<compile_context>
chip_gen: v7x
topology: tpu7x:2x2x1
jax: 0.10.0
libtpu: 0.0.40
codegen_flags: <defaults>
</compile_context>

<pallas_src>
import functools

import jax
import jax.numpy as jnp
from jax.experimental import pallas as pl
from jax.experimental.pallas import tpu as pltpu


# ----------------------------------------------------------------------------
# Static sizes (padded to lane-dense 128-wide tiles).
# ----------------------------------------------------------------------------
C_IN = 3
K = 3
KIN = K * K * C_IN          # 27 real im2col features
KIN_PAD = 32                # contraction padded to 32
C1 = 16                     # stem conv channels (real)
C2 = 64                     # pointwise conv channels (real)
HID = 128                   # classifier hidden
LANE = 128                  # all channel dims padded to 128 lanes
NEG = -1e30                 # bias for padded class lanes (never wins argmax)
N_HEADS = 3                 # router, clean-ID, distorted-ID


def _hswish(x):
    # x * relu6(x + 3) / 6  (torch.nn.Hardswish).  Dtype of x decides whether
    # this runs as f32 or bf16 VPU math.
    return x * jnp.clip(x + 3.0, 0.0, 6.0) * (1.0 / 6.0)


def _use_bf16_act():
    """bf16 VPU elementwise is a win on v6e/v7x; keep f32 on v5e and older."""
    try:
        kind = jax.devices()[0].device_kind.lower()
    except Exception:
        return False
    return any(tag in kind for tag in ("v6", "v7", "7x"))


# ----------------------------------------------------------------------------
# Fused kernel (single program, no grid): for each head h (statically
# unrolled), run the whole classifier:
#   patches (P, 32) @ W_stem (32, 128)  + b -> hardswish
#   ->        @ W_pw   (128, 128)       + b -> hardswish
#   -> (ones(8,P)/P) @ h  (MXU global average pool, broadcast to 8 sublanes)
#   ->        @ W_fc1  (128, 128)       + b -> hardswish
#   ->        @ W_fc2  (128, 128)       + b  -> logits, stored as (8, 128)
# Unrolling all three heads in one program lets the MXU of one head overlap
# the VPU hardswish of another.
# ----------------------------------------------------------------------------
def fused_heads_kernel(patches_ref, w_stem_ref, w_pw_ref, w_fc1_ref,
                       w_fc2_ref, bias_ref, out_ref, *, act_dtype):
    P = patches_ref.shape[0]

    # Hoisted once, shared by all three unrolled heads (no re-splat / re-load).
    patches = patches_ref[...]                              # (P, 32) bf16
    pool_w = jnp.full((8, P), 1.0 / P, jnp.bfloat16)        # GAP as MXU matmul

    for h in range(N_HEADS):                                # static unroll
        b = bias_ref[h]                                     # (4, 128) f32

        # Stem conv (im2col matmul) + hardswish.
        acc = jnp.dot(patches, w_stem_ref[h],
                      preferred_element_type=jnp.float32) + b[0:1, :]
        act = _hswish(acc.astype(act_dtype))                # big (P,128) hswish

        # 1x1 (pointwise) conv + hardswish.
        acc = jnp.dot(act.astype(jnp.bfloat16), w_pw_ref[h],
                      preferred_element_type=jnp.float32) + b[1:2, :]
        act = _hswish(acc.astype(act_dtype))                # big (P,128) hswish

        # Global average pool as an MXU matmul, broadcast across 8 sublanes.
        pooled = jnp.dot(pool_w, act.astype(jnp.bfloat16),
                         preferred_element_type=jnp.float32)   # (8, 128) f32

        # Classifier: Linear -> Hardswish -> (Dropout=identity) -> Linear.
        f = _hswish(jnp.dot(pooled.astype(jnp.bfloat16), w_fc1_ref[h],
                            preferred_element_type=jnp.float32) + b[2:3, :])
        logits = jnp.dot(f.astype(jnp.bfloat16), w_fc2_ref[h],
                         preferred_element_type=jnp.float32) + b[3:4, :]

        out_ref[h] = logits                                 # lane-dense slab


def fused_heads(patches, w_stem, w_pw, w_fc1, w_fc2, bias, *, act_bf16):
    n_heads = w_stem.shape[0]
    kernel = functools.partial(
        fused_heads_kernel,
        act_dtype=jnp.bfloat16 if act_bf16 else jnp.float32)
    vmem = pl.BlockSpec(memory_space=pltpu.MemorySpace.VMEM)
    return pl.pallas_call(
        kernel,
        out_shape=jax.ShapeDtypeStruct((n_heads, 8, LANE), jnp.float32),
        in_specs=[vmem] * 6,     # full arrays resident in VMEM, single program
        out_specs=vmem,
    )(patches, w_stem, w_pw, w_fc1, w_fc2, bias)


# ----------------------------------------------------------------------------
# Plain-JAX glue: normalization + patch extraction (one fused elementwise op
# plus one conv_general_dilated_patches op instead of the 9-slice loop).
# ----------------------------------------------------------------------------
def extract_patches(x_hwc, k=K, stride=2, pad=1):
    H, W, C = x_hwc.shape
    p = jax.lax.conv_general_dilated_patches(
        x_hwc[None],                                 # (1, H, W, C)
        filter_shape=(k, k),
        window_strides=(stride, stride),
        padding=((pad, pad), (pad, pad)),
        dimension_numbers=("NHWC", "HWIO", "NHWC"))  # (1, Ho, Wo, C*k*k)
    Ho = (H + 2 * pad - k) // stride + 1
    Wo = (W + 2 * pad - k) // stride + 1
    patches = p.reshape(Ho * Wo, C * k * k)          # (P, 27)
    patches = jnp.pad(patches, ((0, 0), (0, KIN_PAD - C * k * k)))
    return patches.astype(jnp.bfloat16)


@functools.partial(jax.jit,
                   static_argnames=("ncls_clean", "ncls_dist", "act_bf16"))
def forward_device(img_hwc, stacked_params, ncls_clean, ncls_dist, act_bf16):
    # transforms.Normalize([0.5]*3, [0.5]*3) on a [0,1] tensor, fused to 2x-1.
    x = 2.0 * img_hwc - 1.0
    patches = extract_patches(x)                     # (P, 32) bf16

    out_all = fused_heads(patches, *stacked_params,
                          act_bf16=act_bf16)         # (3, 8, 128) f32

    logits1 = out_all[0, 0, :2]
    logits_c = out_all[1, 0, :ncls_clean]
    logits_d = out_all[2, 0, :ncls_dist]

    is_distorted = jnp.argmax(logits1)
    idx = jnp.where(is_distorted == 0,
                    jnp.argmax(logits_c),
                    jnp.argmax(logits_d))
    route = jnp.stack([is_distorted.astype(jnp.int32), idx.astype(jnp.int32)])
    return route, logits_c, logits_d


# ----------------------------------------------------------------------------
# Deterministic parameter construction (synthetic weights, no checkpoints).
# ----------------------------------------------------------------------------
def make_head_params(seed, ncls):
    key = jax.random.PRNGKey(seed)
    ks = jax.random.split(key, 8)
    w_stem = jnp.zeros((KIN_PAD, LANE), jnp.float32).at[:KIN, :C1].set(
        0.1 * jax.random.normal(ks[0], (KIN, C1), jnp.float32))
    w_pw = jnp.zeros((LANE, LANE), jnp.float32).at[:C1, :C2].set(
        0.1 * jax.random.normal(ks[1], (C1, C2), jnp.float32))
    w_fc1 = jnp.zeros((LANE, LANE), jnp.float32).at[:C2, :HID].set(
        0.1 * jax.random.normal(ks[2], (C2, HID), jnp.float32))
    w_fc2 = jnp.zeros((LANE, LANE), jnp.float32).at[:HID, :ncls].set(
        0.1 * jax.random.normal(ks[3], (HID, ncls), jnp.float32))
    # Biases packed into one (4, 128) buffer: [stem, pw, fc1, fc2], all rows
    # populated (real checkpoints would land here too).
    bias = jnp.zeros((4, LANE), jnp.float32)
    bias = bias.at[0, :C1].set(0.05 * jax.random.normal(ks[4], (C1,)))
    bias = bias.at[1, :C2].set(0.05 * jax.random.normal(ks[5], (C2,)))
    bias = bias.at[2, :HID].set(0.05 * jax.random.normal(ks[6], (HID,)))
    bias = bias.at[3, :ncls].set(0.05 * jax.random.normal(ks[7], (ncls,)))
    bias = bias.at[3, ncls:].set(NEG)   # padded class lanes can never win argmax
    return w_stem, w_pw, w_fc1, w_fc2, bias


def stack_heads(per_head_params):
    ws, wp, w1, w2, bs = zip(*per_head_params)
    return (jnp.stack(ws).astype(jnp.bfloat16),   # (3, 32, 128)
            jnp.stack(wp).astype(jnp.bfloat16),   # (3, 128, 128)
            jnp.stack(w1).astype(jnp.bfloat16),   # (3, 128, 128)
            jnp.stack(w2).astype(jnp.bfloat16),   # (3, 128, 128)
            jnp.stack(bs))                        # (3, 4, 128) f32


# ----------------------------------------------------------------------------
# UnifiedFaceAnalyzer forward: model1 routes to model2 (clean) or model3
# (distorted); return argmax class label of the chosen branch.  One kernel
# launch, one small host readback.
# ----------------------------------------------------------------------------
class UnifiedFaceAnalyzerPallas:
    def __init__(self, num_classes_clean=5, num_classes_distorted=7):
        self.ncls_clean = num_classes_clean
        self.ncls_distorted = num_classes_distorted
        self.act_bf16 = _use_bf16_act()
        self.stacked = stack_heads([
            make_head_params(1, 2),
            make_head_params(2, num_classes_clean),
            make_head_params(3, num_classes_distorted),
        ])
        self.idx_to_class_clean = None       # no json mapping available
        self.idx_to_class_distorted = None

    def forward(self, img_hwc):
        route, logits_c, logits_d = forward_device(
            img_hwc, self.stacked, self.ncls_clean, self.ncls_distorted,
            self.act_bf16)
        # Single device->host sync of two int32 scalars (.item() analogue).
        is_distorted, idx = (int(v) for v in jax.device_get(route))

        if is_distorted == 0:
            out = logits_c
            mapping = self.idx_to_class_clean
        else:
            out = logits_d
            mapping = self.idx_to_class_distorted
        label = mapping.get(idx, f"class_{idx}") if mapping else f"class_{idx}"
        return label, out


if __name__ == "__main__":
    # Synthetic "image": H=32, W=32, C=3, values in [0, 1] (post-ToTensor).
    key = jax.random.PRNGKey(0)
    img = jax.random.uniform(key, (32, 32, 3), dtype=jnp.float32)

    analyzer = UnifiedFaceAnalyzerPallas()
    label, logits = analyzer.forward(img)
    jax.block_until_ready(logits)

    assert isinstance(label, str) and label.startswith("class_")
    assert logits.shape[0] in (analyzer.ncls_clean, analyzer.ncls_distorted)
    print("KERNEL_OK")
</pallas_src>

<mosaic_0001>
module attributes {stable_mosaic.version = 11 : i64} {
  func.func @fused_heads_kernel(%arg0: memref<256x32xbf16, #tpu.memory_space<vmem>>, %arg1: memref<3x32x128xbf16, #tpu.memory_space<vmem>>, %arg2: memref<3x128x128xbf16, #tpu.memory_space<vmem>>, %arg3: memref<3x128x128xbf16, #tpu.memory_space<vmem>>, %arg4: memref<3x128x128xbf16, #tpu.memory_space<vmem>>, %arg5: memref<3x4x128xf32, #tpu.memory_space<vmem>>, %arg6: memref<3x8x128xf32, #tpu.memory_space<vmem>>) attributes {dimension_semantics = [], scalar_prefetch = 0 : i64, scratch_operands = 0 : i64, tpu.core_type = #tpu.core_type<tc>} {
    %c0 = arith.constant 0 : index
    %c0_0 = arith.constant 0 : index
    %0 = vector.load %arg0[%c0, %c0_0] : memref<256x32xbf16, #tpu.memory_space<vmem>>, vector<256x32xbf16>
    %cst = arith.constant 3.906250e-03 : bf16
    %1 = vector.broadcast %cst : bf16 to vector<8x256xbf16>
    %c0_1 = arith.constant 0 : index
    %c0_2 = arith.constant 0 : index
    %c0_3 = arith.constant 0 : index
    %2 = vector.load %arg5[%c0_1, %c0_2, %c0_3] : memref<3x4x128xf32, #tpu.memory_space<vmem>>, vector<1x4x128xf32>
    %3 = vector.shape_cast %2 : vector<1x4x128xf32> to vector<4x128xf32>
    %c0_4 = arith.constant 0 : index
    %c0_5 = arith.constant 0 : index
    %c0_6 = arith.constant 0 : index
    %4 = vector.load %arg1[%c0_4, %c0_5, %c0_6] : memref<3x32x128xbf16, #tpu.memory_space<vmem>>, vector<1x32x128xbf16>
    %5 = vector.shape_cast %4 : vector<1x32x128xbf16> to vector<32x128xbf16>
    %cst_7 = arith.constant dense<0.000000e+00> : vector<256x128xf32>
    %6 = tpu.matmul %0, %5, %cst_7 {dimension_numbers = #tpu.dot_dimension_numbers<[1], [0], [0], [1], [0, 0, 1, 1], [], []>} : vector<256x32xbf16>, vector<32x128xbf16>, vector<256x128xf32> -> vector<256x128xf32>
    %7 = vector.extract_strided_slice %3 {offsets = [0, 0], sizes = [1, 128], strides = [1, 1]} : vector<4x128xf32> to vector<1x128xf32>
    %8 = vector.broadcast %7 : vector<1x128xf32> to vector<256x128xf32>
    %9 = arith.addf %6, %8 : vector<256x128xf32>
    %cst_8 = arith.constant 3.000000e+00 : f32
    %10 = vector.broadcast %cst_8 : f32 to vector<256x128xf32>
    %11 = arith.addf %9, %10 : vector<256x128xf32>
    %cst_9 = arith.constant 0.000000e+00 : f32
    %cst_10 = arith.constant 6.000000e+00 : f32
    %12 = vector.broadcast %cst_9 : f32 to vector<256x128xf32>
    %13 = arith.maximumf %12, %11 : vector<256x128xf32>
    %14 = vector.broadcast %cst_10 : f32 to vector<256x128xf32>
    %15 = arith.minimumf %14, %13 : vector<256x128xf32>
    %16 = arith.mulf %9, %15 : vector<256x128xf32>
    %cst_11 = arith.constant 0.166666672 : f32
    %17 = vector.broadcast %cst_11 : f32 to vector<256x128xf32>
    %18 = arith.mulf %16, %17 : vector<256x128xf32>
    %19 = arith.truncf %18 : vector<256x128xf32> to vector<256x128xbf16>
    %c0_12 = arith.constant 0 : index
    %c0_13 = arith.constant 0 : index
    %c0_14 = arith.constant 0 : index
    %20 = vector.load %arg2[%c0_12, %c0_13, %c0_14] : memref<3x128x128xbf16, #tpu.memory_space<vmem>>, vector<1x128x128xbf16>
    %21 = vector.shape_cast %20 : vector<1x128x128xbf16> to vector<128x128xbf16>
    %cst_15 = arith.constant dense<0.000000e+00> : vector<256x128xf32>
    %22 = tpu.matmul %19, %21, %cst_15 {dimension_numbers = #tpu.dot_dimension_numbers<[1], [0], [0], [1], [0, 0, 1, 1], [], []>} : vector<256x128xbf16>, vector<128x128xbf16>, vector<256x128xf32> -> vector<256x128xf32>
    %23 = vector.extract_strided_slice %3 {offsets = [1, 0], sizes = [1, 128], strides = [1, 1]} : vector<4x128xf32> to vector<1x128xf32>
    %24 = vector.broadcast %23 : vector<1x128xf32> to vector<256x128xf32>
    %25 = arith.addf %22, %24 : vector<256x128xf32>
    %cst_16 = arith.constant 3.000000e+00 : f32
    %26 = vector.broadcast %cst_16 : f32 to vector<256x128xf32>
    %27 = arith.addf %25, %26 : vector<256x128xf32>
    %cst_17 = arith.constant 0.000000e+00 : f32
    %cst_18 = arith.constant 6.000000e+00 : f32
    %28 = vector.broadcast %cst_17 : f32 to vector<256x128xf32>
    %29 = arith.maximumf %28, %27 : vector<256x128xf32>
    %30 = vector.broadcast %cst_18 : f32 to vector<256x128xf32>
    %31 = arith.minimumf %30, %29 : vector<256x128xf32>
    %32 = arith.mulf %25, %31 : vector<256x128xf32>
    %cst_19 = arith.constant 0.166666672 : f32
    %33 = vector.broadcast %cst_19 : f32 to vector<256x128xf32>
    %34 = arith.mulf %32, %33 : vector<256x128xf32>
    %35 = arith.truncf %34 : vector<256x128xf32> to vector<256x128xbf16>
    %cst_20 = arith.constant dense<0.000000e+00> : vector<8x128xf32>
    %36 = tpu.matmul %1, %35, %cst_20 {dimension_numbers = #tpu.dot_dimension_numbers<[1], [0], [0], [1], [0, 0, 1, 1], [], []>} : vector<8x256xbf16>, vector<256x128xbf16>, vector<8x128xf32> -> vector<8x128xf32>
    %37 = arith.truncf %36 : vector<8x128xf32> to vector<8x128xbf16>
    %c0_21 = arith.constant 0 : index
    %c0_22 = arith.constant 0 : index
    %c0_23 = arith.constant 0 : index
    %38 = vector.load %arg3[%c0_21, %c0_22, %c0_23] : memref<3x128x128xbf16, #tpu.memory_space<vmem>>, vector<1x128x128xbf16>
    %39 = vector.shape_cast %38 : vector<1x128x128xbf16> to vector<128x128xbf16>
    %cst_24 = arith.constant dense<0.000000e+00> : vector<8x128xf32>
    %40 = tpu.matmul %37, %39, %cst_24 {dimension_numbers = #tpu.dot_dimension_numbers<[1], [0], [0], [1], [0, 0, 1, 1], [], []>} : vector<8x128xbf16>, vector<128x128xbf16>, vector<8x128xf32> -> vector<8x128xf32>
    %41 = vector.extract_strided_slice %3 {offsets = [2, 0], sizes = [1, 128], strides = [1, 1]} : vector<4x128xf32> to vector<1x128xf32>
    %42 = vector.broadcast %41 : vector<1x128xf32> to vector<8x128xf32>
    %43 = arith.addf %40, %42 : vector<8x128xf32>
    %cst_25 = arith.constant 3.000000e+00 : f32
    %44 = vector.broadcast %cst_25 : f32 to vector<8x128xf32>
    %45 = arith.addf %43, %44 : vector<8x128xf32>
    %cst_26 = arith.constant 0.000000e+00 : f32
    %cst_27 = arith.constant 6.000000e+00 : f32
    %46 = vector.broadcast %cst_26 : f32 to vector<8x128xf32>
    %47 = arith.maximumf %46, %45 : vector<8x128xf32>
    %48 = vector.broadcast %cst_27 : f32 to vector<8x128xf32>
    %49 = arith.minimumf %48, %47 : vector<8x128xf32>
    %50 = arith.mulf %43, %49 : vector<8x128xf32>
    %cst_28 = arith.constant 0.166666672 : f32
    %51 = vector.broadcast %cst_28 : f32 to vector<8x128xf32>
    %52 = arith.mulf %50, %51 : vector<8x128xf32>
    %53 = arith.truncf %52 : vector<8x128xf32> to vector<8x128xbf16>
    %c0_29 = arith.constant 0 : index
    %c0_30 = arith.constant 0 : index
    %c0_31 = arith.constant 0 : index
    %54 = vector.load %arg4[%c0_29, %c0_30, %c0_31] : memref<3x128x128xbf16, #tpu.memory_space<vmem>>, vector<1x128x128xbf16>
    %55 = vector.shape_cast %54 : vector<1x128x128xbf16> to vector<128x128xbf16>
    %cst_32 = arith.constant dense<0.000000e+00> : vector<8x128xf32>
    %56 = tpu.matmul %53, %55, %cst_32 {dimension_numbers = #tpu.dot_dimension_numbers<[1], [0], [0], [1], [0, 0, 1, 1], [], []>} : vector<8x128xbf16>, vector<128x128xbf16>, vector<8x128xf32> -> vector<8x128xf32>
    %57 = vector.extract_strided_slice %3 {offsets = [3, 0], sizes = [1, 128], strides = [1, 1]} : vector<4x128xf32> to vector<1x128xf32>
    %58 = vector.broadcast %57 : vector<1x128xf32> to vector<8x128xf32>
    %59 = arith.addf %56, %58 : vector<8x128xf32>
    %c0_33 = arith.constant 0 : index
    %c0_34 = arith.constant 0 : index
    %c0_35 = arith.constant 0 : index
    %60 = vector.load %arg6[%c0_33, %c0_34, %c0_35] : memref<3x8x128xf32, #tpu.memory_space<vmem>>, vector<1x8x128xf32>
    %61 = vector.shape_cast %60 : vector<1x8x128xf32> to vector<8x128xf32>
    %62 = vector.shape_cast %59 : vector<8x128xf32> to vector<1x8x128xf32>
    tpu.vector_store %arg6[%c0_33, %c0_34, %c0_35], %62 {strides = array<i32>} : memref<3x8x128xf32, #tpu.memory_space<vmem>>, vector<1x8x128xf32>,
    %c1 = arith.constant 1 : index
    %c0_36 = arith.constant 0 : index
    %c0_37 = arith.constant 0 : index
    %63 = vector.load %arg5[%c1, %c0_36, %c0_37] : memref<3x4x128xf32, #tpu.memory_space<vmem>>, vector<1x4x128xf32>
    %64 = vector.shape_cast %63 : vector<1x4x128xf32> to vector<4x128xf32>
    %c1_38 = arith.constant 1 : index
    %c0_39 = arith.constant 0 : index
    %c0_40 = arith.constant 0 : index
    %65 = vector.load %arg1[%c1_38, %c0_39, %c0_40] : memref<3x32x128xbf16, #tpu.memory_space<vmem>>, vector<1x32x128xbf16>
    %66 = vector.shape_cast %65 : vector<1x32x128xbf16> to vector<32x128xbf16>
    %cst_41 = arith.constant dense<0.000000e+00> : vector<256x128xf32>
    %67 = tpu.matmul %0, %66, %cst_41 {dimension_numbers = #tpu.dot_dimension_numbers<[1], [0], [0], [1], [0, 0, 1, 1], [], []>} : vector<256x32xbf16>, vector<32x128xbf16>, vector<256x128xf32> -> vector<256x128xf32>
    %68 = vector.extract_strided_slice %64 {offsets = [0, 0], sizes = [1, 128], strides = [1, 1]} : vector<4x128xf32> to vector<1x128xf32>
    %69 = vector.broadcast %68 : vector<1x128xf32> to vector<256x128xf32>
    %70 = arith.addf %67, %69 : vector<256x128xf32>
    %cst_42 = arith.constant 3.000000e+00 : f32
    %71 = vector.broadcast %cst_42 : f32 to vector<256x128xf32>
    %72 = arith.addf %70, %71 : vector<256x128xf32>
    %cst_43 = arith.constant 0.000000e+00 : f32
    %cst_44 = arith.constant 6.000000e+00 : f32
    %73 = vector.broadcast %cst_43 : f32 to vector<256x128xf32>
    %74 = arith.maximumf %73, %72 : vector<256x128xf32>
    %75 = vector.broadcast %cst_44 : f32 to vector<256x128xf32>
    %76 = arith.minimumf %75, %74 : vector<256x128xf32>
    %77 = arith.mulf %70, %76 : vector<256x128xf32>
    %cst_45 = arith.constant 0.166666672 : f32
    %78 = vector.broadcast %cst_45 : f32 to vector<256x128xf32>
    %79 = arith.mulf %77, %78 : vector<256x128xf32>
    %80 = arith.truncf %79 : vector<256x128xf32> to vector<256x128xbf16>
    %c1_46 = arith.constant 1 : index
    %c0_47 = arith.constant 0 : index
    %c0_48 = arith.constant 0 : index
    %81 = vector.load %arg2[%c1_46, %c0_47, %c0_48] : memref<3x128x128xbf16, #tpu.memory_space<vmem>>, vector<1x128x128xbf16>
    %82 = vector.shape_cast %81 : vector<1x128x128xbf16> to vector<128x128xbf16>
    %cst_49 = arith.constant dense<0.000000e+00> : vector<256x128xf32>
    %83 = tpu.matmul %80, %82, %cst_49 {dimension_numbers = #tpu.dot_dimension_numbers<[1], [0], [0], [1], [0, 0, 1, 1], [], []>} : vector<256x128xbf16>, vector<128x128xbf16>, vector<256x128xf32> -> vector<256x128xf32>
    %84 = vector.extract_strided_slice %64 {offsets = [1, 0], sizes = [1, 128], strides = [1, 1]} : vector<4x128xf32> to vector<1x128xf32>
    %85 = vector.broadcast %84 : vector<1x128xf32> to vector<256x128xf32>
    %86 = arith.addf %83, %85 : vector<256x128xf32>
    %cst_50 = arith.constant 3.000000e+00 : f32
    %87 = vector.broadcast %cst_50 : f32 to vector<256x128xf32>
    %88 = arith.addf %86, %87 : vector<256x128xf32>
    %cst_51 = arith.constant 0.000000e+00 : f32
    %cst_52 = arith.constant 6.000000e+00 : f32
    %89 = vector.broadcast %cst_51 : f32 to vector<256x128xf32>
    %90 = arith.maximumf %89, %88 : vector<256x128xf32>
    %91 = vector.broadcast %cst_52 : f32 to vector<256x128xf32>
    %92 = arith.minimumf %91, %90 : vector<256x128xf32>
    %93 = arith.mulf %86, %92 : vector<256x128xf32>
    %cst_53 = arith.constant 0.166666672 : f32
    %94 = vector.broadcast %cst_53 : f32 to vector<256x128xf32>
    %95 = arith.mulf %93, %94 : vector<256x128xf32>
    %96 = arith.truncf %95 : vector<256x128xf32> to vector<256x128xbf16>
    %cst_54 = arith.constant dense<0.000000e+00> : vector<8x128xf32>
    %97 = tpu.matmul %1, %96, %cst_54 {dimension_numbers = #tpu.dot_dimension_numbers<[1], [0], [0], [1], [0, 0, 1, 1], [], []>} : vector<8x256xbf16>, vector<256x128xbf16>, vector<8x128xf32> -> vector<8x128xf32>
    %98 = arith.truncf %97 : vector<8x128xf32> to vector<8x128xbf16>
    %c1_55 = arith.constant 1 : index
    %c0_56 = arith.constant 0 : index
    %c0_57 = arith.constant 0 : index
    %99 = vector.load %arg3[%c1_55, %c0_56, %c0_57] : memref<3x128x128xbf16, #tpu.memory_space<vmem>>, vector<1x128x128xbf16>
    %100 = vector.shape_cast %99 : vector<1x128x128xbf16> to vector<128x128xbf16>
    %cst_58 = arith.constant dense<0.000000e+00> : vector<8x128xf32>
    %101 = tpu.matmul %98, %100, %cst_58 {dimension_numbers = #tpu.dot_dimension_numbers<[1], [0], [0], [1], [0, 0, 1, 1], [], []>} : vector<8x128xbf16>, vector<128x128xbf16>, vector<8x128xf32> -> vector<8x128xf32>
    %102 = vector.extract_strided_slice %64 {offsets = [2, 0], sizes = [1, 128], strides = [1, 1]} : vector<4x128xf32> to vector<1x128xf32>
    %103 = vector.broadcast %102 : vector<1x128xf32> to vector<8x128xf32>
    %104 = arith.addf %101, %103 : vector<8x128xf32>
    %cst_59 = arith.constant 3.000000e+00 : f32
    %105 = vector.broadcast %cst_59 : f32 to vector<8x128xf32>
    %106 = arith.addf %104, %105 : vector<8x128xf32>
    %cst_60 = arith.constant 0.000000e+00 : f32
    %cst_61 = arith.constant 6.000000e+00 : f32
    %107 = vector.broadcast %cst_60 : f32 to vector<8x128xf32>
    %108 = arith.maximumf %107, %106 : vector<8x128xf32>
    %109 = vector.broadcast %cst_61 : f32 to vector<8x128xf32>
    %110 = arith.minimumf %109, %108 : vector<8x128xf32>
    %111 = arith.mulf %104, %110 : vector<8x128xf32>
    %cst_62 = arith.constant 0.166666672 : f32
    %112 = vector.broadcast %cst_62 : f32 to vector<8x128xf32>
    %113 = arith.mulf %111, %112 : vector<8x128xf32>
    %114 = arith.truncf %113 : vector<8x128xf32> to vector<8x128xbf16>
    %c1_63 = arith.constant 1 : index
    %c0_64 = arith.constant 0 : index
    %c0_65 = arith.constant 0 : index
    %115 = vector.load %arg4[%c1_63, %c0_64, %c0_65] : memref<3x128x128xbf16, #tpu.memory_space<vmem>>, vector<1x128x128xbf16>
    %116 = vector.shape_cast %115 : vector<1x128x128xbf16> to vector<128x128xbf16>
    %cst_66 = arith.constant dense<0.000000e+00> : vector<8x128xf32>
    %117 = tpu.matmul %114, %116, %cst_66 {dimension_numbers = #tpu.dot_dimension_numbers<[1], [0], [0], [1], [0, 0, 1, 1], [], []>} : vector<8x128xbf16>, vector<128x128xbf16>, vector<8x128xf32> -> vector<8x128xf32>
    %118 = vector.extract_strided_slice %64 {offsets = [3, 0], sizes = [1, 128], strides = [1, 1]} : vector<4x128xf32> to vector<1x128xf32>
    %119 = vector.broadcast %118 : vector<1x128xf32> to vector<8x128xf32>
    %120 = arith.addf %117, %119 : vector<8x128xf32>
    %c1_67 = arith.constant 1 : index
    %c0_68 = arith.constant 0 : index
    %c0_69 = arith.constant 0 : index
    %121 = vector.load %arg6[%c1_67, %c0_68, %c0_69] : memref<3x8x128xf32, #tpu.memory_space<vmem>>, vector<1x8x128xf32>
    %122 = vector.shape_cast %121 : vector<1x8x128xf32> to vector<8x128xf32>
    %123 = vector.shape_cast %120 : vector<8x128xf32> to vector<1x8x128xf32>
    tpu.vector_store %arg6[%c1_67, %c0_68, %c0_69], %123 {strides = array<i32>} : memref<3x8x128xf32, #tpu.memory_space<vmem>>, vector<1x8x128xf32>,
    %c2 = arith.constant 2 : index
    %c0_70 = arith.constant 0 : index
    %c0_71 = arith.constant 0 : index
    %124 = vector.load %arg5[%c2, %c0_70, %c0_71] : memref<3x4x128xf32, #tpu.memory_space<vmem>>, vector<1x4x128xf32>
    %125 = vector.shape_cast %124 : vector<1x4x128xf32> to vector<4x128xf32>
    %c2_72 = arith.constant 2 : index
    %c0_73 = arith.constant 0 : index
    %c0_74 = arith.constant 0 : index
    %126 = vector.load %arg1[%c2_72, %c0_73, %c0_74] : memref<3x32x128xbf16, #tpu.memory_space<vmem>>, vector<1x32x128xbf16>
    %127 = vector.shape_cast %126 : vector<1x32x128xbf16> to vector<32x128xbf16>
    %cst_75 = arith.constant dense<0.000000e+00> : vector<256x128xf32>
    %128 = tpu.matmul %0, %127, %cst_75 {dimension_numbers = #tpu.dot_dimension_numbers<[1], [0], [0], [1], [0, 0, 1, 1], [], []>} : vector<256x32xbf16>, vector<32x128xbf16>, vector<256x128xf32> -> vector<256x128xf32>
    %129 = vector.extract_strided_slice %125 {offsets = [0, 0], sizes = [1, 128], strides = [1, 1]} : vector<4x128xf32> to vector<1x128xf32>
    %130 = vector.broadcast %129 : vector<1x128xf32> to vector<256x128xf32>
    %131 = arith.addf %128, %130 : vector<256x128xf32>
    %cst_76 = arith.constant 3.000000e+00 : f32
    %132 = vector.broadcast %cst_76 : f32 to vector<256x128xf32>
    %133 = arith.addf %131, %132 : vector<256x128xf32>
    %cst_77 = arith.constant 0.000000e+00 : f32
    %cst_78 = arith.constant 6.000000e+00 : f32
    %134 = vector.broadcast %cst_77 : f32 to vector<256x128xf32>
    %135 = arith.maximumf %134, %133 : vector<256x128xf32>
    %136 = vector.broadcast %cst_78 : f32 to vector<256x128xf32>
    %137 = arith.minimumf %136, %135 : vector<256x128xf32>
    %138 = arith.mulf %131, %137 : vector<256x128xf32>
    %cst_79 = arith.constant 0.166666672 : f32
    %139 = vector.broadcast %cst_79 : f32 to vector<256x128xf32>
    %140 = arith.mulf %138, %139 : vector<256x128xf32>
    %141 = arith.truncf %140 : vector<256x128xf32> to vector<256x128xbf16>
    %c2_80 = arith.constant 2 : index
    %c0_81 = arith.constant 0 : index
    %c0_82 = arith.constant 0 : index
    %142 = vector.load %arg2[%c2_80, %c0_81, %c0_82] : memref<3x128x128xbf16, #tpu.memory_space<vmem>>, vector<1x128x128xbf16>
    %143 = vector.shape_cast %142 : vector<1x128x128xbf16> to vector<128x128xbf16>
    %cst_83 = arith.constant dense<0.000000e+00> : vector<256x128xf32>
    %144 = tpu.matmul %141, %143, %cst_83 {dimension_numbers = #tpu.dot_dimension_numbers<[1], [0], [0], [1], [0, 0, 1, 1], [], []>} : vector<256x128xbf16>, vector<128x128xbf16>, vector<256x128xf32> -> vector<256x128xf32>
    %145 = vector.extract_strided_slice %125 {offsets = [1, 0], sizes = [1, 128], strides = [1, 1]} : vector<4x128xf32> to vector<1x128xf32>
    %146 = vector.broadcast %145 : vector<1x128xf32> to vector<256x128xf32>
    %147 = arith.addf %144, %146 : vector<256x128xf32>
    %cst_84 = arith.constant 3.000000e+00 : f32
    %148 = vector.broadcast %cst_84 : f32 to vector<256x128xf32>
    %149 = arith.addf %147, %148 : vector<256x128xf32>
    %cst_85 = arith.constant 0.000000e+00 : f32
    %cst_86 = arith.constant 6.000000e+00 : f32
    %150 = vector.broadcast %cst_85 : f32 to vector<256x128xf32>
    %151 = arith.maximumf %150, %149 : vector<256x128xf32>
    %152 = vector.broadcast %cst_86 : f32 to vector<256x128xf32>
    %153 = arith.minimumf %152, %151 : vector<256x128xf32>
    %154 = arith.mulf %147, %153 : vector<256x128xf32>
    %cst_87 = arith.constant 0.166666672 : f32
    %155 = vector.broadcast %cst_87 : f32 to vector<256x128xf32>
    %156 = arith.mulf %154, %155 : vector<256x128xf32>
    %157 = arith.truncf %156 : vector<256x128xf32> to vector<256x128xbf16>
    %cst_88 = arith.constant dense<0.000000e+00> : vector<8x128xf32>
    %158 = tpu.matmul %1, %157, %cst_88 {dimension_numbers = #tpu.dot_dimension_numbers<[1], [0], [0], [1], [0, 0, 1, 1], [], []>} : vector<8x256xbf16>, vector<256x128xbf16>, vector<8x128xf32> -> vector<8x128xf32>
    %159 = arith.truncf %158 : vector<8x128xf32> to vector<8x128xbf16>
    %c2_89 = arith.constant 2 : index
    %c0_90 = arith.constant 0 : index
    %c0_91 = arith.constant 0 : index
    %160 = vector.load %arg3[%c2_89, %c0_90, %c0_91] : memref<3x128x128xbf16, #tpu.memory_space<vmem>>, vector<1x128x128xbf16>
    %161 = vector.shape_cast %160 : vector<1x128x128xbf16> to vector<128x128xbf16>
    %cst_92 = arith.constant dense<0.000000e+00> : vector<8x128xf32>
    %162 = tpu.matmul %159, %161, %cst_92 {dimension_numbers = #tpu.dot_dimension_numbers<[1], [0], [0], [1], [0, 0, 1, 1], [], []>} : vector<8x128xbf16>, vector<128x128xbf16>, vector<8x128xf32> -> vector<8x128xf32>
    %163 = vector.extract_strided_slice %125 {offsets = [2, 0], sizes = [1, 128], strides = [1, 1]} : vector<4x128xf32> to vector<1x128xf32>
    %164 = vector.broadcast %163 : vector<1x128xf32> to vector<8x128xf32>
    %165 = arith.addf %162, %164 : vector<8x128xf32>
    %cst_93 = arith.constant 3.000000e+00 : f32
    %166 = vector.broadcast %cst_93 : f32 to vector<8x128xf32>
    %167 = arith.addf %165, %166 : vector<8x128xf32>
    %cst_94 = arith.constant 0.000000e+00 : f32
    %cst_95 = arith.constant 6.000000e+00 : f32
    %168 = vector.broadcast %cst_94 : f32 to vector<8x128xf32>
    %169 = arith.maximumf %168, %167 : vector<8x128xf32>
    %170 = vector.broadcast %cst_95 : f32 to vector<8x128xf32>
    %171 = arith.minimumf %170, %169 : vector<8x128xf32>
    %172 = arith.mulf %165, %171 : vector<8x128xf32>
    %cst_96 = arith.constant 0.166666672 : f32
    %173 = vector.broadcast %cst_96 : f32 to vector<8x128xf32>
    %174 = arith.mulf %172, %173 : vector<8x128xf32>
    %175 = arith.truncf %174 : vector<8x128xf32> to vector<8x128xbf16>
    %c2_97 = arith.constant 2 : index
    %c0_98 = arith.constant 0 : index
    %c0_99 = arith.constant 0 : index
    %176 = vector.load %arg4[%c2_97, %c0_98, %c0_99] : memref<3x128x128xbf16, #tpu.memory_space<vmem>>, vector<1x128x128xbf16>
    %177 = vector.shape_cast %176 : vector<1x128x128xbf16> to vector<128x128xbf16>
    %cst_100 = arith.constant dense<0.000000e+00> : vector<8x128xf32>
    %178 = tpu.matmul %175, %177, %cst_100 {dimension_numbers = #tpu.dot_dimension_numbers<[1], [0], [0], [1], [0, 0, 1, 1], [], []>} : vector<8x128xbf16>, vector<128x128xbf16>, vector<8x128xf32> -> vector<8x128xf32>
    %179 = vector.extract_strided_slice %125 {offsets = [3, 0], sizes = [1, 128], strides = [1, 1]} : vector<4x128xf32> to vector<1x128xf32>
    %180 = vector.broadcast %179 : vector<1x128xf32> to vector<8x128xf32>
    %181 = arith.addf %178, %180 : vector<8x128xf32>
    %c2_101 = arith.constant 2 : index
    %c0_102 = arith.constant 0 : index
    %c0_103 = arith.constant 0 : index
    %182 = vector.load %arg6[%c2_101, %c0_102, %c0_103] : memref<3x8x128xf32, #tpu.memory_space<vmem>>, vector<1x8x128xf32>
    %183 = vector.shape_cast %182 : vector<1x8x128xf32> to vector<8x128xf32>
    %184 = vector.shape_cast %181 : vector<8x128xf32> to vector<1x8x128xf32>
    tpu.vector_store %arg6[%c2_101, %c0_102, %c0_103], %184 {strides = array<i32>} : memref<3x8x128xf32, #tpu.memory_space<vmem>>, vector<1x8x128xf32>,
    return
  }
}

</mosaic_0001>

<bundles_post_ra>
// kernel: forward_device.1
= control target key start
LH: loop header
LB: loop body
LE: loop exit
PB: predicated region body
PF: predicated region fallthrough
CT: control target
= control target key end

     0   :  { %vm158_vm0 = vcmask 261120   ;;  %v62_v26 = vlaneseq  ;;  %vm4285_vm1 = vmmov 0   ;;  %s5462_s1 = inlined_call_operand.vmem [shape: bf16[3,32,128], index: 1, kind: input, shape index: {}]   ;;  %s5463_s0 = inlined_call_operand.vmem [shape: bf16[256,32], index: 0, kind: input, shape index: {}]   ;;  %s5464_s2 = inlined_call_operand.vmem [shape: bf16[3,128,128], index: 2, kind: input, shape index: {}]   ;;  %s5465_s5 = inlined_call_operand.vmem [shape: f32[3,4,128], index: 5, kind: input, shape index: {}]   ;;  %s5466_s3 = inlined_call_operand.vmem [shape: bf16[3,128,128], index: 3, kind: input, shape index: {}]   ;;  %s5467_s4 = inlined_call_operand.vmem [shape: bf16[3,128,128], index: 4, kind: input, shape index: {}]   ;;  %s5468_s6 = inlined_call_operand.vmem [shape: f32[3,8,128], index: 6, kind: output, shape index: {}]  }
   0x1   :  { %v4154_v0 = vld [vmem:[%s5462_s1] sm:$0xff]   ;;  %v4155_v1 = vld [vmem:[%s5462_s1 + $0x8] sm:$0xff]   ;;  %v4158_v4 = vld [vmem:[%s5463_s0 + $0x10] sm:$0xff]  }
   0x2   :  { %3779 = vmatprep.subr.bf16.mxu0 %v4154_v0  ;;  %v4156_v2 = vld [vmem:[%s5463_s0] sm:$0xff]   ;;  %v4157_v3 = vld [vmem:[%s5463_s0 + $0x8] sm:$0xff]   ;;  %v4159_v5 = vld [vmem:[%s5463_s0 + $0x18] sm:$0xff]   ;;  %v4415_v27 = vshrl.u32 %v62_v26, 7 }
   0x3   :  { %3780 = vmatpush3.bf16.msra.mxu0 %v4154_v0  ;;  %3783 = vmatprep.mubr.msk.bf16.mxu0 %vm158_vm0, %v4156_v2  ;;  %v4160_v6 = vld [vmem:[%s5463_s0 + $0x20] sm:$0xff]   ;;  %v4173_v8 = vld [vmem:[%s5464_s2 + $0x8] sm:$0xff]   ;;  %v4162_v10 = vld [vmem:[%s5463_s0 + $0x30] sm:$0xff]  }
   0x4   :  { %3781 = vmatprep.subr.bf16.mxu0 %v4155_v1  ;;  %v4172_v7 = vld [vmem:[%s5464_s2] sm:$0xff]   ;;  %v4161_v9 = vld [vmem:[%s5463_s0 + $0x28] sm:$0xff]   ;;  %v4174_v11 = vld [vmem:[%s5464_s2 + $0x10] sm:$0xff]   ;;  %v4418_v28 = vsub.s32 0, %v4415_v27 }
   0x5   :  { %3815 = vmatprep.subr.bf16.mxu1 %v4172_v7  ;;  %v4175_v12 = vld [vmem:[%s5464_s2 + $0x18] sm:$0xff]   ;;  %v4164_v14 = vld [vmem:[%s5463_s0 + $0x40] sm:$0xff]   ;;  %v4165_v15 = vld [vmem:[%s5463_s0 + $0x48] sm:$0xff]  }
   0x6   :  { %3816 = vmatpush3.bf16.msra.mxu1 %v4172_v7  ;;  %v4163_v13 = vld [vmem:[%s5463_s0 + $0x38] sm:$0xff]   ;;  %v4166_v16 = vld [vmem:[%s5463_s0 + $0x50] sm:$0xff]   ;;  %v4168_v18 = vld [vmem:[%s5463_s0 + $0x60] sm:$0xff]  }
   0x7   :  { %3782 = vmatpush3.bf16.msra.mxu0 %v4155_v1  ;;  %3817 = vmatprep.subr.bf16.mxu1 %v4173_v8  ;;  %v4167_v17 = vld [vmem:[%s5463_s0 + $0x58] sm:$0xff]   ;;  %v4169_v19 = vld [vmem:[%s5463_s0 + $0x68] sm:$0xff]   ;;  %v4170_v20 = vld [vmem:[%s5463_s0 + $0x70] sm:$0xff]  }
   0x8   :  { %v4171_v21 = vld [vmem:[%s5463_s0 + $0x78] sm:$0xff]   ;;  %v4176_v22 = vld [vmem:[%s5464_s2 + $0x20] sm:$0xff]   ;;  %v4177_v23 = vld [vmem:[%s5464_s2 + $0x28] sm:$0xff]  }
   0x9   :  { %v4178_v24 = vld [vmem:[%s5464_s2 + $0x30] sm:$0xff]   ;;  %v4179_v25 = vld [vmem:[%s5464_s2 + $0x38] sm:$0xff]   ;;  %v4423_v29 = vld [vmem:[%s5465_s5] sm:$0xf] }
   0xa   :  { %3784 = vmatmul.mubr.msk.bf16.vlgmr.msra.gmra.mrb[0].mxu0 %vm158_vm0, %v4157_v3  ;;  %3818 = vmatpush3.bf16.msra.mxu1 %v4173_v8  ;;  %v4427_v30 = vrot.slane %v4423_v29, %v4418_v28 }
   0xb   :  { %3787 = vmatprep.mubr.msk.bf16.mxu0 %vm158_vm0, %v4158_v4  ;;  %3819 = vmatprep.subr.bf16.mxu1 %v4174_v11 }
   0xe   :  { %3820 = vmatpush3.bf16.msra.mxu1 %v4174_v11 }
   0xf   :  { %3821 = vmatprep.subr.bf16.mxu1 %v4175_v12 }
  0x12   :  { %3788 = vmatmul.mubr.msk.bf16.gmra.mrb[4].mxu0 %vm158_vm0, %v4159_v5  ;;  %3822 = vmatpush3.bf16.msra.mxu1 %v4175_v12 }
  0x13   :  { %3791 = vmatprep.mubr.msk.bf16.mxu0 %vm158_vm0, %v4160_v6  ;;  %3823 = vmatprep.subr.bf16.mxu1 %v4176_v22 }
  0x16   :  { %3824 = vmatpush3.bf16.msra.mxu1 %v4176_v22 }
  0x17   :  { %3825 = vmatprep.subr.bf16.mxu1 %v4177_v23 }
  0x1a   :  { %3792 = vmatmul.mubr.msk.bf16.gmra.mrb[8].mxu0 %vm158_vm0, %v4161_v9  ;;  %3826 = vmatpush3.bf16.msra.mxu1 %v4177_v23 }
  0x1b   :  { %3795 = vmatprep.mubr.msk.bf16.mxu0 %vm158_vm0, %v4162_v10  ;;  %3827 = vmatprep.subr.bf16.mxu1 %v4178_v24 }
  0x1e   :  { %3828 = vmatpush3.bf16.msra.mxu1 %v4178_v24 }
  0x1f   :  { %3829 = vmatprep.subr.bf16.mxu1 %v4179_v25 }
  0x22   :  { %3796 = vmatmul.mubr.msk.bf16.gmra.mrb[12].mxu0 %vm158_vm0, %v4163_v13  ;;  %3830 = vmatpush3.bf16.msra.mxu1 %v4179_v25 }
  0x23   :  { %3799 = vmatprep.mubr.msk.bf16.mxu0 %vm158_vm0, %v4164_v14 }
  0x2a   :  { %3800 = vmatmul.mubr.msk.bf16.gmra.mrb[16].mxu0 %vm158_vm0, %v4165_v15 }
  0x2b   :  { %3803 = vmatprep.mubr.msk.bf16.mxu0 %vm158_vm0, %v4166_v16 }
  0x32   :  { %3804 = vmatmul.mubr.msk.bf16.gmra.mrb[20].mxu0 %vm158_vm0, %v4167_v17 }
  0x33   :  { %3807 = vmatprep.mubr.msk.bf16.mxu0 %vm158_vm0, %v4168_v18 }
  0x3a   :  { %3808 = vmatmul.mubr.msk.bf16.gmra.mrb[24].mxu0 %vm158_vm0, %v4169_v19 }
  0x3b   :  { %3811 = vmatprep.mubr.msk.bf16.mxu0 %vm158_vm0, %v4170_v20 }
  0x42   :  { %3812 = vmatmul.mubr.msk.bf16.gmra.mrb[28].mxu0 %vm158_vm0, %v4171_v21 }
  0xdd   :  { %v3785_v31 = vpop.f32.mrb[0].mxu0 }
  0xde   :  { %v250_v32 = vadd.f32 %v3785_v31, %v4427_v30  ;;  %v241_v33 = vpop.f32.mrb[1].mxu0 }
  0xdf   :  { %v242_v34 = vadd.f32 %v241_v33, %v4427_v30  ;;  %v3786_v35 = vpop.f32.mrb[2].mxu0 }
  0xe0   :  { %v370_v36 = vadd.f32 3.0, %v250_v32  ;;  %v253_v37 = vadd.f32 %v3786_v35, %v4427_v30  ;;  %v244_v38 = vpop.f32.mrb[3].mxu0 }
  0xe1   :  { %v368_v39 = vadd.f32 3.0, %v242_v34  ;;  %v245_v40 = vadd.f32 %v244_v38, %v4427_v30 }
  0xe2   :  { %v402_v41 = vmax.f32 %v370_v36, 0.0  ;;  %v371_v42 = vadd.f32 3.0, %v253_v37 }
  0xe3   :  { %v400_v43 = vmax.f32 %v368_v39, 0.0  ;;  %v369_v44 = vadd.f32 3.0, %v245_v40 }
  0xe4   :  { %v434_v45 = vmin.f32 %v402_v41, 6.0  ;;  %v403_v46 = vmax.f32 %v371_v42, 0.0 }
  0xe5   :  { %v432_v47 = vmin.f32 %v400_v43, 6.0  ;;  %v401_v48 = vmax.f32 %v369_v44, 0.0  ;;  %v3789_v49 = vpop.f32.mrb[4].mxu0 }
  0xe6   :  { %v466_v50 = vmul.f32 %v434_v45, %v250_v32  ;;  %v435_v51 = vmin.f32 %v403_v46, 6.0  ;;  %v266_v52 = vadd.f32 %v3789_v49, %v4427_v30  ;;  %v257_v53 = vpop.f32.mrb[5].mxu0 }
  0xe7   :  { %v433_v54 = vmin.f32 %v401_v48, 6.0  ;;  %v258_v55 = vadd.f32 %v257_v53, %v4427_v30  ;;  %v3790_v56 = vpop.f32.mrb[6].mxu0  ;;  %v464_v57 = vmul.f32 %v432_v47, %v242_v34 }
  0xe8   :  { %v467_v58 = vmul.f32 %v435_v51, %v253_v37  ;;  %v374_v59 = vadd.f32 3.0, %v266_v52  ;;  %v269_v60 = vadd.f32 %v3790_v56, %v4427_v30  ;;  %v260_v61 = vpop.f32.mrb[7].mxu0  ;;  %v498_v1 = vmul.f32 0.16666667, %v466_v50 }
  0xe9   :  { %v372_v62 = vadd.f32 3.0, %v258_v55  ;;  %v261_v63 = vadd.f32 %v260_v61, %v4427_v30  ;;  %v465_v0 = vmul.f32 %v433_v54, %v245_v40  ;;  %v496_v7 = vmul.f32 0.16666667, %v464_v57 }
  0xea   :  { %v499_v2 = vmul.f32 0.16666667, %v467_v58  ;;  %v406_v3 = vmax.f32 %v374_v59, 0.0  ;;  %v375_v4 = vadd.f32 3.0, %v269_v60 }
  0xeb   :  { %v404_v5 = vmax.f32 %v372_v62, 0.0  ;;  %v373_v6 = vadd.f32 3.0, %v261_v63  ;;  %v497_v8 = vmul.f32 0.16666667, %v465_v0 }
  0xec   :  { %v438_v9 = vmin.f32 %v406_v3, 6.0  ;;  %v407_v10 = vmax.f32 %v375_v4, 0.0  ;;  %v529_v11 = vpack.c.bf16 %v499_v2, %v498_v1 }
  0xed   :  { %v436_v12 = vmin.f32 %v404_v5, 6.0  ;;  %v405_v13 = vmax.f32 %v373_v6, 0.0  ;;  %v3793_v14 = vpop.f32.mrb[8].mxu0  ;;  %v528_v15 = vpack.c.bf16 %v497_v8, %v496_v7 }
  0xee   :  { %v470_v16 = vmul.f32 %v438_v9, %v266_v52  ;;  %v439_v17 = vmin.f32 %v407_v10, 6.0  ;;  %v282_v18 = vadd.f32 %v3793_v14, %v4427_v30  ;;  %v273_v19 = vpop.f32.mrb[9].mxu0 }
  0xef   :  { %v468_v20 = vmul.f32 %v436_v12, %v258_v55  ;;  %v437_v21 = vmin.f32 %v405_v13, 6.0  ;;  %v274_v22 = vadd.f32 %v273_v19, %v4427_v30  ;;  %v3794_v23 = vpop.f32.mrb[10].mxu0  ;;  %3831 = vmatprep.mubr.bf16.mxu1 %v528_v15 }
  0xf0   :  { %v471_v24 = vmul.f32 %v439_v17, %v269_v60  ;;  %v378_v25 = vadd.f32 3.0, %v282_v18  ;;  %v285_v26 = vadd.f32 %v3794_v23, %v4427_v30  ;;  %v276_v31 = vpop.f32.mrb[11].mxu0  ;;  %3832 = vmatmul.mubr.bf16.vlgmr.msra.gmra.mrb[0].mxu1 %v529_v11  ;;  %v502_v35 = vmul.f32 0.16666667, %v470_v16 }
  0xf1   :  { %v469_v32 = vmul.f32 %v437_v21, %v261_v63  ;;  %v376_v33 = vadd.f32 3.0, %v274_v22  ;;  %v277_v34 = vadd.f32 %v276_v31, %v4427_v30  ;;  %v500_v39 = vmul.f32 0.16666667, %v468_v20 }
  0xf2   :  { %v503_v36 = vmul.f32 0.16666667, %v471_v24  ;;  %v410_v37 = vmax.f32 %v378_v25, 0.0  ;;  %v379_v38 = vadd.f32 3.0, %v285_v26 }
  0xf3   :  { %v501_v40 = vmul.f32 0.16666667, %v469_v32  ;;  %v408_v41 = vmax.f32 %v376_v33, 0.0  ;;  %v377_v42 = vadd.f32 3.0, %v277_v34 }
  0xf4   :  { %v442_v43 = vmin.f32 %v410_v37, 6.0  ;;  %v411_v44 = vmax.f32 %v379_v38, 0.0  ;;  %v531_v45 = vpack.c.bf16 %v503_v36, %v502_v35 }
  0xf5   :  { %v440_v46 = vmin.f32 %v408_v41, 6.0  ;;  %v409_v47 = vmax.f32 %v377_v42, 0.0  ;;  %v3797_v48 = vpop.f32.mrb[12].mxu0  ;;  %v530_v49 = vpack.c.bf16 %v501_v40, %v500_v39 }
  0xf6   :  { %v474_v50 = vmul.f32 %v442_v43, %v282_v18  ;;  %v443_v51 = vmin.f32 %v411_v44, 6.0  ;;  %v298_v52 = vadd.f32 %v3797_v48, %v4427_v30  ;;  %v289_v53 = vpop.f32.mrb[13].mxu0 }
  0xf7   :  { %v472_v54 = vmul.f32 %v440_v46, %v274_v22  ;;  %v441_v55 = vmin.f32 %v409_v47, 6.0  ;;  %v290_v56 = vadd.f32 %v289_v53, %v4427_v30  ;;  %v3798_v57 = vpop.f32.mrb[14].mxu0  ;;  %3835 = vmatprep.mubr.bf16.mxu1 %v530_v49 }
  0xf8   :  { %v475_v58 = vmul.f32 %v443_v51, %v285_v26  ;;  %v382_v59 = vadd.f32 3.0, %v298_v52  ;;  %v301_v60 = vadd.f32 %v3798_v57, %v4427_v30  ;;  %v292_v61 = vpop.f32.mrb[15].mxu0  ;;  %3836 = vmatmul.mubr.bf16.gmra.mrb[4].mxu1 %v531_v45  ;;  %v506_v1 = vmul.f32 0.16666667, %v474_v50 }
  0xf9   :  { %v473_v62 = vmul.f32 %v441_v55, %v277_v34  ;;  %v380_v63 = vadd.f32 3.0, %v290_v56  ;;  %v293_v0 = vadd.f32 %v292_v61, %v4427_v30  ;;  %v504_v5 = vmul.f32 0.16666667, %v472_v54 }
  0xfa   :  { %v507_v2 = vmul.f32 0.16666667, %v475_v58  ;;  %v414_v3 = vmax.f32 %v382_v59, 0.0  ;;  %v383_v4 = vadd.f32 3.0, %v301_v60 }
  0xfb   :  { %v505_v6 = vmul.f32 0.16666667, %v473_v62  ;;  %v412_v7 = vmax.f32 %v380_v63, 0.0  ;;  %v381_v8 = vadd.f32 3.0, %v293_v0 }
  0xfc   :  { %v446_v9 = vmin.f32 %v414_v3, 6.0  ;;  %v415_v10 = vmax.f32 %v383_v4, 0.0  ;;  %v533_v11 = vpack.c.bf16 %v507_v2, %v506_v1 }
  0xfd   :  { %v444_v12 = vmin.f32 %v412_v7, 6.0  ;;  %v413_v13 = vmax.f32 %v381_v8, 0.0  ;;  %v3801_v14 = vpop.f32.mrb[16].mxu0  ;;  %v532_v15 = vpack.c.bf16 %v505_v6, %v504_v5 }
  0xfe   :  { %v478_v16 = vmul.f32 %v446_v9, %v298_v52  ;;  %v447_v17 = vmin.f32 %v415_v10, 6.0  ;;  %v314_v18 = vadd.f32 %v3801_v14, %v4427_v30  ;;  %v305_v19 = vpop.f32.mrb[17].mxu0 }
  0xff   :  { %v476_v20 = vmul.f32 %v444_v12, %v290_v56  ;;  %v445_v21 = vmin.f32 %v413_v13, 6.0  ;;  %v306_v22 = vadd.f32 %v305_v19, %v4427_v30  ;;  %v3802_v23 = vpop.f32.mrb[18].mxu0  ;;  %3839 = vmatprep.mubr.bf16.mxu1 %v532_v15 }
 0x100   :  { %v479_v24 = vmul.f32 %v447_v17, %v301_v60  ;;  %v386_v25 = vadd.f32 3.0, %v314_v18  ;;  %v317_v26 = vadd.f32 %v3802_v23, %v4427_v30  ;;  %v308_v31 = vpop.f32.mrb[19].mxu0  ;;  %3840 = vmatmul.mubr.bf16.gmra.mrb[8].mxu1 %v533_v11  ;;  %v510_v35 = vmul.f32 0.16666667, %v478_v16 }
 0x101   :  { %v477_v32 = vmul.f32 %v445_v21, %v293_v0  ;;  %v384_v33 = vadd.f32 3.0, %v306_v22  ;;  %v309_v34 = vadd.f32 %v308_v31, %v4427_v30  ;;  %v508_v39 = vmul.f32 0.16666667, %v476_v20 }
 0x102   :  { %v511_v36 = vmul.f32 0.16666667, %v479_v24  ;;  %v418_v37 = vmax.f32 %v386_v25, 0.0  ;;  %v387_v38 = vadd.f32 3.0, %v317_v26 }
 0x103   :  { %v509_v40 = vmul.f32 0.16666667, %v477_v32  ;;  %v416_v41 = vmax.f32 %v384_v33, 0.0  ;;  %v385_v42 = vadd.f32 3.0, %v309_v34 }
 0x104   :  { %v450_v43 = vmin.f32 %v418_v37, 6.0  ;;  %v419_v44 = vmax.f32 %v387_v38, 0.0  ;;  %v535_v45 = vpack.c.bf16 %v511_v36, %v510_v35 }
 0x105   :  { %v448_v46 = vmin.f32 %v416_v41, 6.0  ;;  %v417_v47 = vmax.f32 %v385_v42, 0.0  ;;  %v3805_v48 = vpop.f32.mrb[20].mxu0  ;;  %v534_v49 = vpack.c.bf16 %v509_v40, %v508_v39 }
 0x106   :  { %v482_v50 = vmul.f32 %v450_v43, %v314_v18  ;;  %v451_v51 = vmin.f32 %v419_v44, 6.0  ;;  %v330_v52 = vadd.f32 %v3805_v48, %v4427_v30  ;;  %v321_v53 = vpop.f32.mrb[21].mxu0 }
 0x107   :  { %v480_v54 = vmul.f32 %v448_v46, %v306_v22  ;;  %v449_v55 = vmin.f32 %v417_v47, 6.0  ;;  %v322_v56 = vadd.f32 %v321_v53, %v4427_v30  ;;  %v3806_v57 = vpop.f32.mrb[22].mxu0  ;;  %3843 = vmatprep.mubr.bf16.mxu1 %v534_v49 }
 0x108   :  { %v483_v58 = vmul.f32 %v451_v51, %v317_v26  ;;  %v390_v59 = vadd.f32 3.0, %v330_v52  ;;  %v333_v60 = vadd.f32 %v3806_v57, %v4427_v30  ;;  %v324_v61 = vpop.f32.mrb[23].mxu0  ;;  %3844 = vmatmul.mubr.bf16.gmra.mrb[12].mxu1 %v535_v45  ;;  %v514_v1 = vmul.f32 0.16666667, %v482_v50 }
 0x109   :  { %v481_v62 = vmul.f32 %v449_v55, %v309_v34  ;;  %v388_v63 = vadd.f32 3.0, %v322_v56  ;;  %v325_v0 = vadd.f32 %v324_v61, %v4427_v30  ;;  %v512_v5 = vmul.f32 0.16666667, %v480_v54 }
 0x10a   :  { %v515_v2 = vmul.f32 0.16666667, %v483_v58  ;;  %v422_v3 = vmax.f32 %v390_v59, 0.0  ;;  %v391_v4 = vadd.f32 3.0, %v333_v60 }
 0x10b   :  { %v513_v6 = vmul.f32 0.16666667, %v481_v62  ;;  %v420_v7 = vmax.f32 %v388_v63, 0.0  ;;  %v389_v8 = vadd.f32 3.0, %v325_v0 }
 0x10c   :  { %v454_v9 = vmin.f32 %v422_v3, 6.0  ;;  %v423_v10 = vmax.f32 %v391_v4, 0.0  ;;  %v537_v11 = vpack.c.bf16 %v515_v2, %v514_v1 }
 0x10d   :  { %v452_v12 = vmin.f32 %v420_v7, 6.0  ;;  %v421_v13 = vmax.f32 %v389_v8, 0.0  ;;  %v3809_v14 = vpop.f32.mrb[24].mxu0  ;;  %v536_v15 = vpack.c.bf16 %v513_v6, %v512_v5 }
 0x10e   :  { %v486_v16 = vmul.f32 %v454_v9, %v330_v52  ;;  %v455_v17 = vmin.f32 %v423_v10, 6.0  ;;  %v346_v18 = vadd.f32 %v3809_v14, %v4427_v30  ;;  %v337_v19 = vpop.f32.mrb[25].mxu0 }
 0x10f   :  { %v484_v20 = vmul.f32 %v452_v12, %v322_v56  ;;  %v453_v21 = vmin.f32 %v421_v13, 6.0  ;;  %v338_v22 = vadd.f32 %v337_v19, %v4427_v30  ;;  %v3810_v23 = vpop.f32.mrb[26].mxu0  ;;  %3847 = vmatprep.mubr.bf16.mxu1 %v536_v15 }
 0x110   :  { %v487_v24 = vmul.f32 %v455_v17, %v333_v60  ;;  %v394_v25 = vadd.f32 3.0, %v346_v18  ;;  %v349_v26 = vadd.f32 %v3810_v23, %v4427_v30  ;;  %v340_v31 = vpop.f32.mrb[27].mxu0  ;;  %3848 = vmatmul.mubr.bf16.gmra.mrb[16].mxu1 %v537_v11  ;;  %v518_v35 = vmul.f32 0.16666667, %v486_v16 }
 0x111   :  { %v485_v32 = vmul.f32 %v453_v21, %v325_v0  ;;  %v392_v33 = vadd.f32 3.0, %v338_v22  ;;  %v341_v34 = vadd.f32 %v340_v31, %v4427_v30  ;;  %v516_v39 = vmul.f32 0.16666667, %v484_v20 }
 0x112   :  { %v519_v36 = vmul.f32 0.16666667, %v487_v24  ;;  %v426_v37 = vmax.f32 %v394_v25, 0.0  ;;  %v395_v38 = vadd.f32 3.0, %v349_v26  ;;  %v4284_v31 = vmov 0.0  }
 0x113   :  { %v517_v40 = vmul.f32 0.16666667, %v485_v32  ;;  %v424_v41 = vmax.f32 %v392_v33, 0.0  ;;  %v393_v42 = vadd.f32 3.0, %v341_v34  ;;  %3863 = vmatprep.subr.bf16.mxu1 %v4284_v31  ;;  %v4180_v32 = vld [vmem:[%s5466_s3] sm:$0xff]   ;;  %v4181_v33 = vld [vmem:[%s5466_s3 + $0x8] sm:$0xff]  }
 0x114   :  { %v458_v43 = vmin.f32 %v426_v37, 6.0  ;;  %v427_v44 = vmax.f32 %v395_v38, 0.0  ;;  %v539_v45 = vpack.c.bf16 %v519_v36, %v518_v35  ;;  %3864 = vmatpush3.bf16.msra.mxu1 %v4180_v32  ;;  %v4183_v35 = vld [vmem:[%s5466_s3 + $0x18] sm:$0xff]   ;;  %v4184_v36 = vld [vmem:[%s5466_s3 + $0x20] sm:$0xff]   ;;  %v4185_v37 = vld [vmem:[%s5466_s3 + $0x28] sm:$0xff]  }
 0x115   :  { %v456_v46 = vmin.f32 %v424_v41, 6.0  ;;  %v425_v47 = vmax.f32 %v393_v42, 0.0  ;;  %v3813_v48 = vpop.f32.mrb[28].mxu0  ;;  %v538_v49 = vpack.c.bf16 %v517_v40, %v516_v39  ;;  %3865 = vmatprep.subr.bf16.mxu1 %v4284_v31  ;;  %v4186_v38 = vld [vmem:[%s5466_s3 + $0x30] sm:$0xff]   ;;  %v4492_v39 = vsub.s32 1, %v4415_v27 }
 0x116   :  { %v490_v50 = vmul.f32 %v458_v43, %v346_v18  ;;  %v459_v51 = vmin.f32 %v427_v44, 6.0  ;;  %v362_v52 = vadd.f32 %v3813_v48, %v4427_v30  ;;  %v353_v53 = vpop.f32.mrb[29].mxu0 }
 0x117   :  { %v488_v54 = vmul.f32 %v456_v46, %v338_v22  ;;  %v457_v55 = vmin.f32 %v425_v47, 6.0  ;;  %v354_v56 = vadd.f32 %v353_v53, %v4427_v30  ;;  %v3814_v57 = vpop.f32.mrb[30].mxu0  ;;  %3851 = vmatprep.mubr.bf16.mxu1 %v538_v49  ;;  %v4496_v40 = vrot.slane %v4423_v29, %v4492_v39 }
 0x118   :  { %v491_v58 = vmul.f32 %v459_v51, %v349_v26  ;;  %v398_v59 = vadd.f32 3.0, %v362_v52  ;;  %v365_v60 = vadd.f32 %v3814_v57, %v4427_v30  ;;  %v356_v61 = vpop.f32.mrb[31].mxu0  ;;  %3852 = vmatmul.mubr.bf16.gmra.mrb[20].mxu1 %v539_v45  ;;  %v522_v1 = vmul.f32 0.16666667, %v490_v50 }
 0x119   :  { %v489_v62 = vmul.f32 %v457_v55, %v341_v34  ;;  %v396_v63 = vadd.f32 3.0, %v354_v56  ;;  %v357_v0 = vadd.f32 %v356_v61, %v4427_v30  ;;  %v520_v5 = vmul.f32 0.16666667, %v488_v54  ;;  %3866 = vmatpush3.bf16.msra.mxu1 %v4181_v33  ;;  %v4182_v34 = vld [vmem:[%s5466_s3 + $0x10] sm:$0xff]  }
 0x11a   :  { %v523_v2 = vmul.f32 0.16666667, %v491_v58  ;;  %v430_v3 = vmax.f32 %v398_v59, 0.0  ;;  %v399_v4 = vadd.f32 3.0, %v365_v60  ;;  %v4283_v26 = vmov 998259584   ;;  %3867 = vmatprep.subr.bf16.mxu1 %v4284_v31 }
 0x11b   :  { %v521_v6 = vmul.f32 0.16666667, %v489_v62  ;;  %v428_v7 = vmax.f32 %v396_v63, 0.0  ;;  %v397_v8 = vadd.f32 3.0, %v357_v0  ;;  %981 = vmatprep.mubr.bf16.mxu0 %v4283_v26 }
 0x11c   :  { %v462_v9 = vmin.f32 %v430_v3, 6.0  ;;  %v431_v10 = vmax.f32 %v399_v4, 0.0  ;;  %v541_v11 = vpack.c.bf16 %v523_v2, %v522_v1 }
 0x11d   :  { %v460_v12 = vmin.f32 %v428_v7, 6.0  ;;  %v429_v13 = vmax.f32 %v397_v8, 0.0  ;;  %v540_v14 = vpack.c.bf16 %v521_v6, %v520_v5  ;;  %3868 = vmatpush3.bf16.msra.mxu1 %v4182_v34 }
 0x11e   :  { %v494_v15 = vmul.f32 %v462_v9, %v362_v52  ;;  %v463_v16 = vmin.f32 %v431_v10, 6.0  ;;  %3869 = vmatprep.subr.bf16.mxu1 %v4284_v31 }
 0x11f   :  { %v492_v17 = vmul.f32 %v460_v12, %v354_v56  ;;  %v461_v18 = vmin.f32 %v429_v13, 6.0  ;;  %3855 = vmatprep.mubr.bf16.mxu1 %v540_v14 }
 0x120   :  { %v495_v30 = vmul.f32 %v463_v16, %v365_v60  ;;  %3856 = vmatmul.mubr.bf16.gmra.mrb[24].mxu1 %v541_v11  ;;  %v526_v20 = vmul.f32 0.16666667, %v494_v15 }
 0x121   :  { %v493_v19 = vmul.f32 %v461_v18, %v357_v0  ;;  %v524_v22 = vmul.f32 0.16666667, %v492_v17  ;;  %3870 = vmatpush3.bf16.msra.mxu1 %v4183_v35 }
 0x122   :  { %v527_v21 = vmul.f32 0.16666667, %v495_v30  ;;  %3871 = vmatprep.subr.bf16.mxu1 %v4284_v31 }
 0x123   :  { %v525_v23 = vmul.f32 0.16666667, %v493_v19 }
 0x124   :  { %v543_v24 = vpack.c.bf16 %v527_v21, %v526_v20 }
 0x125   :  { %v542_v25 = vpack.c.bf16 %v525_v23, %v524_v22  ;;  %3872 = vmatpush3.bf16.msra.mxu1 %v4184_v36 }
 0x126   :  { %3873 = vmatprep.subr.bf16.mxu1 %v4284_v31 }
 0x127   :  { %3859 = vmatprep.mubr.bf16.mxu1 %v542_v25 }
 0x128   :  { %3860 = vmatmul.mubr.bf16.gmra.mrb[28].mxu1 %v543_v24 }
 0x129   :  { %3874 = vmatpush3.bf16.msra.mxu1 %v4185_v37  ;;  %3879 = vmatprep.mubr.msk.bf16.mxu1 %vm4285_vm1, %v4284_v31 }
 0x12a   :  { %3875 = vmatprep.subr.bf16.mxu1 %v4284_v31 }
 0x12d   :  { %3876 = vmatpush3.bf16.msra.mxu1 %v4186_v38 }
 0x12e   :  { %3877 = vmatprep.subr.bf16.mxu1 %v4284_v31 }
 0x1c3   :  { %v3833_v41 = vpop.f32.mrb[0].mxu1 }
 0x1c4   :  { %v655_v42 = vadd.f32 %v3833_v41, %v4496_v40  ;;  %v646_v43 = vpop.f32.mrb[1].mxu1 }
 0x1c5   :  { %v647_v44 = vadd.f32 %v646_v43, %v4496_v40  ;;  %v3834_v45 = vpop.f32.mrb[2].mxu1 }
 0x1c6   :  { %v775_v46 = vadd.f32 3.0, %v655_v42  ;;  %v658_v47 = vadd.f32 %v3834_v45, %v4496_v40  ;;  %v649_v48 = vpop.f32.mrb[3].mxu1 }
 0x1c7   :  { %v773_v49 = vadd.f32 3.0, %v647_v44  ;;  %v650_v50 = vadd.f32 %v649_v48, %v4496_v40 }
 0x1c8   :  { %v807_v51 = vmax.f32 %v775_v46, 0.0  ;;  %v776_v52 = vadd.f32 3.0, %v658_v47 }
 0x1c9   :  { %v805_v53 = vmax.f32 %v773_v49, 0.0  ;;  %v774_v54 = vadd.f32 3.0, %v650_v50 }
 0x1ca   :  { %v839_v29 = vmin.f32 %v807_v51, 6.0  ;;  %v808_v55 = vmax.f32 %v776_v52, 0.0 }
 0x1cb   :  { %v837_v56 = vmin.f32 %v805_v53, 6.0  ;;  %v806_v57 = vmax.f32 %v774_v54, 0.0  ;;  %v3837_v58 = vpop.f32.mrb[4].mxu1 }
 0x1cc   :  { %v871_v59 = vmul.f32 %v839_v29, %v655_v42  ;;  %v840_v60 = vmin.f32 %v808_v55, 6.0  ;;  %v671_v61 = vadd.f32 %v3837_v58, %v4496_v40  ;;  %v662_v62 = vpop.f32.mrb[5].mxu1 }
 0x1cd   :  { %v869_v63 = vmul.f32 %v837_v56, %v647_v44  ;;  %v838_v0 = vmin.f32 %v806_v57, 6.0  ;;  %v663_v1 = vadd.f32 %v662_v62, %v4496_v40  ;;  %v3838_v2 = vpop.f32.mrb[6].mxu1 }
 0x1ce   :  { %v872_v3 = vmul.f32 %v840_v60, %v658_v47  ;;  %v779_v4 = vadd.f32 3.0, %v671_v61  ;;  %v674_v5 = vadd.f32 %v3838_v2, %v4496_v40  ;;  %v665_v6 = vpop.f32.mrb[7].mxu1  ;;  %v4506_v10 = vmul.f32 0.16666667, %v871_v59 }
 0x1cf   :  { %v870_v7 = vmul.f32 %v838_v0, %v650_v50  ;;  %v777_v8 = vadd.f32 3.0, %v663_v1  ;;  %v666_v9 = vadd.f32 %v665_v6, %v4496_v40  ;;  %v4510_v14 = vmul.f32 0.16666667, %v869_v63 }
 0x1d0   :  { %v4508_v11 = vmul.f32 0.16666667, %v872_v3  ;;  %v811_v12 = vmax.f32 %v779_v4, 0.0  ;;  %v780_v13 = vadd.f32 3.0, %v674_v5 }
 0x1d1   :  { %v4512_v15 = vmul.f32 0.16666667, %v870_v7  ;;  %v809_v16 = vmax.f32 %v777_v8, 0.0  ;;  %v778_v17 = vadd.f32 3.0, %v666_v9 }
 0x1d2   :  { %v934_v18 = vpack.c.bf16 %v4508_v11, %v4506_v10  ;;  %v843_v30 = vmin.f32 %v811_v12, 6.0  ;;  %v812_v19 = vmax.f32 %v780_v13, 0.0 }
 0x1d3   :  { %v933_v20 = vpack.c.bf16 %v4512_v15, %v4510_v14  ;;  %v841_v21 = vmin.f32 %v809_v16, 6.0  ;;  %v810_v22 = vmax.f32 %v778_v17, 0.0  ;;  %v3841_v23 = vpop.f32.mrb[8].mxu1 }
 0x1d4   :  { %v875_v24 = vmul.f32 %v843_v30, %v671_v61  ;;  %v844_v25 = vmin.f32 %v812_v19, 6.0  ;;  %v687_v32 = vadd.f32 %v3841_v23, %v4496_v40  ;;  %v678_v33 = vpop.f32.mrb[9].mxu1 }
 0x1d5   :  { %v873_v34 = vmul.f32 %v841_v21, %v663_v1  ;;  %v842_v35 = vmin.f32 %v810_v22, 6.0  ;;  %v679_v36 = vadd.f32 %v678_v33, %v4496_v40  ;;  %v3842_v37 = vpop.f32.mrb[10].mxu1 }
 0x1d6   :  { %v876_v38 = vmul.f32 %v844_v25, %v674_v5  ;;  %v783_v41 = vadd.f32 3.0, %v687_v32  ;;  %v690_v42 = vadd.f32 %v3842_v37, %v4496_v40  ;;  %v681_v43 = vpop.f32.mrb[11].mxu1  ;;  %v4522_v47 = vmul.f32 0.16666667, %v875_v24 }
 0x1d7   :  { %v874_v44 = vmul.f32 %v842_v35, %v666_v9  ;;  %v781_v45 = vadd.f32 3.0, %v679_v36  ;;  %v682_v46 = vadd.f32 %v681_v43, %v4496_v40  ;;  %v4526_v51 = vmul.f32 0.16666667, %v873_v34 }
 0x1d8   :  { %v4524_v48 = vmul.f32 0.16666667, %v876_v38  ;;  %v815_v49 = vmax.f32 %v783_v41, 0.0  ;;  %v784_v50 = vadd.f32 3.0, %v690_v42 }
 0x1d9   :  { %v4528_v52 = vmul.f32 0.16666667, %v874_v44  ;;  %v813_v53 = vmax.f32 %v781_v45, 0.0  ;;  %v782_v54 = vadd.f32 3.0, %v682_v46 }
 0x1da   :  { %v936_v29 = vpack.c.bf16 %v4524_v48, %v4522_v47  ;;  %v847_v55 = vmin.f32 %v815_v49, 6.0  ;;  %v816_v56 = vmax.f32 %v784_v50, 0.0 }
 0x1db   :  { %v935_v57 = vpack.c.bf16 %v4528_v52, %v4526_v51  ;;  %v845_v58 = vmin.f32 %v813_v53, 6.0  ;;  %v814_v59 = vmax.f32 %v782_v54, 0.0  ;;  %v3845_v60 = vpop.f32.mrb[12].mxu1 }
 0x1dc   :  { %v879_v61 = vmul.f32 %v847_v55, %v687_v32  ;;  %v848_v62 = vmin.f32 %v816_v56, 6.0  ;;  %v703_v63 = vadd.f32 %v3845_v60, %v4496_v40  ;;  %v694_v0 = vpop.f32.mrb[13].mxu1 }
 0x1dd   :  { %v877_v1 = vmul.f32 %v845_v58, %v679_v36  ;;  %v846_v2 = vmin.f32 %v814_v59, 6.0  ;;  %v695_v3 = vadd.f32 %v694_v0, %v4496_v40  ;;  %v3846_v4 = vpop.f32.mrb[14].mxu1 }
 0x1de   :  { %v880_v5 = vmul.f32 %v848_v62, %v690_v42  ;;  %v787_v6 = vadd.f32 3.0, %v703_v63  ;;  %v706_v7 = vadd.f32 %v3846_v4, %v4496_v40  ;;  %v697_v8 = vpop.f32.mrb[15].mxu1  ;;  %v4538_v16 = vmul.f32 0.16666667, %v879_v61 }
 0x1df   :  { %v878_v9 = vmul.f32 %v846_v2, %v682_v46  ;;  %v785_v12 = vadd.f32 3.0, %v695_v3  ;;  %v698_v13 = vadd.f32 %v697_v8, %v4496_v40  ;;  %v4542_v21 = vmul.f32 0.16666667, %v877_v1 }
 0x1e0   :  { %v4540_v17 = vmul.f32 0.16666667, %v880_v5  ;;  %v819_v30 = vmax.f32 %v787_v6, 0.0  ;;  %v788_v19 = vadd.f32 3.0, %v706_v7 }
 0x1e1   :  { %v4544_v22 = vmul.f32 0.16666667, %v878_v9  ;;  %v817_v23 = vmax.f32 %v785_v12, 0.0  ;;  %v786_v24 = vadd.f32 3.0, %v698_v13 }
 0x1e2   :  { %v938_v25 = vpack.c.bf16 %v4540_v17, %v4538_v16  ;;  %v851_v32 = vmin.f32 %v819_v30, 6.0  ;;  %v820_v33 = vmax.f32 %v788_v19, 0.0  ;;  %v4187_v16 = vld [vmem:[%s5466_s3 + $0x38] sm:$0xff]   ;;  %v4188_v17 = vld [vmem:[%s5462_s1 + $0x10] sm:$0xff]  }
 0x1e3   :  { %v937_v34 = vpack.c.bf16 %v4544_v22, %v4542_v21  ;;  %v849_v35 = vmin.f32 %v817_v23, 6.0  ;;  %v818_v36 = vmax.f32 %v786_v24, 0.0  ;;  %v3849_v37 = vpop.f32.mrb[16].mxu1  ;;  %3878 = vmatpush3.bf16.msra.mxu1 %v4187_v16  ;;  %v4190_v21 = vld [vmem:[%s5467_s4] sm:$0xff]   ;;  %v4191_v22 = vld [vmem:[%s5467_s4 + $0x8] sm:$0xff]  }
 0x1e4   :  { %v883_v38 = vmul.f32 %v851_v32, %v703_v63  ;;  %v852_v41 = vmin.f32 %v820_v33, 6.0  ;;  %v719_v42 = vadd.f32 %v3849_v37, %v4496_v40  ;;  %v710_v43 = vpop.f32.mrb[17].mxu1  ;;  %3903 = vmatprep.subr.bf16.mxu1 %v4188_v17 }
 0x1e5   :  { %v881_v44 = vmul.f32 %v849_v35, %v695_v3  ;;  %v850_v45 = vmin.f32 %v818_v36, 6.0  ;;  %v711_v46 = vadd.f32 %v710_v43, %v4496_v40  ;;  %v3850_v49 = vpop.f32.mrb[18].mxu1 }
 0x1e6   :  { %v884_v50 = vmul.f32 %v852_v41, %v706_v7  ;;  %v791_v53 = vadd.f32 3.0, %v719_v42  ;;  %v722_v54 = vadd.f32 %v3850_v49, %v4496_v40  ;;  %v713_v55 = vpop.f32.mrb[19].mxu1  ;;  %v4554_v60 = vmul.f32 0.16666667, %v883_v38 }
 0x1e7   :  { %v882_v56 = vmul.f32 %v850_v45, %v698_v13  ;;  %v789_v58 = vadd.f32 3.0, %v711_v46  ;;  %v714_v59 = vadd.f32 %v713_v55, %v4496_v40  ;;  %v4558_v0 = vmul.f32 0.16666667, %v881_v44 }
 0x1e8   :  { %v4556_v61 = vmul.f32 0.16666667, %v884_v50  ;;  %v823_v62 = vmax.f32 %v791_v53, 0.0  ;;  %v792_v63 = vadd.f32 3.0, %v722_v54 }
 0x1e9   :  { %v4560_v1 = vmul.f32 0.16666667, %v882_v56  ;;  %v821_v2 = vmax.f32 %v789_v58, 0.0  ;;  %v790_v3 = vadd.f32 3.0, %v714_v59 }
 0x1ea   :  { %v940_v4 = vpack.c.bf16 %v4556_v61, %v4554_v60  ;;  %v855_v5 = vmin.f32 %v823_v62, 6.0  ;;  %v824_v6 = vmax.f32 %v792_v63, 0.0  ;;  %v4194_v60 = vld [vmem:[%s5467_s4 + $0x20] sm:$0xff]  }
 0x1eb   :  { %v939_v7 = vpack.c.bf16 %v4560_v1, %v4558_v0  ;;  %v853_v8 = vmin.f32 %v821_v2, 6.0  ;;  %v822_v9 = vmax.f32 %v790_v3, 0.0  ;;  %v3853_v12 = vpop.f32.mrb[20].mxu1 }
 0x1ec   :  { %v887_v13 = vmul.f32 %v855_v5, %v719_v42  ;;  %v856_v30 = vmin.f32 %v824_v6, 6.0  ;;  %v735_v19 = vadd.f32 %v3853_v12, %v4496_v40  ;;  %v726_v23 = vpop.f32.mrb[21].mxu1 }
 0x1ed   :  { %v885_v24 = vmul.f32 %v853_v8, %v711_v46  ;;  %v854_v32 = vmin.f32 %v822_v9, 6.0  ;;  %v727_v33 = vadd.f32 %v726_v23, %v4496_v40  ;;  %v3854_v35 = vpop.f32.mrb[22].mxu1 }
 0x1ee   :  { %v888_v36 = vmul.f32 %v856_v30, %v722_v54  ;;  %v795_v37 = vadd.f32 3.0, %v735_v19  ;;  %v738_v38 = vadd.f32 %v3854_v35, %v4496_v40  ;;  %v729_v41 = vpop.f32.mrb[23].mxu1  ;;  %v919_v49 = vmul.f32 0.16666667, %v887_v13 }
 0x1ef   :  { %v886_v43 = vmul.f32 %v854_v32, %v714_v59  ;;  %v793_v44 = vadd.f32 3.0, %v727_v33  ;;  %v730_v45 = vadd.f32 %v729_v41, %v4496_v40  ;;  %v917_v55 = vmul.f32 0.16666667, %v885_v24 }
 0x1f0   :  { %v920_v42 = vmul.f32 0.16666667, %v888_v36  ;;  %v827_v50 = vmax.f32 %v795_v37, 0.0  ;;  %v796_v53 = vadd.f32 3.0, %v738_v38 }
 0x1f1   :  { %v918_v56 = vmul.f32 0.16666667, %v886_v43  ;;  %v825_v46 = vmax.f32 %v793_v44, 0.0  ;;  %v794_v58 = vadd.f32 3.0, %v730_v45 }
 0x1f2   :  { %v859_v62 = vmin.f32 %v827_v50, 6.0  ;;  %v828_v63 = vmax.f32 %v796_v53, 0.0  ;;  %v942_v2 = vpack.c.bf16 %v920_v42, %v919_v49 }
 0x1f3   :  { %v857_v54 = vmin.f32 %v825_v46, 6.0  ;;  %v826_v3 = vmax.f32 %v794_v58, 0.0  ;;  %v3857_v5 = vpop.f32.mrb[24].mxu1  ;;  %v941_v6 = vpack.c.bf16 %v918_v56, %v917_v55 }
 0x1f4   :  { %v891_v8 = vmul.f32 %v859_v62, %v735_v19  ;;  %v860_v59 = vmin.f32 %v828_v63, 6.0  ;;  %v751_v9 = vadd.f32 %v3857_v5, %v4496_v40  ;;  %v742_v12 = vpop.f32.mrb[25].mxu1 }
 0x1f5   :  { %v889_v13 = vmul.f32 %v857_v54, %v727_v33  ;;  %v858_v30 = vmin.f32 %v826_v3, 6.0  ;;  %v743_v23 = vadd.f32 %v742_v12, %v4496_v40  ;;  %v3858_v24 = vpop.f32.mrb[26].mxu1  ;;  %3575 = vmatprep.subr.bf16.mxu0 %v941_v6 }
 0x1f6   :  { %v892_v32 = vmul.f32 %v860_v59, %v738_v38  ;;  %v799_v35 = vadd.f32 3.0, %v751_v9  ;;  %v754_v36 = vadd.f32 %v3858_v24, %v4496_v40  ;;  %v745_v37 = vpop.f32.mrb[27].mxu1  ;;  %3576 = vmatpush3.bf16.msra.mxu0 %v933_v20  ;;  %v923_v33 = vmul.f32 0.16666667, %v891_v8 }
 0x1f7   :  { %v890_v19 = vmul.f32 %v858_v30, %v730_v45  ;;  %v797_v41 = vadd.f32 3.0, %v743_v23  ;;  %v746_v43 = vadd.f32 %v745_v37, %v4496_v40  ;;  %3577 = vmatprep.subr.bf16.mxu0 %v942_v2  ;;  %v921_v50 = vmul.f32 0.16666667, %v889_v13 }
 0x1f8   :  { %v924_v44 = vmul.f32 0.16666667, %v892_v32  ;;  %v831_v49 = vmax.f32 %v799_v35, 0.0  ;;  %v800_v42 = vadd.f32 3.0, %v754_v36 }
 0x1f9   :  { %v922_v53 = vmul.f32 0.16666667, %v890_v19  ;;  %v829_v38 = vmax.f32 %v797_v41, 0.0  ;;  %v798_v55 = vadd.f32 3.0, %v746_v43 }
 0x1fa   :  { %v863_v56 = vmin.f32 %v831_v49, 6.0  ;;  %v832_v46 = vmax.f32 %v800_v42, 0.0  ;;  %3578 = vmatpush3.bf16.msra.mxu0 %v934_v18  ;;  %v944_v14 = vpack.c.bf16 %v924_v44, %v923_v33 }
 0x1fb   :  { %v861_v15 = vmin.f32 %v829_v38, 6.0  ;;  %v830_v20 = vmax.f32 %v798_v55, 0.0  ;;  %v3861_v45 = vpop.f32.mrb[28].mxu1  ;;  %v943_v58 = vpack.c.bf16 %v922_v53, %v921_v50 }
 0x1fc   :  { %v895_v62 = vmul.f32 %v863_v56, %v751_v9  ;;  %v864_v63 = vmin.f32 %v832_v46, 6.0  ;;  %v767_v2 = vadd.f32 %v3861_v45, %v4496_v40  ;;  %v758_v54 = vpop.f32.mrb[29].mxu1  ;;  %v4250_v45 = vld [vmem:[%s5463_s0 + $0x10] sm:$0xff]  }
 0x1fd   :  { %v893_v3 = vmul.f32 %v861_v15, %v743_v23  ;;  %v862_v5 = vmin.f32 %v830_v20, 6.0  ;;  %v759_v6 = vadd.f32 %v758_v54, %v4496_v40  ;;  %v3862_v8 = vpop.f32.mrb[30].mxu1  ;;  %3579 = vmatprep.subr.bf16.mxu0 %v943_v58  ;;  %v4248_v15 = vld [vmem:[%s5463_s0] sm:$0xff]   ;;  %v4249_v20 = vld [vmem:[%s5463_s0 + $0x8] sm:$0xff]   ;;  %v4251_v58 = vld [vmem:[%s5463_s0 + $0x18] sm:$0xff]  }
 0x1fe   :  { %v896_v59 = vmul.f32 %v864_v63, %v754_v36  ;;  %v803_v12 = vadd.f32 3.0, %v767_v2  ;;  %v770_v10 = vadd.f32 %v3862_v8, %v4496_v40  ;;  %v761_v11 = vpop.f32.mrb[31].mxu1  ;;  %3580 = vmatpush3.bf16.msra.mxu0 %v935_v57  ;;  %v927_v30 = vmul.f32 0.16666667, %v895_v62  ;;  %v4252_v62 = vld [vmem:[%s5463_s0 + $0x20] sm:$0xff]   ;;  %v4253_v63 = vld [vmem:[%s5463_s0 + $0x28] sm:$0xff]  }
 0x1ff   :  { %v894_v18 = vmul.f32 %v862_v5, %v746_v43  ;;  %v801_v9 = vadd.f32 3.0, %v759_v6  ;;  %v762_v13 = vadd.f32 %v761_v11, %v4496_v40  ;;  %3581 = vmatprep.subr.bf16.mxu0 %v944_v14  ;;  %v925_v35 = vmul.f32 0.16666667, %v893_v3  ;;  %v4189_v14 = vld [vmem:[%s5462_s1 + $0x18] sm:$0xff]   ;;  %v4256_v3 = vld [vmem:[%s5463_s0 + $0x40] sm:$0xff]   ;;  %v4257_v5 = vld [vmem:[%s5463_s0 + $0x48] sm:$0xff]  }
 0x200   :  { %v928_v23 = vmul.f32 0.16666667, %v896_v59  ;;  %v835_v24 = vmax.f32 %v803_v12, 0.0  ;;  %v804_v32 = vadd.f32 3.0, %v770_v10  ;;  %v4255_v54 = vld [vmem:[%s5463_s0 + $0x38] sm:$0xff]   ;;  %v4260_v59 = vld [vmem:[%s5463_s0 + $0x60] sm:$0xff]  }
 0x201   :  { %v926_v37 = vmul.f32 0.16666667, %v894_v18  ;;  %v833_v36 = vmax.f32 %v801_v9, 0.0  ;;  %v802_v19 = vadd.f32 3.0, %v762_v13  ;;  %v4259_v8 = vld [vmem:[%s5463_s0 + $0x58] sm:$0xff]   ;;  %v4261_v12 = vld [vmem:[%s5463_s0 + $0x68] sm:$0xff]  }
 0x202   :  { %v867_v41 = vmin.f32 %v835_v24, 6.0  ;;  %v836_v33 = vmax.f32 %v804_v32, 0.0  ;;  %3582 = vmatpush3.bf16.msra.mxu0 %v936_v29  ;;  %v946_v51 = vpack.c.bf16 %v928_v23, %v927_v30  ;;  %v4263_v11 = vld [vmem:[%s5463_s0 + $0x78] sm:$0xff]   ;;  %v4195_v18 = vld [vmem:[%s5467_s4 + $0x28] sm:$0xff]   ;;  %v4196_v9 = vld [vmem:[%s5467_s4 + $0x30] sm:$0xff]   ;;  %v4717_v23 = vsub.s32 2, %v4415_v27 }
 0x203   :  { %v865_v52 = vmin.f32 %v833_v36, 6.0  ;;  %v834_v57 = vmax.f32 %v802_v19, 0.0  ;;  %v945_v43 = vpack.c.bf16 %v926_v37, %v925_v35  ;;  %v4198_v30 = vld [vmem:[%s5464_s2 + $0x40] sm:$0xff]  }
 0x204   :  { %v899_v40 = vmul.f32 %v867_v41, %v767_v2  ;;  %v868_v44 = vmin.f32 %v836_v33, 6.0  ;;  %v4254_v2 = vld [vmem:[%s5463_s0 + $0x30] sm:$0xff]   ;;  %v4722_v24 = vld [vmem:[%s5465_s5] sm:$0xf]  ;;  %v4729_v41 = vld [vmem:[%s5465_s5 + $0x4] sm:$0xf] }
 0x205   :  { %v897_v49 = vmul.f32 %v865_v52, %v759_v6  ;;  %v866_v42 = vmin.f32 %v834_v57, 6.0  ;;  %3583 = vmatprep.subr.bf16.mxu0 %v945_v43  ;;  %v4258_v6 = vld [vmem:[%s5463_s0 + $0x50] sm:$0xff]   ;;  %v1009_v32 = vrot.slane %v4722_v24, %v4717_v23  ;;  %v4733_v57 = vrot.slane %v4729_v41, %v4418_v28 }
 0x206   :  { %v900_v50 = vmul.f32 %v868_v44, %v770_v10  ;;  %3584 = vmatpush3.bf16.msra.mxu0 %v937_v34  ;;  %v931_v38 = vmul.f32 0.16666667, %v899_v40  ;;  %v4193_v34 = vld [vmem:[%s5467_s4 + $0x18] sm:$0xff]   ;;  %v4262_v10 = vld [vmem:[%s5463_s0 + $0x70] sm:$0xff]  }
 0x207   :  { %v898_v53 = vmul.f32 %v866_v42, %v762_v13  ;;  %3585 = vmatprep.subr.bf16.mxu0 %v946_v51  ;;  %v929_v47 = vmul.f32 0.16666667, %v897_v49  ;;  %v4197_v13 = vld [vmem:[%s5467_s4 + $0x38] sm:$0xff]  }
 0x208   :  { %v932_v55 = vmul.f32 0.16666667, %v900_v50 }
 0x209   :  { %v930_v48 = vmul.f32 0.16666667, %v898_v53 }
 0x20a   :  { %3586 = vmatpush3.bf16.msra.mxu0 %v938_v25  ;;  %v948_v29 = vpack.c.bf16 %v932_v55, %v931_v38  ;;  %v4192_v25 = vld [vmem:[%s5467_s4 + $0x10] sm:$0xff]  }
 0x20b   :  { %v947_v56 = vpack.c.bf16 %v930_v48, %v929_v47 }
 0x20d   :  { %3587 = vmatprep.subr.bf16.mxu0 %v947_v56 }
 0x20e   :  { %3588 = vmatpush3.bf16.msra.mxu0 %v939_v7 }
 0x20f   :  { %3589 = vmatprep.subr.bf16.mxu0 %v948_v29 }
 0x212   :  { %3590 = vmatpush3.bf16.msra.mxu0 %v940_v4 }
 0x213   :  { %3883 = vmatprep.subr.bf16.mxu0 %v4284_v31 }
 0x215   :  { %982 = vmatmul.mubr.bf16.vlgmr.msra.gmra.mrb[32].mxu0 %v4283_v26 }
 0x216   :  { %3899 = vmatprep.mubr.msk.bf16.mxu0 %vm4285_vm1, %v4284_v31  ;;  %3884 = vmatpush3.bf16.msra.mxu0 %v4190_v21  ;;  %v4199_v21 = vld [vmem:[%s5464_s2 + $0x48] sm:$0xff]  }
 0x217   :  { %3885 = vmatprep.subr.bf16.mxu0 %v4284_v31 }
 0x21a   :  { %3886 = vmatpush3.bf16.msra.mxu0 %v4191_v22 }
 0x21b   :  { %3887 = vmatprep.subr.bf16.mxu0 %v4284_v31 }
 0x21e   :  { %3888 = vmatpush3.bf16.msra.mxu0 %v4192_v25 }
 0x21f   :  { %3889 = vmatprep.subr.bf16.mxu0 %v4284_v31 }
 0x222   :  { %3890 = vmatpush3.bf16.msra.mxu0 %v4193_v34 }
 0x223   :  { %3891 = vmatprep.subr.bf16.mxu0 %v4284_v31 }
 0x226   :  { %3892 = vmatpush3.bf16.msra.mxu0 %v4194_v60 }
 0x227   :  { %3893 = vmatprep.subr.bf16.mxu0 %v4284_v31 }
 0x22a   :  { %3894 = vmatpush3.bf16.msra.mxu0 %v4195_v18 }
 0x22b   :  { %3895 = vmatprep.subr.bf16.mxu0 %v4284_v31 }
 0x22e   :  { %3896 = vmatpush3.bf16.msra.mxu0 %v4196_v9  ;;  %v4201_v9 = vld [vmem:[%s5464_s2 + $0x58] sm:$0xff]  }
 0x22f   :  { %3897 = vmatprep.subr.bf16.mxu0 %v4284_v31 }
 0x232   :  { %3898 = vmatpush3.bf16.msra.mxu0 %v4197_v13 }
 0x233   :  { %3939 = vmatprep.subr.bf16.mxu0 %v4198_v30 }
 0x2e8   :  { %v3591_v61 = vpop.f32.mrb[32].mxu0 }
 0x2e9   :  { %v3592_v0 = vpop.f32.mrb[33].mxu0 }
 0x2ea   :  { %v3593_v1 = vadd.f32 %v3592_v0, %v3591_v61  ;;  %v3594_v4 = vpop.f32.mrb[34].mxu0 }
 0x2eb   :  { %v3595_v7 = vpop.f32.mrb[35].mxu0 }
 0x2ec   :  { %v989_v46 = vpack.c.bf16 %v3593_v1, %v3593_v1 }
 0x2ee   :  { %3880 = vmatmul.mubr.bf16.vlgmr.msra.gmra.mrb[32].mxu1 %v989_v46 }
 0x2ef   :  { %3904 = vmatpush3.bf16.msra.mxu1 %v4188_v17  ;;  %3907 = vmatprep.mubr.msk.bf16.mxu1 %vm158_vm0, %v4248_v15 }
 0x2f0   :  { %3905 = vmatprep.subr.bf16.mxu1 %v4189_v14 }
 0x2f3   :  { %3906 = vmatpush3.bf16.msra.mxu1 %v4189_v14  ;;  %v4200_v14 = vld [vmem:[%s5464_s2 + $0x50] sm:$0xff]  }
 0x2f6   :  { %3908 = vmatmul.mubr.msk.bf16.vlgmr.msra.gmra.mrb[36].mxu1 %vm158_vm0, %v4249_v20 }
 0x2f7   :  { %3911 = vmatprep.mubr.msk.bf16.mxu1 %vm158_vm0, %v4250_v45 }
 0x2fe   :  { %3912 = vmatmul.mubr.msk.bf16.gmra.mrb[40].mxu1 %vm158_vm0, %v4251_v58 }
 0x2ff   :  { %3915 = vmatprep.mubr.msk.bf16.mxu1 %vm158_vm0, %v4252_v62 }
 0x306   :  { %3916 = vmatmul.mubr.msk.bf16.gmra.mrb[44].mxu1 %vm158_vm0, %v4253_v63 }
 0x307   :  { %3919 = vmatprep.mubr.msk.bf16.mxu1 %vm158_vm0, %v4254_v2 }
 0x30e   :  { %3920 = vmatmul.mubr.msk.bf16.gmra.mrb[48].mxu1 %vm158_vm0, %v4255_v54 }
 0x30f   :  { %3923 = vmatprep.mubr.msk.bf16.mxu1 %vm158_vm0, %v4256_v3 }
 0x316   :  { %3924 = vmatmul.mubr.msk.bf16.gmra.mrb[52].mxu1 %vm158_vm0, %v4257_v5 }
 0x317   :  { %3927 = vmatprep.mubr.msk.bf16.mxu1 %vm158_vm0, %v4258_v6 }
 0x31e   :  { %3928 = vmatmul.mubr.msk.bf16.gmra.mrb[56].mxu1 %vm158_vm0, %v4259_v8 }
 0x31f   :  { %3931 = vmatprep.mubr.msk.bf16.mxu1 %vm158_vm0, %v4260_v59 }
 0x326   :  { %3932 = vmatmul.mubr.msk.bf16.gmra.mrb[60].mxu1 %vm158_vm0, %v4261_v12 }
 0x327   :  { %3935 = vmatprep.mubr.msk.bf16.mxu1 %vm158_vm0, %v4262_v10 }
 0x32e   :  { %3936 = vmatmul.mubr.msk.bf16.gmra.mrb[64].mxu1 %vm158_vm0, %v4263_v11 }
 0x32f   :  { %2011 = vmatprep.mubr.bf16.mxu1 %v4283_v26 }
 0x3c1   :  { %v1092_v35 = vpop.f32.mrb[32].mxu1 }
 0x3c2   :  { %v1093_v37 = vadd.f32 %v1092_v35, %v1009_v32  ;;  %v3881_v36 = vpop.f32.mrb[33].mxu1 }
 0x3c3   :  { %v1095_v19 = vpop.f32.mrb[34].mxu1 }
 0x3c4   :  { %v1098_v33 = vadd.f32 3.0, %v1093_v37  ;;  %v3882_v51 = vpop.f32.mrb[35].mxu1 }
 0x3c6   :  { %v1099_v52 = vmax.f32 %v1098_v33, 0.0 }
 0x3c8   :  { %v1100_v43 = vmin.f32 %v1099_v52, 6.0 }
 0x3c9   :  { %v3909_v40 = vpop.f32.mrb[36].mxu1 }
 0x3ca   :  { %v1101_v44 = vmul.f32 %v1100_v43, %v1093_v37  ;;  %v1279_v49 = vadd.f32 %v3909_v40, %v4733_v57  ;;  %v1270_v42 = vpop.f32.mrb[37].mxu1 }
 0x3cb   :  { %v1271_v50 = vadd.f32 %v1270_v42, %v4733_v57  ;;  %v3910_v53 = vpop.f32.mrb[38].mxu1 }
 0x3cc   :  { %v1102_v38 = vmul.f32 0.16666667, %v1101_v44  ;;  %v1399_v55 = vadd.f32 3.0, %v1279_v49  ;;  %v1282_v47 = vadd.f32 %v3910_v53, %v4733_v57  ;;  %v1273_v48 = vpop.f32.mrb[39].mxu1 }
 0x3cd   :  { %v1397_v29 = vadd.f32 3.0, %v1271_v50  ;;  %v1274_v56 = vadd.f32 %v1273_v48, %v4733_v57 }
 0x3ce   :  { %v1103_v16 = vpack.c.bf16 %v1102_v38, %v1102_v38  ;;  %v1431_v17 = vmax.f32 %v1399_v55, 0.0  ;;  %v1400_v22 = vadd.f32 3.0, %v1282_v47 }
 0x3cf   :  { %v1429_v25 = vmax.f32 %v1397_v29, 0.0  ;;  %v1398_v34 = vadd.f32 3.0, %v1274_v56 }
 0x3d0   :  { %3900 = vmatmul.mubr.bf16.vlgmr.msra.gmra.mrb[36].mxu0 %v1103_v16  ;;  %v1463_v60 = vmin.f32 %v1431_v17, 6.0  ;;  %v1432_v61 = vmax.f32 %v1400_v22, 0.0 }
 0x3d1   :  { %3940 = vmatpush3.bf16.msra.mxu0 %v4198_v30  ;;  %v1461_v0 = vmin.f32 %v1429_v25, 6.0  ;;  %v1430_v1 = vmax.f32 %v1398_v34, 0.0  ;;  %v3913_v4 = vpop.f32.mrb[40].mxu1 }
 0x3d2   :  { %v1495_v7 = vmul.f32 %v1463_v60, %v1279_v49  ;;  %3941 = vmatprep.subr.bf16.mxu0 %v4199_v21  ;;  %v1464_v46 = vmin.f32 %v1432_v61, 6.0  ;;  %v1295_v15 = vadd.f32 %v3913_v4, %v4733_v57  ;;  %v1286_v20 = vpop.f32.mrb[41].mxu1  ;;  %v4202_v49 = vld [vmem:[%s5464_s2 + $0x60] sm:$0xff]  }
 0x3d3   :  { %v1493_v45 = vmul.f32 %v1461_v0, %v1271_v50  ;;  %v1462_v58 = vmin.f32 %v1430_v1, 6.0  ;;  %v1287_v62 = vadd.f32 %v1286_v20, %v4733_v57  ;;  %v3914_v63 = vpop.f32.mrb[42].mxu1  ;;  %v4203_v0 = vld [vmem:[%s5464_s2 + $0x68] sm:$0xff]  }
 0x3d4   :  { %v4747_v2 = vmul.f32 0.16666667, %v1495_v7  ;;  %v1496_v54 = vmul.f32 %v1464_v46, %v1282_v47  ;;  %v1403_v3 = vadd.f32 3.0, %v1295_v15  ;;  %v1298_v5 = vadd.f32 %v3914_v63, %v4733_v57  ;;  %v1289_v6 = vpop.f32.mrb[43].mxu1 }
 0x3d5   :  { %v1525_v8 = vmul.f32 0.16666667, %v1493_v45  ;;  %3942 = vmatpush3.bf16.msra.mxu0 %v4199_v21  ;;  %v1494_v59 = vmul.f32 %v1462_v58, %v1274_v56  ;;  %v1401_v12 = vadd.f32 3.0, %v1287_v62  ;;  %v1290_v10 = vadd.f32 %v1289_v6, %v4733_v57 }
 0x3d6   :  { %v4751_v11 = vmul.f32 0.16666667, %v1496_v54  ;;  %3943 = vmatprep.subr.bf16.mxu0 %v4200_v14  ;;  %v1435_v18 = vmax.f32 %v1403_v3, 0.0  ;;  %v1404_v13 = vadd.f32 3.0, %v1298_v5 }
 0x3d7   :  { %v1526_v30 = vmul.f32 0.16666667, %v1494_v59  ;;  %v1433_v32 = vmax.f32 %v1401_v12, 0.0  ;;  %v1402_v35 = vadd.f32 3.0, %v1290_v10 }
 0x3d8   :  { %v1558_v37 = vpack.c.bf16 %v4751_v11, %v4747_v2  ;;  %v1467_v36 = vmin.f32 %v1435_v18, 6.0  ;;  %v1436_v19 = vmax.f32 %v1404_v13, 0.0 }
 0x3d9   :  { %3944 = vmatpush3.bf16.msra.mxu0 %v4200_v14  ;;  %v1465_v33 = vmin.f32 %v1433_v32, 6.0  ;;  %v1434_v51 = vmax.f32 %v1402_v35, 0.0  ;;  %v3917_v52 = vpop.f32.mrb[44].mxu1  ;;  %v1557_v43 = vpack.c.bf16 %v1526_v30, %v1525_v8 }
 0x3da   :  { %v1499_v40 = vmul.f32 %v1467_v36, %v1295_v15  ;;  %3945 = vmatprep.subr.bf16.mxu0 %v4201_v9  ;;  %v1468_v44 = vmin.f32 %v1436_v19, 6.0  ;;  %v1311_v42 = vadd.f32 %v3917_v52, %v4733_v57  ;;  %v1302_v50 = vpop.f32.mrb[45].mxu1 }
 0x3db   :  { %v1497_v53 = vmul.f32 %v1465_v33, %v1287_v62  ;;  %v1466_v38 = vmin.f32 %v1434_v51, 6.0  ;;  %v1303_v55 = vadd.f32 %v1302_v50, %v4733_v57  ;;  %v3918_v47 = vpop.f32.mrb[46].mxu1  ;;  %3955 = vmatprep.mubr.bf16.mxu0 %v1557_v43 }
 0x3dc   :  { %v4763_v48 = vmul.f32 0.16666667, %v1499_v40  ;;  %v1500_v29 = vmul.f32 %v1468_v44, %v1298_v5  ;;  %v1407_v56 = vadd.f32 3.0, %v1311_v42  ;;  %v1314_v16 = vadd.f32 %v3918_v47, %v4733_v57  ;;  %v1305_v17 = vpop.f32.mrb[47].mxu1  ;;  %v4204_v5 = vld [vmem:[%s5464_s2 + $0x70] sm:$0xff]   ;;  %v4205_v40 = vld [vmem:[%s5464_s2 + $0x78] sm:$0xff]  }
 0x3dd   :  { %v4766_v21 = vmul.f32 0.16666667, %v1497_v53  ;;  %3946 = vmatpush3.bf16.msra.mxu0 %v4201_v9  ;;  %v1498_v22 = vmul.f32 %v1466_v38, %v1290_v10  ;;  %v1405_v25 = vadd.f32 3.0, %v1303_v55  ;;  %v1306_v34 = vadd.f32 %v1305_v17, %v4733_v57 }
 0x3de   :  { %v4769_v60 = vmul.f32 0.16666667, %v1500_v29  ;;  %3947 = vmatprep.subr.bf16.mxu0 %v4202_v49  ;;  %v1439_v61 = vmax.f32 %v1407_v56, 0.0  ;;  %v1408_v1 = vadd.f32 3.0, %v1314_v16 }
 0x3df   :  { %v4774_v4 = vmul.f32 0.16666667, %v1498_v22  ;;  %v1437_v7 = vmax.f32 %v1405_v25, 0.0  ;;  %v1406_v46 = vadd.f32 3.0, %v1306_v34 }
 0x3e0   :  { %v1471_v14 = vmin.f32 %v1439_v61, 6.0  ;;  %v1440_v15 = vmax.f32 %v1408_v1, 0.0  ;;  %v1560_v20 = vpack.c.bf16 %v4769_v60, %v4763_v48 }
 0x3e1   :  { %3948 = vmatpush3.bf16.msra.mxu0 %v4202_v49  ;;  %v1469_v45 = vmin.f32 %v1437_v7, 6.0  ;;  %v1438_v58 = vmax.f32 %v1406_v46, 0.0  ;;  %v3921_v62 = vpop.f32.mrb[48].mxu1  ;;  %v1559_v63 = vpack.c.bf16 %v4774_v4, %v4766_v21 }
 0x3e2   :  { %v1503_v54 = vmul.f32 %v1471_v14, %v1311_v42  ;;  %3949 = vmatprep.subr.bf16.mxu0 %v4203_v0  ;;  %v1472_v3 = vmin.f32 %v1440_v15, 6.0  ;;  %v1327_v6 = vadd.f32 %v3921_v62, %v4733_v57  ;;  %v1318_v8 = vpop.f32.mrb[49].mxu1 }
 0x3e3   :  { %v1501_v59 = vmul.f32 %v1469_v45, %v1303_v55  ;;  %v1470_v12 = vmin.f32 %v1438_v58, 6.0  ;;  %v1319_v10 = vadd.f32 %v1318_v8, %v4733_v57  ;;  %v3922_v18 = vpop.f32.mrb[50].mxu1 }
 0x3e4   :  { %v4785_v9 = vmul.f32 0.16666667, %v1503_v54  ;;  %v1504_v13 = vmul.f32 %v1472_v3, %v1314_v16  ;;  %v1411_v30 = vadd.f32 3.0, %v1327_v6  ;;  %v1330_v32 = vadd.f32 %v3922_v18, %v4733_v57  ;;  %v1321_v35 = vpop.f32.mrb[51].mxu1 }
 0x3e5   :  { %v4788_v36 = vmul.f32 0.16666667, %v1501_v59  ;;  %3950 = vmatpush3.bf16.msra.mxu0 %v4203_v0  ;;  %v1502_v19 = vmul.f32 %v1470_v12, %v1306_v34  ;;  %v1409_v33 = vadd.f32 3.0, %v1319_v10  ;;  %v1322_v51 = vadd.f32 %v1321_v35, %v4733_v57 }
 0x3e6   :  { %v4791_v52 = vmul.f32 0.16666667, %v1504_v13  ;;  %3951 = vmatprep.subr.bf16.mxu0 %v4204_v5  ;;  %v1443_v43 = vmax.f32 %v1411_v30, 0.0  ;;  %v1412_v44 = vadd.f32 3.0, %v1330_v32 }
 0x3e7   :  { %v4796_v49 = vmul.f32 0.16666667, %v1502_v19  ;;  %v1441_v42 = vmax.f32 %v1409_v33, 0.0  ;;  %v1410_v50 = vadd.f32 3.0, %v1322_v51 }
 0x3e8   :  { %v1475_v53 = vmin.f32 %v1443_v43, 6.0  ;;  %v1444_v38 = vmax.f32 %v1412_v44, 0.0  ;;  %v1562_v55 = vpack.c.bf16 %v4791_v52, %v4785_v9 }
 0x3e9   :  { %3952 = vmatpush3.bf16.msra.mxu0 %v4204_v5  ;;  %v1473_v47 = vmin.f32 %v1441_v42, 6.0  ;;  %v1442_v29 = vmax.f32 %v1410_v50, 0.0  ;;  %v3925_v56 = vpop.f32.mrb[52].mxu1  ;;  %v1561_v16 = vpack.c.bf16 %v4796_v49, %v4788_v36 }
 0x3ea   :  { %v1507_v17 = vmul.f32 %v1475_v53, %v1327_v6  ;;  %3953 = vmatprep.subr.bf16.mxu0 %v4205_v40  ;;  %v1476_v22 = vmin.f32 %v1444_v38, 6.0  ;;  %v1343_v25 = vadd.f32 %v3925_v56, %v4733_v57  ;;  %v1334_v34 = vpop.f32.mrb[53].mxu1 }
 0x3eb   :  { %v1505_v61 = vmul.f32 %v1473_v47, %v1319_v10  ;;  %v1474_v0 = vmin.f32 %v1442_v29, 6.0  ;;  %v1335_v1 = vadd.f32 %v1334_v34, %v4733_v57  ;;  %v3926_v7 = vpop.f32.mrb[54].mxu1 }
 0x3ec   :  { %v4804_v46 = vmul.f32 0.16666667, %v1507_v17  ;;  %v1508_v14 = vmul.f32 %v1476_v22, %v1330_v32  ;;  %v1415_v15 = vadd.f32 3.0, %v1343_v25  ;;  %v1346_v45 = vadd.f32 %v3926_v7, %v4733_v57  ;;  %v1337_v58 = vpop.f32.mrb[55].mxu1 }
 0x3ed   :  { %v4807_v62 = vmul.f32 0.16666667, %v1505_v61  ;;  %3954 = vmatpush3.bf16.msra.mxu0 %v4205_v40  ;;  %v1506_v54 = vmul.f32 %v1474_v0, %v1322_v51  ;;  %v1413_v3 = vadd.f32 3.0, %v1335_v1  ;;  %v1338_v5 = vadd.f32 %v1337_v58, %v4733_v57 }
 0x3ee   :  { %v4810_v6 = vmul.f32 0.16666667, %v1508_v14  ;;  %v1447_v8 = vmax.f32 %v1415_v15, 0.0  ;;  %v1416_v59 = vadd.f32 3.0, %v1346_v45  ;;  %3987 = vmatprep.subr.bf16.mxu0 %v4284_v31 }
 0x3ef   :  { %v4813_v12 = vmul.f32 0.16666667, %v1506_v54  ;;  %v1445_v10 = vmax.f32 %v1413_v3, 0.0  ;;  %v1414_v18 = vadd.f32 3.0, %v1338_v5 }
 0x3f0   :  { %3956 = vmatmul.mubr.bf16.vlgmr.msra.gmra.mrb[40].mxu0 %v1558_v37  ;;  %v1479_v13 = vmin.f32 %v1447_v8, 6.0  ;;  %v1448_v30 = vmax.f32 %v1416_v59, 0.0  ;;  %v1564_v32 = vpack.c.bf16 %v4810_v6, %v4804_v46 }
 0x3f1   :  { %3959 = vmatprep.mubr.bf16.mxu0 %v1559_v63  ;;  %v1477_v35 = vmin.f32 %v1445_v10, 6.0  ;;  %v1446_v19 = vmax.f32 %v1414_v18, 0.0  ;;  %v3929_v33 = vpop.f32.mrb[56].mxu1  ;;  %v1563_v51 = vpack.c.bf16 %v4813_v12, %v4807_v62 }
 0x3f2   :  { %v1511_v43 = vmul.f32 %v1479_v13, %v1343_v25  ;;  %v1480_v40 = vmin.f32 %v1448_v30, 6.0  ;;  %v1359_v2 = vadd.f32 %v3929_v33, %v4733_v57  ;;  %v1350_v11 = vpop.f32.mrb[57].mxu1 }
 0x3f3   :  { %v1509_v37 = vmul.f32 %v1477_v35, %v1335_v1  ;;  %v1478_v44 = vmin.f32 %v1446_v19, 6.0  ;;  %v1351_v42 = vadd.f32 %v1350_v11, %v4733_v57  ;;  %v3930_v50 = vpop.f32.mrb[58].mxu1 }
 0x3f4   :  { %v4827_v53 = vmul.f32 0.16666667, %v1511_v43  ;;  %v1512_v21 = vmul.f32 %v1480_v40, %v1346_v45  ;;  %v1419_v4 = vadd.f32 3.0, %v1359_v2  ;;  %v1362_v63 = vadd.f32 %v3930_v50, %v4733_v57  ;;  %v1353_v38 = vpop.f32.mrb[59].mxu1 }
 0x3f5   :  { %v4830_v47 = vmul.f32 0.16666667, %v1509_v37  ;;  %v1510_v29 = vmul.f32 %v1478_v44, %v1338_v5  ;;  %v1417_v56 = vadd.f32 3.0, %v1351_v42  ;;  %v1354_v17 = vadd.f32 %v1353_v38, %v4733_v57 }
 0x3f6   :  { %v4833_v22 = vmul.f32 0.16666667, %v1512_v21  ;;  %v1451_v25 = vmax.f32 %v1419_v4, 0.0  ;;  %v1420_v34 = vadd.f32 3.0, %v1362_v63 }
 0x3f7   :  { %v4835_v61 = vmul.f32 0.16666667, %v1510_v29  ;;  %v1449_v0 = vmax.f32 %v1417_v56, 0.0  ;;  %v1418_v1 = vadd.f32 3.0, %v1354_v17 }
 0x3f8   :  { %3960 = vmatmul.mubr.bf16.gmra.mrb[44].mxu0 %v1560_v20  ;;  %v1483_v7 = vmin.f32 %v1451_v25, 6.0  ;;  %v1452_v14 = vmax.f32 %v1420_v34, 0.0  ;;  %v1566_v15 = vpack.c.bf16 %v4833_v22, %v4827_v53  ;;  %v4207_v53 = vld [vmem:[%s5466_s3 + $0x48] sm:$0xff]   ;;  %v4208_v22 = vld [vmem:[%s5466_s3 + $0x50] sm:$0xff]  }
 0x3f9   :  { %3963 = vmatprep.mubr.bf16.mxu0 %v1561_v16  ;;  %v1481_v45 = vmin.f32 %v1449_v0, 6.0  ;;  %v1450_v58 = vmax.f32 %v1418_v1, 0.0  ;;  %v3933_v62 = vpop.f32.mrb[60].mxu1  ;;  %v1565_v54 = vpack.c.bf16 %v4835_v61, %v4830_v47 }
 0x3fa   :  { %v1515_v3 = vmul.f32 %v1483_v7, %v1359_v2  ;;  %v1484_v5 = vmin.f32 %v1452_v14, 6.0  ;;  %v1375_v48 = vadd.f32 %v3933_v62, %v4733_v57  ;;  %v1366_v60 = vpop.f32.mrb[61].mxu1 }
 0x3fb   :  { %v1513_v20 = vmul.f32 %v1481_v45, %v1351_v42  ;;  %v1482_v8 = vmin.f32 %v1450_v58, 6.0  ;;  %v1367_v59 = vadd.f32 %v1366_v60, %v4733_v57  ;;  %v3934_v12 = vpop.f32.mrb[62].mxu1 }
 0x3fc   :  { %v4849_v10 = vmul.f32 0.16666667, %v1515_v3  ;;  %v1516_v36 = vmul.f32 %v1484_v5, %v1362_v63  ;;  %v1423_v49 = vadd.f32 3.0, %v1375_v48  ;;  %v1378_v16 = vadd.f32 %v3934_v12, %v4733_v57  ;;  %v1369_v18 = vpop.f32.mrb[63].mxu1 }
 0x3fd   :  { %v1545_v13 = vmul.f32 0.16666667, %v1513_v20  ;;  %v1514_v30 = vmul.f32 %v1482_v8, %v1354_v17  ;;  %v1421_v35 = vadd.f32 3.0, %v1367_v59  ;;  %v1370_v19 = vadd.f32 %v1369_v18, %v4733_v57 }
 0x3fe   :  { %v1548_v33 = vmul.f32 0.16666667, %v1516_v36  ;;  %v1455_v43 = vmax.f32 %v1423_v49, 0.0  ;;  %v1424_v40 = vadd.f32 3.0, %v1378_v16 }
 0x3ff   :  { %v1546_v2 = vmul.f32 0.16666667, %v1514_v30  ;;  %v1453_v11 = vmax.f32 %v1421_v35, 0.0  ;;  %v1422_v37 = vadd.f32 3.0, %v1370_v19 }
 0x400   :  { %3964 = vmatmul.mubr.bf16.gmra.mrb[48].mxu0 %v1562_v55  ;;  %v1487_v44 = vmin.f32 %v1455_v43, 6.0  ;;  %v1456_v42 = vmax.f32 %v1424_v40, 0.0  ;;  %v1568_v50 = vpack.c.bf16 %v1548_v33, %v4849_v10 }
 0x401   :  { %3967 = vmatprep.mubr.bf16.mxu0 %v1563_v51  ;;  %v1485_v21 = vmin.f32 %v1453_v11, 6.0  ;;  %v1454_v4 = vmax.f32 %v1422_v37, 0.0  ;;  %v3937_v63 = vpop.f32.mrb[64].mxu1  ;;  %v1567_v38 = vpack.c.bf16 %v1546_v2, %v1545_v13  ;;  %v4210_v37 = vld [vmem:[%s5466_s3 + $0x60] sm:$0xff]  }
 0x402   :  { %v1519_v47 = vmul.f32 %v1487_v44, %v1375_v48  ;;  %v1488_v29 = vmin.f32 %v1456_v42, 6.0  ;;  %v1391_v56 = vadd.f32 %v3937_v63, %v4733_v57  ;;  %v1382_v17 = vpop.f32.mrb[65].mxu1 }
 0x403   :  { %v1517_v25 = vmul.f32 %v1485_v21, %v1367_v59  ;;  %v1486_v34 = vmin.f32 %v1454_v4, 6.0  ;;  %v1383_v61 = vadd.f32 %v1382_v17, %v4733_v57  ;;  %v3938_v9 = vpop.f32.mrb[66].mxu1  ;;  %v4212_v21 = vld [vmem:[%s5466_s3 + $0x70] sm:$0xff]   ;;  %v4907_v4 = vrot.slane %v4729_v41, %v4492_v39 }
 0x404   :  { %v1551_v52 = vmul.f32 0.16666667, %v1519_v47  ;;  %v1520_v55 = vmul.f32 %v1488_v29, %v1378_v16  ;;  %v1427_v0 = vadd.f32 3.0, %v1391_v56  ;;  %v1394_v1 = vadd.f32 %v3938_v9, %v4733_v57  ;;  %v1385_v51 = vpop.f32.mrb[67].mxu1 }
 0x405   :  { %v1549_v7 = vmul.f32 0.16666667, %v1517_v25  ;;  %v1518_v14 = vmul.f32 %v1486_v34, %v1370_v19  ;;  %v1425_v45 = vadd.f32 3.0, %v1383_v61  ;;  %v1386_v58 = vadd.f32 %v1385_v51, %v4733_v57 }
 0x406   :  { %v1552_v62 = vmul.f32 0.16666667, %v1520_v55  ;;  %v1459_v3 = vmax.f32 %v1427_v0, 0.0  ;;  %v1428_v5 = vadd.f32 3.0, %v1394_v1 }
 0x407   :  { %v1550_v48 = vmul.f32 0.16666667, %v1518_v14  ;;  %v1457_v60 = vmax.f32 %v1425_v45, 0.0  ;;  %v1426_v20 = vadd.f32 3.0, %v1386_v58 }
 0x408   :  { %3968 = vmatmul.mubr.bf16.gmra.mrb[52].mxu0 %v1564_v32  ;;  %v1491_v8 = vmin.f32 %v1459_v3, 6.0  ;;  %v1460_v59 = vmax.f32 %v1428_v5, 0.0  ;;  %v1570_v12 = vpack.c.bf16 %v1552_v62, %v1551_v52  ;;  %v4206_v32 = vld [vmem:[%s5466_s3 + $0x40] sm:$0xff]  }
 0x409   :  { %3971 = vmatprep.mubr.bf16.mxu0 %v1565_v54  ;;  %v1489_v10 = vmin.f32 %v1457_v60, 6.0  ;;  %v1458_v36 = vmax.f32 %v1426_v20, 0.0  ;;  %v1569_v49 = vpack.c.bf16 %v1550_v48, %v1549_v7  ;;  %3988 = vmatpush3.bf16.msra.mxu0 %v4206_v32  ;;  %v4209_v54 = vld [vmem:[%s5466_s3 + $0x58] sm:$0xff]  }
 0x40a   :  { %v1523_v16 = vmul.f32 %v1491_v8, %v1391_v56  ;;  %v1492_v18 = vmin.f32 %v1460_v59, 6.0  ;;  %3989 = vmatprep.subr.bf16.mxu0 %v4284_v31 }
 0x40b   :  { %v1521_v57 = vmul.f32 %v1489_v10, %v1383_v61  ;;  %v1490_v13 = vmin.f32 %v1458_v36, 6.0 }
 0x40c   :  { %v1555_v30 = vmul.f32 0.16666667, %v1523_v16  ;;  %v1524_v35 = vmul.f32 %v1492_v18, %v1394_v1 }
 0x40d   :  { %v1553_v19 = vmul.f32 0.16666667, %v1521_v57  ;;  %v1522_v33 = vmul.f32 %v1490_v13, %v1386_v58  ;;  %3990 = vmatpush3.bf16.msra.mxu0 %v4207_v53 }
 0x40e   :  { %v1556_v43 = vmul.f32 0.16666667, %v1524_v35  ;;  %3991 = vmatprep.subr.bf16.mxu0 %v4284_v31 }
 0x40f   :  { %v1554_v40 = vmul.f32 0.16666667, %v1522_v33 }
 0x410   :  { %3972 = vmatmul.mubr.bf16.gmra.mrb[56].mxu0 %v1566_v15  ;;  %v1572_v46 = vpack.c.bf16 %v1556_v43, %v1555_v30  ;;  %v4880_v15 = vsub.s32 3, %v4415_v27 }
 0x411   :  { %3975 = vmatprep.mubr.bf16.mxu0 %v1567_v38  ;;  %v1571_v6 = vpack.c.bf16 %v1554_v40, %v1553_v19  ;;  %3992 = vmatpush3.bf16.msra.mxu0 %v4208_v22 }
 0x412   :  { %v1123_v2 = vrot.slane %v4722_v24, %v4880_v15  ;;  %3993 = vmatprep.subr.bf16.mxu0 %v4284_v31  ;;  %v4211_v24 = vld [vmem:[%s5466_s3 + $0x68] sm:$0xff]  }
 0x415   :  { %3994 = vmatpush3.bf16.msra.mxu0 %v4209_v54 }
 0x416   :  { %3995 = vmatprep.subr.bf16.mxu0 %v4284_v31 }
 0x418   :  { %3976 = vmatmul.mubr.bf16.gmra.mrb[60].mxu0 %v1568_v50 }
 0x419   :  { %3979 = vmatprep.mubr.bf16.mxu0 %v1569_v49  ;;  %3996 = vmatpush3.bf16.msra.mxu0 %v4210_v37 }
 0x41a   :  { %3997 = vmatprep.subr.bf16.mxu0 %v4284_v31 }
 0x41d   :  { %3998 = vmatpush3.bf16.msra.mxu0 %v4211_v24 }
 0x41e   :  { %3999 = vmatprep.subr.bf16.mxu0 %v4284_v31 }
 0x420   :  { %3980 = vmatmul.mubr.bf16.gmra.mrb[64].mxu0 %v1570_v12 }
 0x421   :  { %3983 = vmatprep.mubr.bf16.mxu0 %v1571_v6  ;;  %4000 = vmatpush3.bf16.msra.mxu0 %v4212_v21 }
 0x422   :  { %4001 = vmatprep.subr.bf16.mxu0 %v4284_v31 }
 0x428   :  { %3984 = vmatmul.mubr.bf16.gmra.mrb[68].mxu0 %v1572_v46 }
 0x429   :  { %4003 = vmatprep.mubr.msk.bf16.mxu0 %vm4285_vm1, %v4284_v31 }
 0x4a3   :  { %v1206_v11 = vpop.f32.mrb[36].mxu0 }
 0x4a4   :  { %v1207_v27 = vadd.f32 %v1206_v11, %v1123_v2  ;;  %v3901_v44 = vpop.f32.mrb[37].mxu0 }
 0x4a5   :  { %v1209_v42 = vpop.f32.mrb[38].mxu0 }
 0x4a6   :  { %1212 = vst [vmem:[%s5468_s6] sm:$0xff] %v1207_v27  ;;  %v3902_v50 = vpop.f32.mrb[39].mxu0 }
 0x4c3   :  { %v3957_v63 = vpop.f32.mrb[40].mxu0 }
 0x4c4   :  { %v1685_v38 = vadd.f32 %v3957_v63, %v4907_v4  ;;  %v1676_v47 = vpop.f32.mrb[41].mxu0 }
 0x4c5   :  { %v1677_v29 = vadd.f32 %v1676_v47, %v4907_v4  ;;  %v3958_v56 = vpop.f32.mrb[42].mxu0 }
 0x4c6   :  { %v1805_v17 = vadd.f32 3.0, %v1685_v38  ;;  %v1688_v25 = vadd.f32 %v3958_v56, %v4907_v4  ;;  %v1679_v34 = vpop.f32.mrb[43].mxu0 }
 0x4c7   :  { %v1803_v61 = vadd.f32 3.0, %v1677_v29  ;;  %v1680_v9 = vadd.f32 %v1679_v34, %v4907_v4 }
 0x4c8   :  { %v1837_v52 = vmax.f32 %v1805_v17, 0.0  ;;  %v1806_v55 = vadd.f32 3.0, %v1688_v25 }
 0x4c9   :  { %v1835_v0 = vmax.f32 %v1803_v61, 0.0  ;;  %v1804_v1 = vadd.f32 3.0, %v1680_v9 }
 0x4ca   :  { %v1869_v41 = vmin.f32 %v1837_v52, 6.0  ;;  %v1838_v51 = vmax.f32 %v1806_v55, 0.0 }
 0x4cb   :  { %v1867_v7 = vmin.f32 %v1835_v0, 6.0  ;;  %v1836_v14 = vmax.f32 %v1804_v1, 0.0  ;;  %v3961_v45 = vpop.f32.mrb[44].mxu0 }
 0x4cc   :  { %v1901_v58 = vmul.f32 %v1869_v41, %v1685_v38  ;;  %v1870_v62 = vmin.f32 %v1838_v51, 6.0  ;;  %v1701_v3 = vadd.f32 %v3961_v45, %v4907_v4  ;;  %v1692_v5 = vpop.f32.mrb[45].mxu0 }
 0x4cd   :  { %v1899_v48 = vmul.f32 %v1867_v7, %v1677_v29  ;;  %v1868_v60 = vmin.f32 %v1836_v14, 6.0  ;;  %v1693_v20 = vadd.f32 %v1692_v5, %v4907_v4  ;;  %v3962_v8 = vpop.f32.mrb[46].mxu0 }
 0x4ce   :  { %v1902_v59 = vmul.f32 %v1870_v62, %v1688_v25  ;;  %v1809_v12 = vadd.f32 3.0, %v1701_v3  ;;  %v1704_v10 = vadd.f32 %v3962_v8, %v4907_v4  ;;  %v1695_v36 = vpop.f32.mrb[47].mxu0  ;;  %v4917_v57 = vmul.f32 0.16666667, %v1901_v58 }
 0x4cf   :  { %v1900_v49 = vmul.f32 %v1868_v60, %v1680_v9  ;;  %v1807_v16 = vadd.f32 3.0, %v1693_v20  ;;  %v1696_v18 = vadd.f32 %v1695_v36, %v4907_v4  ;;  %v4921_v19 = vmul.f32 0.16666667, %v1899_v48 }
 0x4d0   :  { %v4919_v13 = vmul.f32 0.16666667, %v1902_v59  ;;  %v1841_v30 = vmax.f32 %v1809_v12, 0.0  ;;  %v1810_v35 = vadd.f32 3.0, %v1704_v10 }
 0x4d1   :  { %v4923_v33 = vmul.f32 0.16666667, %v1900_v49  ;;  %v1839_v43 = vmax.f32 %v1807_v16, 0.0  ;;  %v1808_v40 = vadd.f32 3.0, %v1696_v18 }
 0x4d2   :  { %v1964_v46 = vpack.c.bf16 %v4919_v13, %v4917_v57  ;;  %v1873_v6 = vmin.f32 %v1841_v30, 6.0  ;;  %v1842_v32 = vmax.f32 %v1810_v35, 0.0 }
 0x4d3   :  { %v1963_v53 = vpack.c.bf16 %v4923_v33, %v4921_v19  ;;  %v1871_v22 = vmin.f32 %v1839_v43, 6.0  ;;  %v1840_v54 = vmax.f32 %v1808_v40, 0.0  ;;  %v3965_v2 = vpop.f32.mrb[48].mxu0 }
 0x4d4   :  { %v1905_v11 = vmul.f32 %v1873_v6, %v1701_v3  ;;  %v1874_v37 = vmin.f32 %v1842_v32, 6.0  ;;  %v1717_v27 = vadd.f32 %v3965_v2, %v4907_v4  ;;  %v1708_v44 = vpop.f32.mrb[49].mxu0 }
 0x4d5   :  { %v1903_v42 = vmul.f32 %v1871_v22, %v1693_v20  ;;  %v1872_v50 = vmin.f32 %v1840_v54, 6.0  ;;  %v1709_v24 = vadd.f32 %v1708_v44, %v4907_v4  ;;  %v3966_v21 = vpop.f32.mrb[50].mxu0 }
 0x4d6   :  { %v1906_v63 = vmul.f32 %v1874_v37, %v1704_v10  ;;  %v1813_v38 = vadd.f32 3.0, %v1717_v27  ;;  %v1720_v47 = vadd.f32 %v3966_v21, %v4907_v4  ;;  %v1711_v29 = vpop.f32.mrb[51].mxu0  ;;  %v4933_v34 = vmul.f32 0.16666667, %v1905_v11 }
 0x4d7   :  { %v1904_v56 = vmul.f32 %v1872_v50, %v1696_v18  ;;  %v1811_v17 = vadd.f32 3.0, %v1709_v24  ;;  %v1712_v25 = vadd.f32 %v1711_v29, %v4907_v4  ;;  %v4937_v55 = vmul.f32 0.16666667, %v1903_v42 }
 0x4d8   :  { %v4935_v61 = vmul.f32 0.16666667, %v1906_v63  ;;  %v1845_v9 = vmax.f32 %v1813_v38, 0.0  ;;  %v1814_v52 = vadd.f32 3.0, %v1720_v47 }
 0x4d9   :  { %v4939_v0 = vmul.f32 0.16666667, %v1904_v56  ;;  %v1843_v1 = vmax.f32 %v1811_v17, 0.0  ;;  %v1812_v41 = vadd.f32 3.0, %v1712_v25 }
 0x4da   :  { %v1966_v51 = vpack.c.bf16 %v4935_v61, %v4933_v34  ;;  %v1877_v7 = vmin.f32 %v1845_v9, 6.0  ;;  %v1846_v14 = vmax.f32 %v1814_v52, 0.0 }
 0x4db   :  { %v1965_v45 = vpack.c.bf16 %v4939_v0, %v4937_v55  ;;  %v1875_v58 = vmin.f32 %v1843_v1, 6.0  ;;  %v1844_v62 = vmax.f32 %v1812_v41, 0.0  ;;  %v3969_v3 = vpop.f32.mrb[52].mxu0 }
 0x4dc   :  { %v1909_v5 = vmul.f32 %v1877_v7, %v1717_v27  ;;  %v1878_v48 = vmin.f32 %v1846_v14, 6.0  ;;  %v1733_v60 = vadd.f32 %v3969_v3, %v4907_v4  ;;  %v1724_v20 = vpop.f32.mrb[53].mxu0 }
 0x4dd   :  { %v1907_v8 = vmul.f32 %v1875_v58, %v1709_v24  ;;  %v1876_v59 = vmin.f32 %v1844_v62, 6.0  ;;  %v1725_v12 = vadd.f32 %v1724_v20, %v4907_v4  ;;  %v3970_v10 = vpop.f32.mrb[54].mxu0 }
 0x4de   :  { %v1910_v36 = vmul.f32 %v1878_v48, %v1720_v47  ;;  %v1817_v49 = vadd.f32 3.0, %v1733_v60  ;;  %v1736_v16 = vadd.f32 %v3970_v10, %v4907_v4  ;;  %v1727_v18 = vpop.f32.mrb[55].mxu0  ;;  %v4949_v40 = vmul.f32 0.16666667, %v1909_v5 }
 0x4df   :  { %v1908_v30 = vmul.f32 %v1876_v59, %v1712_v25  ;;  %v1815_v35 = vadd.f32 3.0, %v1725_v12  ;;  %v1728_v43 = vadd.f32 %v1727_v18, %v4907_v4  ;;  %v4953_v54 = vmul.f32 0.16666667, %v1907_v8 }
 0x4e0   :  { %v4951_v6 = vmul.f32 0.16666667, %v1910_v36  ;;  %v1849_v32 = vmax.f32 %v1817_v49, 0.0  ;;  %v1818_v22 = vadd.f32 3.0, %v1736_v16 }
 0x4e1   :  { %v4955_v2 = vmul.f32 0.16666667, %v1908_v30  ;;  %v1847_v11 = vmax.f32 %v1815_v35, 0.0  ;;  %v1816_v37 = vadd.f32 3.0, %v1728_v43 }
 0x4e2   :  { %v1968_v27 = vpack.c.bf16 %v4951_v6, %v4949_v40  ;;  %v1881_v44 = vmin.f32 %v1849_v32, 6.0  ;;  %v1850_v42 = vmax.f32 %v1818_v22, 0.0  ;;  %v4213_v40 = vld [vmem:[%s5466_s3 + $0x78] sm:$0xff]   ;;  %v4214_v6 = vld [vmem:[%s5462_s1 + $0x20] sm:$0xff]  }
 0x4e3   :  { %v1967_v50 = vpack.c.bf16 %v4955_v2, %v4953_v54  ;;  %v1879_v24 = vmin.f32 %v1847_v11, 6.0  ;;  %v1848_v21 = vmax.f32 %v1816_v37, 0.0  ;;  %v3973_v63 = vpop.f32.mrb[56].mxu0  ;;  %4002 = vmatpush3.bf16.msra.mxu0 %v4213_v40  ;;  %v4216_v54 = vld [vmem:[%s5467_s4 + $0x40] sm:$0xff]   ;;  %v4217_v2 = vld [vmem:[%s5467_s4 + $0x48] sm:$0xff]  }
 0x4e4   :  { %v1913_v38 = vmul.f32 %v1881_v44, %v1733_v60  ;;  %v1882_v47 = vmin.f32 %v1850_v42, 6.0  ;;  %v1749_v29 = vadd.f32 %v3973_v63, %v4907_v4  ;;  %v1740_v56 = vpop.f32.mrb[57].mxu0  ;;  %4027 = vmatprep.subr.bf16.mxu0 %v4214_v6 }
 0x4e5   :  { %v1911_v17 = vmul.f32 %v1879_v24, %v1725_v12  ;;  %v1880_v25 = vmin.f32 %v1848_v21, 6.0  ;;  %v1741_v9 = vadd.f32 %v1740_v56, %v4907_v4  ;;  %v3974_v52 = vpop.f32.mrb[58].mxu0 }
 0x4e6   :  { %v1914_v1 = vmul.f32 %v1882_v47, %v1736_v16  ;;  %v1821_v41 = vadd.f32 3.0, %v1749_v29  ;;  %v1752_v7 = vadd.f32 %v3974_v52, %v4907_v4  ;;  %v1743_v14 = vpop.f32.mrb[59].mxu0  ;;  %v4965_v5 = vmul.f32 0.16666667, %v1913_v38 }
 0x4e7   :  { %v1912_v58 = vmul.f32 %v1880_v25, %v1728_v43  ;;  %v1819_v62 = vadd.f32 3.0, %v1741_v9  ;;  %v1744_v3 = vadd.f32 %v1743_v14, %v4907_v4  ;;  %v4969_v8 = vmul.f32 0.16666667, %v1911_v17 }
 0x4e8   :  { %v4967_v48 = vmul.f32 0.16666667, %v1914_v1  ;;  %v1853_v60 = vmax.f32 %v1821_v41, 0.0  ;;  %v1822_v20 = vadd.f32 3.0, %v1752_v7 }
 0x4e9   :  { %v4971_v59 = vmul.f32 0.16666667, %v1912_v58  ;;  %v1851_v12 = vmax.f32 %v1819_v62, 0.0  ;;  %v1820_v10 = vadd.f32 3.0, %v1744_v3 }
 0x4ea   :  { %v1970_v36 = vpack.c.bf16 %v4967_v48, %v4965_v5  ;;  %v1885_v49 = vmin.f32 %v1853_v60, 6.0  ;;  %v1854_v16 = vmax.f32 %v1822_v20, 0.0  ;;  %v4220_v5 = vld [vmem:[%s5467_s4 + $0x60] sm:$0xff]  }
 0x4eb   :  { %v1969_v18 = vpack.c.bf16 %v4971_v59, %v4969_v8  ;;  %v1883_v30 = vmin.f32 %v1851_v12, 6.0  ;;  %v1852_v35 = vmax.f32 %v1820_v10, 0.0  ;;  %v3977_v43 = vpop.f32.mrb[60].mxu0 }
 0x4ec   :  { %v1917_v32 = vmul.f32 %v1885_v49, %v1749_v29  ;;  %v1886_v22 = vmin.f32 %v1854_v16, 6.0  ;;  %v1765_v11 = vadd.f32 %v3977_v43, %v4907_v4  ;;  %v1756_v37 = vpop.f32.mrb[61].mxu0 }
 0x4ed   :  { %v1915_v44 = vmul.f32 %v1883_v30, %v1741_v9  ;;  %v1884_v42 = vmin.f32 %v1852_v35, 6.0  ;;  %v1757_v24 = vadd.f32 %v1756_v37, %v4907_v4  ;;  %v3978_v21 = vpop.f32.mrb[62].mxu0 }
 0x4ee   :  { %v1918_v63 = vmul.f32 %v1886_v22, %v1752_v7  ;;  %v1825_v38 = vadd.f32 3.0, %v1765_v11  ;;  %v1768_v47 = vadd.f32 %v3978_v21, %v4907_v4  ;;  %v1759_v56 = vpop.f32.mrb[63].mxu0  ;;  %v1949_v1 = vmul.f32 0.16666667, %v1917_v32 }
 0x4ef   :  { %v1916_v17 = vmul.f32 %v1884_v42, %v1744_v3  ;;  %v1823_v25 = vadd.f32 3.0, %v1757_v24  ;;  %v1760_v52 = vadd.f32 %v1759_v56, %v4907_v4  ;;  %v1947_v58 = vmul.f32 0.16666667, %v1915_v44 }
 0x4f0   :  { %v1950_v29 = vmul.f32 0.16666667, %v1918_v63  ;;  %v1857_v41 = vmax.f32 %v1825_v38, 0.0  ;;  %v1826_v14 = vadd.f32 3.0, %v1768_v47 }
 0x4f1   :  { %v1948_v62 = vmul.f32 0.16666667, %v1916_v17  ;;  %v1855_v9 = vmax.f32 %v1823_v25, 0.0  ;;  %v1824_v60 = vadd.f32 3.0, %v1760_v52 }
 0x4f2   :  { %v1889_v20 = vmin.f32 %v1857_v41, 6.0  ;;  %v1858_v12 = vmax.f32 %v1826_v14, 0.0  ;;  %v1972_v10 = vpack.c.bf16 %v1950_v29, %v1949_v1 }
 0x4f3   :  { %v1887_v7 = vmin.f32 %v1855_v9, 6.0  ;;  %v1856_v49 = vmax.f32 %v1824_v60, 0.0  ;;  %v3981_v16 = vpop.f32.mrb[64].mxu0  ;;  %v1971_v30 = vpack.c.bf16 %v1948_v62, %v1947_v58 }
 0x4f4   :  { %v1921_v35 = vmul.f32 %v1889_v20, %v1765_v11  ;;  %v1890_v3 = vmin.f32 %v1858_v12, 6.0  ;;  %v1781_v43 = vadd.f32 %v3981_v16, %v4907_v4  ;;  %v1772_v22 = vpop.f32.mrb[65].mxu0 }
 0x4f5   :  { %v1919_v32 = vmul.f32 %v1887_v7, %v1757_v24  ;;  %v1888_v37 = vmin.f32 %v1856_v49, 6.0  ;;  %v1773_v42 = vadd.f32 %v1772_v22, %v4907_v4  ;;  %v3982_v44 = vpop.f32.mrb[66].mxu0  ;;  %3657 = vmatprep.subr.bf16.mxu1 %v1971_v30 }
 0x4f6   :  { %v1922_v21 = vmul.f32 %v1890_v3, %v1768_v47  ;;  %v1829_v63 = vadd.f32 3.0, %v1781_v43  ;;  %v1784_v38 = vadd.f32 %v3982_v44, %v4907_v4  ;;  %v1775_v56 = vpop.f32.mrb[67].mxu0  ;;  %3658 = vmatpush3.bf16.msra.mxu1 %v1963_v53  ;;  %v1953_v24 = vmul.f32 0.16666667, %v1921_v35 }
 0x4f7   :  { %v1920_v11 = vmul.f32 %v1888_v37, %v1760_v52  ;;  %v1827_v17 = vadd.f32 3.0, %v1773_v42  ;;  %v1776_v25 = vadd.f32 %v1775_v56, %v4907_v4  ;;  %3659 = vmatprep.subr.bf16.mxu1 %v1972_v10  ;;  %v1951_v14 = vmul.f32 0.16666667, %v1919_v32 }
 0x4f8   :  { %v1954_v1 = vmul.f32 0.16666667, %v1922_v21  ;;  %v1861_v29 = vmax.f32 %v1829_v63, 0.0  ;;  %v1830_v41 = vadd.f32 3.0, %v1784_v38 }
 0x4f9   :  { %v1952_v58 = vmul.f32 0.16666667, %v1920_v11  ;;  %v1859_v47 = vmax.f32 %v1827_v17, 0.0  ;;  %v1828_v62 = vadd.f32 3.0, %v1776_v25 }
 0x4fa   :  { %v1893_v9 = vmin.f32 %v1861_v29, 6.0  ;;  %v1862_v60 = vmax.f32 %v1830_v41, 0.0  ;;  %3660 = vmatpush3.bf16.msra.mxu1 %v1964_v46  ;;  %v1974_v19 = vpack.c.bf16 %v1954_v1, %v1953_v24 }
 0x4fb   :  { %v1891_v33 = vmin.f32 %v1859_v47, 6.0  ;;  %v1860_v53 = vmax.f32 %v1828_v62, 0.0  ;;  %v3985_v52 = vpop.f32.mrb[68].mxu0  ;;  %v1973_v20 = vpack.c.bf16 %v1952_v58, %v1951_v14 }
 0x4fc   :  { %v1925_v12 = vmul.f32 %v1893_v9, %v1781_v43  ;;  %v1894_v10 = vmin.f32 %v1862_v60, 6.0  ;;  %v1797_v7 = vadd.f32 %v3985_v52, %v4907_v4  ;;  %v1788_v49 = vpop.f32.mrb[69].mxu0  ;;  %v4266_v52 = vld [vmem:[%s5463_s0 + $0x8] sm:$0xff]  }
 0x4fd   :  { %v1923_v16 = vmul.f32 %v1891_v33, %v1773_v42  ;;  %v1892_v30 = vmin.f32 %v1860_v53, 6.0  ;;  %v1789_v35 = vadd.f32 %v1788_v49, %v4907_v4  ;;  %v3986_v3 = vpop.f32.mrb[70].mxu0  ;;  %3661 = vmatprep.subr.bf16.mxu1 %v1973_v20  ;;  %v4215_v33 = vld [vmem:[%s5462_s1 + $0x28] sm:$0xff]   ;;  %v4265_v53 = vld [vmem:[%s5463_s0] sm:$0xff]   ;;  %v4267_v20 = vld [vmem:[%s5463_s0 + $0x10] sm:$0xff]  }
 0x4fe   :  { %v1926_v22 = vmul.f32 %v1894_v10, %v1784_v38  ;;  %v1833_v32 = vadd.f32 3.0, %v1797_v7  ;;  %v1800_v57 = vadd.f32 %v3986_v3, %v4907_v4  ;;  %v1791_v13 = vpop.f32.mrb[71].mxu0  ;;  %3662 = vmatpush3.bf16.msra.mxu1 %v1965_v45  ;;  %v1957_v42 = vmul.f32 0.16666667, %v1925_v12  ;;  %v4268_v12 = vld [vmem:[%s5463_s0 + $0x18] sm:$0xff]   ;;  %v4269_v10 = vld [vmem:[%s5463_s0 + $0x20] sm:$0xff]  }
 0x4ff   :  { %v1924_v46 = vmul.f32 %v1892_v30, %v1776_v25  ;;  %v1831_v43 = vadd.f32 3.0, %v1789_v35  ;;  %v1792_v37 = vadd.f32 %v1791_v13, %v4907_v4  ;;  %3663 = vmatprep.subr.bf16.mxu1 %v1974_v19  ;;  %v1955_v56 = vmul.f32 0.16666667, %v1923_v16  ;;  %v4271_v49 = vld [vmem:[%s5463_s0 + $0x30] sm:$0xff]   ;;  %v4272_v16 = vld [vmem:[%s5463_s0 + $0x38] sm:$0xff]   ;;  %v4273_v30 = vld [vmem:[%s5463_s0 + $0x40] sm:$0xff]  }
 0x500   :  { %v1958_v44 = vmul.f32 0.16666667, %v1926_v22  ;;  %v1865_v21 = vmax.f32 %v1833_v32, 0.0  ;;  %v1834_v63 = vadd.f32 3.0, %v1800_v57  ;;  %v4275_v3 = vld [vmem:[%s5463_s0 + $0x50] sm:$0xff]   ;;  %v4276_v22 = vld [vmem:[%s5463_s0 + $0x58] sm:$0xff]  }
 0x501   :  { %v1956_v11 = vmul.f32 0.16666667, %v1924_v46  ;;  %v1863_v38 = vmax.f32 %v1831_v43, 0.0  ;;  %v1832_v17 = vadd.f32 3.0, %v1792_v37  ;;  %v4277_v32 = vld [vmem:[%s5463_s0 + $0x60] sm:$0xff]   ;;  %v4279_v13 = vld [vmem:[%s5463_s0 + $0x70] sm:$0xff]  }
 0x502   :  { %v1897_v24 = vmin.f32 %v1865_v21, 6.0  ;;  %v1866_v1 = vmax.f32 %v1834_v63, 0.0  ;;  %3664 = vmatpush3.bf16.msra.mxu1 %v1966_v51  ;;  %v1976_v55 = vpack.c.bf16 %v1958_v44, %v1957_v42  ;;  %v4280_v46 = vld [vmem:[%s5463_s0 + $0x78] sm:$0xff]   ;;  %v4221_v43 = vld [vmem:[%s5467_s4 + $0x68] sm:$0xff]   ;;  %v4224_v44 = vld [vmem:[%s5464_s2 + $0x80] sm:$0xff]  }
 0x503   :  { %v1895_v0 = vmin.f32 %v1863_v38, 6.0  ;;  %v1864_v45 = vmax.f32 %v1832_v17, 0.0  ;;  %v1975_v25 = vpack.c.bf16 %v1956_v11, %v1955_v56  ;;  %v4223_v42 = vld [vmem:[%s5467_s4 + $0x78] sm:$0xff]   ;;  %v5128_v21 = vld [vmem:[%s5465_s5 + $0x4] sm:$0xf] }
 0x504   :  { %v1929_v4 = vmul.f32 %v1897_v24, %v1797_v7  ;;  %v1898_v29 = vmin.f32 %v1866_v1, 6.0  ;;  %v4270_v7 = vld [vmem:[%s5463_s0 + $0x28] sm:$0xff]   ;;  %v2040_v63 = vrot.slane %v5128_v21, %v4717_v23 }
 0x505   :  { %v1927_v41 = vmul.f32 %v1895_v0, %v1789_v35  ;;  %v1896_v14 = vmin.f32 %v1864_v45, 6.0  ;;  %3665 = vmatprep.subr.bf16.mxu1 %v1975_v25  ;;  %v4274_v35 = vld [vmem:[%s5463_s0 + $0x48] sm:$0xff]  }
 0x506   :  { %v1930_v58 = vmul.f32 %v1898_v29, %v1800_v57  ;;  %3666 = vmatpush3.bf16.msra.mxu1 %v1967_v50  ;;  %v1961_v62 = vmul.f32 0.16666667, %v1929_v4  ;;  %v4219_v50 = vld [vmem:[%s5467_s4 + $0x58] sm:$0xff]   ;;  %v4278_v57 = vld [vmem:[%s5463_s0 + $0x68] sm:$0xff]  }
 0x507   :  { %v1928_v47 = vmul.f32 %v1896_v14, %v1792_v37  ;;  %3667 = vmatprep.subr.bf16.mxu1 %v1976_v55  ;;  %v1959_v34 = vmul.f32 0.16666667, %v1927_v41  ;;  %v4222_v37 = vld [vmem:[%s5467_s4 + $0x70] sm:$0xff]   ;;  %v5135_v24 = vld [vmem:[%s5465_s5 + $0x8] sm:$0xf] }
 0x508   :  { %v1962_v9 = vmul.f32 0.16666667, %v1930_v58  ;;  %v5139_v45 = vrot.slane %v5135_v24, %v4418_v28 }
 0x509   :  { %v1960_v61 = vmul.f32 0.16666667, %v1928_v47 }
 0x50a   :  { %3668 = vmatpush3.bf16.msra.mxu1 %v1968_v27  ;;  %v1978_v51 = vpack.c.bf16 %v1962_v9, %v1961_v62  ;;  %v4218_v27 = vld [vmem:[%s5467_s4 + $0x50] sm:$0xff]  }
 0x50b   :  { %v1977_v60 = vpack.c.bf16 %v1960_v61, %v1959_v34 }
 0x50d   :  { %3669 = vmatprep.subr.bf16.mxu1 %v1977_v60 }
 0x50e   :  { %3670 = vmatpush3.bf16.msra.mxu1 %v1969_v18 }
 0x50f   :  { %3671 = vmatprep.subr.bf16.mxu1 %v1978_v51 }
 0x512   :  { %3672 = vmatpush3.bf16.msra.mxu1 %v1970_v36 }
 0x513   :  { %4007 = vmatprep.subr.bf16.mxu1 %v4284_v31 }
 0x515   :  { %2012 = vmatmul.mubr.bf16.vlgmr.msra.gmra.mrb[68].mxu1 %v4283_v26 }
 0x516   :  { %4023 = vmatprep.mubr.msk.bf16.mxu1 %vm4285_vm1, %v4284_v31  ;;  %4008 = vmatpush3.bf16.msra.mxu1 %v4216_v54 }
 0x517   :  { %4009 = vmatprep.subr.bf16.mxu1 %v4284_v31 }
 0x51a   :  { %4010 = vmatpush3.bf16.msra.mxu1 %v4217_v2 }
 0x51b   :  { %4011 = vmatprep.subr.bf16.mxu1 %v4284_v31 }
 0x51e   :  { %4012 = vmatpush3.bf16.msra.mxu1 %v4218_v27 }
 0x51f   :  { %4013 = vmatprep.subr.bf16.mxu1 %v4284_v31 }
 0x522   :  { %4014 = vmatpush3.bf16.msra.mxu1 %v4219_v50 }
 0x523   :  { %4015 = vmatprep.subr.bf16.mxu1 %v4284_v31 }
 0x526   :  { %4016 = vmatpush3.bf16.msra.mxu1 %v4220_v5 }
 0x527   :  { %4017 = vmatprep.subr.bf16.mxu1 %v4284_v31 }
 0x52a   :  { %4018 = vmatpush3.bf16.msra.mxu1 %v4221_v43  ;;  %v4227_v43 = vld [vmem:[%s5464_s2 + $0x98] sm:$0xff]  }
 0x52b   :  { %4019 = vmatprep.subr.bf16.mxu1 %v4284_v31 }
 0x52e   :  { %4020 = vmatpush3.bf16.msra.mxu1 %v4222_v37 }
 0x52f   :  { %4021 = vmatprep.subr.bf16.mxu1 %v4284_v31 }
 0x532   :  { %4022 = vmatpush3.bf16.msra.mxu1 %v4223_v42 }
 0x533   :  { %4063 = vmatprep.subr.bf16.mxu1 %v4224_v44 }
 0x5e8   :  { %v3673_v48 = vpop.f32.mrb[68].mxu1 }
 0x5e9   :  { %v3674_v8 = vpop.f32.mrb[69].mxu1 }
 0x5ea   :  { %v3675_v59 = vadd.f32 %v3674_v8, %v3673_v48  ;;  %v3676_v36 = vpop.f32.mrb[70].mxu1 }
 0x5eb   :  { %v3677_v18 = vpop.f32.mrb[71].mxu1 }
 0x5ec   :  { %v2019_v19 = vpack.c.bf16 %v3675_v59, %v3675_v59 }
 0x5ee   :  { %4004 = vmatmul.mubr.bf16.vlgmr.msra.gmra.mrb[72].mxu0 %v2019_v19  ;;  %v4226_v19 = vld [vmem:[%s5464_s2 + $0x90] sm:$0xff]  }
 0x5ef   :  { %4028 = vmatpush3.bf16.msra.mxu0 %v4214_v6  ;;  %4031 = vmatprep.mubr.msk.bf16.mxu0 %vm158_vm0, %v4265_v53  ;;  %v4225_v6 = vld [vmem:[%s5464_s2 + $0x88] sm:$0xff]  }
 0x5f0   :  { %4029 = vmatprep.subr.bf16.mxu0 %v4215_v33 }
 0x5f3   :  { %4030 = vmatpush3.bf16.msra.mxu0 %v4215_v33 }
 0x5f6   :  { %4032 = vmatmul.mubr.msk.bf16.vlgmr.msra.gmra.mrb[76].mxu0 %vm158_vm0, %v4266_v52 }
 0x5f7   :  { %4035 = vmatprep.mubr.msk.bf16.mxu0 %vm158_vm0, %v4267_v20 }
 0x5fe   :  { %4036 = vmatmul.mubr.msk.bf16.gmra.mrb[80].mxu0 %vm158_vm0, %v4268_v12 }
 0x5ff   :  { %4039 = vmatprep.mubr.msk.bf16.mxu0 %vm158_vm0, %v4269_v10 }
 0x606   :  { %4040 = vmatmul.mubr.msk.bf16.gmra.mrb[84].mxu0 %vm158_vm0, %v4270_v7 }
 0x607   :  { %4043 = vmatprep.mubr.msk.bf16.mxu0 %vm158_vm0, %v4271_v49 }
 0x60e   :  { %4044 = vmatmul.mubr.msk.bf16.gmra.mrb[88].mxu0 %vm158_vm0, %v4272_v16 }
 0x60f   :  { %4047 = vmatprep.mubr.msk.bf16.mxu0 %vm158_vm0, %v4273_v30 }
 0x616   :  { %4048 = vmatmul.mubr.msk.bf16.gmra.mrb[92].mxu0 %vm158_vm0, %v4274_v35 }
 0x617   :  { %4051 = vmatprep.mubr.msk.bf16.mxu0 %vm158_vm0, %v4275_v3 }
 0x61e   :  { %4052 = vmatmul.mubr.msk.bf16.gmra.mrb[96].mxu0 %vm158_vm0, %v4276_v22 }
 0x61f   :  { %4055 = vmatprep.mubr.msk.bf16.mxu0 %vm158_vm0, %v4277_v32 }
 0x626   :  { %4056 = vmatmul.mubr.msk.bf16.gmra.mrb[100].mxu0 %vm158_vm0, %v4278_v57 }
 0x627   :  { %4059 = vmatprep.mubr.msk.bf16.mxu0 %vm158_vm0, %v4279_v13 }
 0x62e   :  { %4060 = vmatmul.mubr.msk.bf16.gmra.mrb[104].mxu0 %vm158_vm0, %v4280_v46 }
 0x62f   :  { %3044 = vmatprep.mubr.bf16.mxu0 %v4283_v26 }
 0x6c1   :  { %v2123_v56 = vpop.f32.mrb[72].mxu0 }
 0x6c2   :  { %v2124_v11 = vadd.f32 %v2123_v56, %v2040_v63  ;;  %v4005_v38 = vpop.f32.mrb[73].mxu0 }
 0x6c3   :  { %v2126_v17 = vpop.f32.mrb[74].mxu0 }
 0x6c4   :  { %v2129_v1 = vadd.f32 3.0, %v2124_v11  ;;  %v4006_v55 = vpop.f32.mrb[75].mxu0 }
 0x6c6   :  { %v2130_v0 = vmax.f32 %v2129_v1, 0.0 }
 0x6c8   :  { %v2131_v25 = vmin.f32 %v2130_v0, 6.0 }
 0x6c9   :  { %v4033_v4 = vpop.f32.mrb[76].mxu0 }
 0x6ca   :  { %v2132_v29 = vmul.f32 %v2131_v25, %v2124_v11  ;;  %v2312_v41 = vadd.f32 %v4033_v4, %v5139_v45  ;;  %v2303_v14 = vpop.f32.mrb[77].mxu0 }
 0x6cb   :  { %v2304_v58 = vadd.f32 %v2303_v14, %v5139_v45  ;;  %v4034_v47 = vpop.f32.mrb[78].mxu0 }
 0x6cc   :  { %v2133_v62 = vmul.f32 0.16666667, %v2132_v29  ;;  %v2432_v9 = vadd.f32 3.0, %v2312_v41  ;;  %v2315_v34 = vadd.f32 %v4034_v47, %v5139_v45  ;;  %v2306_v61 = vpop.f32.mrb[79].mxu0  ;;  %v4228_v29 = vld [vmem:[%s5464_s2 + $0xa0] sm:$0xff]  }
 0x6cd   :  { %v2430_v51 = vadd.f32 3.0, %v2304_v58  ;;  %v2307_v60 = vadd.f32 %v2306_v61, %v5139_v45 }
 0x6ce   :  { %v2134_v40 = vpack.c.bf16 %v2133_v62, %v2133_v62  ;;  %v2464_v28 = vmax.f32 %v2432_v9, 0.0  ;;  %v2433_v54 = vadd.f32 3.0, %v2315_v34 }
 0x6cf   :  { %v2462_v2 = vmax.f32 %v2430_v51, 0.0  ;;  %v2431_v27 = vadd.f32 3.0, %v2307_v60 }
 0x6d0   :  { %4024 = vmatmul.mubr.bf16.vlgmr.msra.gmra.mrb[72].mxu1 %v2134_v40  ;;  %v2496_v50 = vmin.f32 %v2464_v28, 6.0  ;;  %v2465_v5 = vmax.f32 %v2433_v54, 0.0 }
 0x6d1   :  { %4064 = vmatpush3.bf16.msra.mxu1 %v4224_v44  ;;  %v2494_v48 = vmin.f32 %v2462_v2, 6.0  ;;  %v2463_v8 = vmax.f32 %v2431_v27, 0.0  ;;  %v4037_v59 = vpop.f32.mrb[80].mxu0 }
 0x6d2   :  { %v2528_v36 = vmul.f32 %v2496_v50, %v2312_v41  ;;  %4065 = vmatprep.subr.bf16.mxu1 %v4225_v6  ;;  %v2497_v18 = vmin.f32 %v2465_v5, 6.0  ;;  %v2328_v33 = vadd.f32 %v4037_v59, %v5139_v45  ;;  %v2319_v53 = vpop.f32.mrb[81].mxu0  ;;  %v4229_v5 = vld [vmem:[%s5464_s2 + $0xa8] sm:$0xff]  }
 0x6d3   :  { %v2526_v52 = vmul.f32 %v2494_v48, %v2304_v58  ;;  %v2495_v20 = vmin.f32 %v2463_v8, 6.0  ;;  %v2320_v12 = vadd.f32 %v2319_v53, %v5139_v45  ;;  %v4038_v10 = vpop.f32.mrb[82].mxu0 }
 0x6d4   :  { %v5153_v7 = vmul.f32 0.16666667, %v2528_v36  ;;  %v2529_v49 = vmul.f32 %v2497_v18, %v2315_v34  ;;  %v2436_v16 = vadd.f32 3.0, %v2328_v33  ;;  %v2331_v30 = vadd.f32 %v4038_v10, %v5139_v45  ;;  %v2322_v35 = vpop.f32.mrb[83].mxu0 }
 0x6d5   :  { %v2558_v3 = vmul.f32 0.16666667, %v2526_v52  ;;  %4066 = vmatpush3.bf16.msra.mxu1 %v4225_v6  ;;  %v2527_v22 = vmul.f32 %v2495_v20, %v2307_v60  ;;  %v2434_v32 = vadd.f32 3.0, %v2320_v12  ;;  %v2323_v57 = vadd.f32 %v2322_v35, %v5139_v45 }
 0x6d6   :  { %v5157_v13 = vmul.f32 0.16666667, %v2529_v49  ;;  %4067 = vmatprep.subr.bf16.mxu1 %v4226_v19  ;;  %v2468_v46 = vmax.f32 %v2436_v16, 0.0  ;;  %v2437_v37 = vadd.f32 3.0, %v2331_v30  ;;  %v4230_v16 = vld [vmem:[%s5464_s2 + $0xb0] sm:$0xff]  }
 0x6d7   :  { %v2559_v42 = vmul.f32 0.16666667, %v2527_v22  ;;  %v2466_v44 = vmax.f32 %v2434_v32, 0.0  ;;  %v2435_v63 = vadd.f32 3.0, %v2323_v57 }
 0x6d8   :  { %v2591_v56 = vpack.c.bf16 %v5157_v13, %v5153_v7  ;;  %v2500_v11 = vmin.f32 %v2468_v46, 6.0  ;;  %v2469_v38 = vmax.f32 %v2437_v37, 0.0 }
 0x6d9   :  { %4068 = vmatpush3.bf16.msra.mxu1 %v4226_v19  ;;  %v2498_v17 = vmin.f32 %v2466_v44, 6.0  ;;  %v2467_v1 = vmax.f32 %v2435_v63, 0.0  ;;  %v4041_v55 = vpop.f32.mrb[84].mxu0  ;;  %v2590_v0 = vpack.c.bf16 %v2559_v42, %v2558_v3 }
 0x6da   :  { %v2532_v25 = vmul.f32 %v2500_v11, %v2328_v33  ;;  %4069 = vmatprep.subr.bf16.mxu1 %v4227_v43  ;;  %v2501_v4 = vmin.f32 %v2469_v38, 6.0  ;;  %v2344_v41 = vadd.f32 %v4041_v55, %v5139_v45  ;;  %v2335_v14 = vpop.f32.mrb[85].mxu0 }
 0x6db   :  { %v2530_v58 = vmul.f32 %v2498_v17, %v2320_v12  ;;  %v2499_v47 = vmin.f32 %v2467_v1, 6.0  ;;  %v2336_v62 = vadd.f32 %v2335_v14, %v5139_v45  ;;  %v4042_v9 = vpop.f32.mrb[86].mxu0  ;;  %4079 = vmatprep.mubr.bf16.mxu1 %v2590_v0  ;;  %v4231_v0 = vld [vmem:[%s5464_s2 + $0xb8] sm:$0xff]  }
 0x6dc   :  { %v5169_v34 = vmul.f32 0.16666667, %v2532_v25  ;;  %v2533_v61 = vmul.f32 %v2501_v4, %v2331_v30  ;;  %v2440_v51 = vadd.f32 3.0, %v2344_v41  ;;  %v2347_v60 = vadd.f32 %v4042_v9, %v5139_v45  ;;  %v2338_v40 = vpop.f32.mrb[87].mxu0 }
 0x6dd   :  { %v5172_v28 = vmul.f32 0.16666667, %v2530_v58  ;;  %4070 = vmatpush3.bf16.msra.mxu1 %v4227_v43  ;;  %v2531_v6 = vmul.f32 %v2499_v47, %v2323_v57  ;;  %v2438_v54 = vadd.f32 3.0, %v2336_v62  ;;  %v2339_v2 = vadd.f32 %v2338_v40, %v5139_v45 }
 0x6de   :  { %v5175_v27 = vmul.f32 0.16666667, %v2533_v61  ;;  %4071 = vmatprep.subr.bf16.mxu1 %v4228_v29  ;;  %v2472_v50 = vmax.f32 %v2440_v51, 0.0  ;;  %v2441_v48 = vadd.f32 3.0, %v2347_v60 }
 0x6df   :  { %v5180_v8 = vmul.f32 0.16666667, %v2531_v6  ;;  %v2470_v59 = vmax.f32 %v2438_v54, 0.0  ;;  %v2439_v36 = vadd.f32 3.0, %v2339_v2 }
 0x6e0   :  { %v2504_v18 = vmin.f32 %v2472_v50, 6.0  ;;  %v2473_v19 = vmax.f32 %v2441_v48, 0.0  ;;  %v2593_v33 = vpack.c.bf16 %v5175_v27, %v5169_v34 }
 0x6e1   :  { %4072 = vmatpush3.bf16.msra.mxu1 %v4228_v29  ;;  %v2502_v53 = vmin.f32 %v2470_v59, 6.0  ;;  %v2471_v52 = vmax.f32 %v2439_v36, 0.0  ;;  %v4045_v20 = vpop.f32.mrb[88].mxu0  ;;  %v2592_v12 = vpack.c.bf16 %v5180_v8, %v5172_v28 }
 0x6e2   :  { %v2536_v10 = vmul.f32 %v2504_v18, %v2344_v41  ;;  %4073 = vmatprep.subr.bf16.mxu1 %v4229_v5  ;;  %v2505_v49 = vmin.f32 %v2473_v19, 6.0  ;;  %v2360_v30 = vadd.f32 %v4045_v20, %v5139_v45  ;;  %v2351_v35 = vpop.f32.mrb[89].mxu0 }
 0x6e3   :  { %v2534_v3 = vmul.f32 %v2502_v53, %v2336_v62  ;;  %v2503_v22 = vmin.f32 %v2471_v52, 6.0  ;;  %v2352_v32 = vadd.f32 %v2351_v35, %v5139_v45  ;;  %v4046_v57 = vpop.f32.mrb[90].mxu0 }
 0x6e4   :  { %v5191_v46 = vmul.f32 0.16666667, %v2536_v10  ;;  %v2537_v43 = vmul.f32 %v2505_v49, %v2347_v60  ;;  %v2444_v37 = vadd.f32 3.0, %v2360_v30  ;;  %v2363_v42 = vadd.f32 %v4046_v57, %v5139_v45  ;;  %v2354_v44 = vpop.f32.mrb[91].mxu0 }
 0x6e5   :  { %v5194_v63 = vmul.f32 0.16666667, %v2534_v3  ;;  %4074 = vmatpush3.bf16.msra.mxu1 %v4229_v5  ;;  %v2535_v11 = vmul.f32 %v2503_v22, %v2339_v2  ;;  %v2442_v38 = vadd.f32 3.0, %v2352_v32  ;;  %v2355_v17 = vadd.f32 %v2354_v44, %v5139_v45 }
 0x6e6   :  { %v5197_v1 = vmul.f32 0.16666667, %v2537_v43  ;;  %4075 = vmatprep.subr.bf16.mxu1 %v4230_v16  ;;  %v2476_v55 = vmax.f32 %v2444_v37, 0.0  ;;  %v2445_v25 = vadd.f32 3.0, %v2363_v42 }
 0x6e7   :  { %v5202_v4 = vmul.f32 0.16666667, %v2535_v11  ;;  %v2474_v29 = vmax.f32 %v2442_v38, 0.0  ;;  %v2443_v41 = vadd.f32 3.0, %v2355_v17 }
 0x6e8   :  { %v2508_v14 = vmin.f32 %v2476_v55, 6.0  ;;  %v2477_v58 = vmax.f32 %v2445_v25, 0.0  ;;  %v2595_v47 = vpack.c.bf16 %v5197_v1, %v5191_v46 }
 0x6e9   :  { %4076 = vmatpush3.bf16.msra.mxu1 %v4230_v16  ;;  %v2506_v62 = vmin.f32 %v2474_v29, 6.0  ;;  %v2475_v9 = vmax.f32 %v2443_v41, 0.0  ;;  %v4049_v61 = vpop.f32.mrb[92].mxu0  ;;  %v2594_v51 = vpack.c.bf16 %v5202_v4, %v5194_v63 }
 0x6ea   :  { %v2540_v60 = vmul.f32 %v2508_v14, %v2360_v30  ;;  %4077 = vmatprep.subr.bf16.mxu1 %v4231_v0  ;;  %v2509_v40 = vmin.f32 %v2477_v58, 6.0  ;;  %v2376_v6 = vadd.f32 %v4049_v61, %v5139_v45  ;;  %v2367_v54 = vpop.f32.mrb[93].mxu0 }
 0x6eb   :  { %v2538_v2 = vmul.f32 %v2506_v62, %v2352_v32  ;;  %v2507_v50 = vmin.f32 %v2475_v9, 6.0  ;;  %v2368_v5 = vadd.f32 %v2367_v54, %v5139_v45  ;;  %v4050_v48 = vpop.f32.mrb[94].mxu0 }
 0x6ec   :  { %v5210_v59 = vmul.f32 0.16666667, %v2540_v60  ;;  %v2541_v36 = vmul.f32 %v2509_v40, %v2363_v42  ;;  %v2448_v18 = vadd.f32 3.0, %v2376_v6  ;;  %v2379_v19 = vadd.f32 %v4050_v48, %v5139_v45  ;;  %v2370_v53 = vpop.f32.mrb[95].mxu0 }
 0x6ed   :  { %v5213_v52 = vmul.f32 0.16666667, %v2538_v2  ;;  %4078 = vmatpush3.bf16.msra.mxu1 %v4231_v0  ;;  %v2539_v20 = vmul.f32 %v2507_v50, %v2355_v17  ;;  %v2446_v10 = vadd.f32 3.0, %v2368_v5  ;;  %v2371_v49 = vadd.f32 %v2370_v53, %v5139_v45 }
 0x6ee   :  { %v5216_v16 = vmul.f32 0.16666667, %v2541_v36  ;;  %v2480_v30 = vmax.f32 %v2448_v18, 0.0  ;;  %v2449_v35 = vadd.f32 3.0, %v2379_v19  ;;  %4111 = vmatprep.subr.bf16.mxu1 %v4284_v31 }
 0x6ef   :  { %v5219_v3 = vmul.f32 0.16666667, %v2539_v20  ;;  %v2478_v22 = vmax.f32 %v2446_v10, 0.0  ;;  %v2447_v32 = vadd.f32 3.0, %v2371_v49 }
 0x6f0   :  { %4080 = vmatmul.mubr.bf16.vlgmr.msra.gmra.mrb[76].mxu1 %v2591_v56  ;;  %v2512_v57 = vmin.f32 %v2480_v30, 6.0  ;;  %v2481_v43 = vmax.f32 %v2449_v35, 0.0  ;;  %v2597_v37 = vpack.c.bf16 %v5216_v16, %v5210_v59 }
 0x6f1   :  { %4083 = vmatprep.mubr.bf16.mxu1 %v2592_v12  ;;  %v2510_v42 = vmin.f32 %v2478_v22, 6.0  ;;  %v2479_v44 = vmax.f32 %v2447_v32, 0.0  ;;  %v2596_v11 = vpack.c.bf16 %v5219_v3, %v5213_v52  ;;  %v4053_v38 = vpop.f32.mrb[96].mxu0 }
 0x6f2   :  { %v2544_v17 = vmul.f32 %v2512_v57, %v2376_v6  ;;  %v2513_v55 = vmin.f32 %v2481_v43, 6.0  ;;  %v2392_v7 = vadd.f32 %v4053_v38, %v5139_v45  ;;  %v2383_v13 = vpop.f32.mrb[97].mxu0 }
 0x6f3   :  { %v2542_v56 = vmul.f32 %v2510_v42, %v2368_v5  ;;  %v2511_v0 = vmin.f32 %v2479_v44, 6.0  ;;  %v2384_v25 = vadd.f32 %v2383_v13, %v5139_v45  ;;  %v4054_v29 = vpop.f32.mrb[98].mxu0 }
 0x6f4   :  { %v5233_v41 = vmul.f32 0.16666667, %v2544_v17  ;;  %v2545_v28 = vmul.f32 %v2513_v55, %v2379_v19  ;;  %v2452_v8 = vadd.f32 3.0, %v2392_v7  ;;  %v2395_v12 = vadd.f32 %v4054_v29, %v5139_v45  ;;  %v2386_v14 = vpop.f32.mrb[99].mxu0 }
 0x6f5   :  { %v5236_v58 = vmul.f32 0.16666667, %v2542_v56  ;;  %v2543_v62 = vmul.f32 %v2511_v0, %v2371_v49  ;;  %v2450_v9 = vadd.f32 3.0, %v2384_v25  ;;  %v2387_v61 = vadd.f32 %v2386_v14, %v5139_v45 }
 0x6f6   :  { %v5239_v60 = vmul.f32 0.16666667, %v2545_v28  ;;  %v2484_v40 = vmax.f32 %v2452_v8, 0.0  ;;  %v2453_v6 = vadd.f32 3.0, %v2395_v12 }
 0x6f7   :  { %v5241_v54 = vmul.f32 0.16666667, %v2543_v62  ;;  %v2482_v2 = vmax.f32 %v2450_v9, 0.0  ;;  %v2451_v50 = vadd.f32 3.0, %v2387_v61 }
 0x6f8   :  { %4084 = vmatmul.mubr.bf16.gmra.mrb[80].mxu1 %v2593_v33  ;;  %v2516_v5 = vmin.f32 %v2484_v40, 6.0  ;;  %v2485_v48 = vmax.f32 %v2453_v6, 0.0  ;;  %v2599_v36 = vpack.c.bf16 %v5239_v60, %v5233_v41  ;;  %v4233_v41 = vld [vmem:[%s5466_s3 + $0x88] sm:$0xff]   ;;  %v4234_v60 = vld [vmem:[%s5466_s3 + $0x90] sm:$0xff]  }
 0x6f9   :  { %4087 = vmatprep.mubr.bf16.mxu1 %v2594_v51  ;;  %v2514_v18 = vmin.f32 %v2482_v2, 6.0  ;;  %v2483_v19 = vmax.f32 %v2451_v50, 0.0  ;;  %v2598_v53 = vpack.c.bf16 %v5241_v54, %v5236_v58  ;;  %v4057_v52 = vpop.f32.mrb[100].mxu0 }
 0x6fa   :  { %v2548_v20 = vmul.f32 %v2516_v5, %v2392_v7  ;;  %v2517_v10 = vmin.f32 %v2485_v48, 6.0  ;;  %v2408_v34 = vadd.f32 %v4057_v52, %v5139_v45  ;;  %v2399_v27 = vpop.f32.mrb[101].mxu0 }
 0x6fb   :  { %v2546_v33 = vmul.f32 %v2514_v18, %v2384_v25  ;;  %v2515_v49 = vmin.f32 %v2483_v19, 6.0  ;;  %v2400_v30 = vadd.f32 %v2399_v27, %v5139_v45  ;;  %v4058_v35 = vpop.f32.mrb[102].mxu0 }
 0x6fc   :  { %v5255_v3 = vmul.f32 0.16666667, %v2548_v20  ;;  %v2549_v63 = vmul.f32 %v2517_v10, %v2395_v12  ;;  %v2456_v4 = vadd.f32 3.0, %v2408_v34  ;;  %v2411_v51 = vadd.f32 %v4058_v35, %v5139_v45  ;;  %v2402_v22 = vpop.f32.mrb[103].mxu0 }
 0x6fd   :  { %v2578_v32 = vmul.f32 0.16666667, %v2546_v33  ;;  %v2547_v57 = vmul.f32 %v2515_v49, %v2387_v61  ;;  %v2454_v43 = vadd.f32 3.0, %v2400_v30  ;;  %v2403_v42 = vadd.f32 %v2402_v22, %v5139_v45 }
 0x6fe   :  { %v2581_v44 = vmul.f32 0.16666667, %v2549_v63  ;;  %v2488_v38 = vmax.f32 %v2456_v4, 0.0  ;;  %v2457_v17 = vadd.f32 3.0, %v2411_v51 }
 0x6ff   :  { %v2579_v55 = vmul.f32 0.16666667, %v2547_v57  ;;  %v2486_v7 = vmax.f32 %v2454_v43, 0.0  ;;  %v2455_v13 = vadd.f32 3.0, %v2403_v42 }
 0x700   :  { %4088 = vmatmul.mubr.bf16.gmra.mrb[84].mxu1 %v2595_v47  ;;  %v2520_v56 = vmin.f32 %v2488_v38, 6.0  ;;  %v2489_v0 = vmax.f32 %v2457_v17, 0.0  ;;  %v2601_v25 = vpack.c.bf16 %v2581_v44, %v5255_v3 }
 0x701   :  { %4091 = vmatprep.mubr.bf16.mxu1 %v2596_v11  ;;  %v2518_v29 = vmin.f32 %v2486_v7, 6.0  ;;  %v2487_v28 = vmax.f32 %v2455_v13, 0.0  ;;  %v4061_v8 = vpop.f32.mrb[104].mxu0  ;;  %v2600_v12 = vpack.c.bf16 %v2579_v55, %v2578_v32  ;;  %v4236_v55 = vld [vmem:[%s5466_s3 + $0xa0] sm:$0xff]  }
 0x702   :  { %v2552_v14 = vmul.f32 %v2520_v56, %v2408_v34  ;;  %v2521_v58 = vmin.f32 %v2489_v0, 6.0  ;;  %v2424_v62 = vadd.f32 %v4061_v8, %v5139_v45  ;;  %v2415_v9 = vpop.f32.mrb[105].mxu0 }
 0x703   :  { %v2550_v61 = vmul.f32 %v2518_v29, %v2400_v30  ;;  %v2519_v40 = vmin.f32 %v2487_v28, 6.0  ;;  %v2416_v6 = vadd.f32 %v2415_v9, %v5139_v45  ;;  %v4062_v46 = vpop.f32.mrb[106].mxu0  ;;  %v5310_v29 = vrot.slane %v5135_v24, %v4492_v39 }
 0x704   :  { %v2584_v1 = vmul.f32 0.16666667, %v2552_v14  ;;  %v2553_v47 = vmul.f32 %v2521_v58, %v2411_v51  ;;  %v2460_v54 = vadd.f32 3.0, %v2424_v62  ;;  %v2427_v2 = vadd.f32 %v4062_v46, %v5139_v45  ;;  %v2418_v11 = vpop.f32.mrb[107].mxu0 }
 0x705   :  { %v2582_v50 = vmul.f32 0.16666667, %v2550_v61  ;;  %v2551_v5 = vmul.f32 %v2519_v40, %v2403_v42  ;;  %v2458_v48 = vadd.f32 3.0, %v2416_v6  ;;  %v2419_v18 = vadd.f32 %v2418_v11, %v5139_v45 }
 0x706   :  { %v2585_v19 = vmul.f32 0.16666667, %v2553_v47  ;;  %v2492_v52 = vmax.f32 %v2460_v54, 0.0  ;;  %v2461_v20 = vadd.f32 3.0, %v2427_v2 }
 0x707   :  { %v2583_v10 = vmul.f32 0.16666667, %v2551_v5  ;;  %v2490_v34 = vmax.f32 %v2458_v48, 0.0  ;;  %v2459_v27 = vadd.f32 3.0, %v2419_v18 }
 0x708   :  { %4092 = vmatmul.mubr.bf16.gmra.mrb[88].mxu1 %v2597_v37  ;;  %v2524_v33 = vmin.f32 %v2492_v52, 6.0  ;;  %v2493_v49 = vmax.f32 %v2461_v20, 0.0  ;;  %v2603_v30 = vpack.c.bf16 %v2585_v19, %v2584_v1  ;;  %v4232_v37 = vld [vmem:[%s5466_s3 + $0x80] sm:$0xff]  }
 0x709   :  { %4095 = vmatprep.mubr.bf16.mxu1 %v2598_v53  ;;  %v2522_v35 = vmin.f32 %v2490_v34, 6.0  ;;  %v2491_v3 = vmax.f32 %v2459_v27, 0.0  ;;  %v2602_v63 = vpack.c.bf16 %v2583_v10, %v2582_v50  ;;  %4112 = vmatpush3.bf16.msra.mxu1 %v4232_v37  ;;  %v2155_v53 = vrot.slane %v5128_v21, %v4880_v15  ;;  %v4237_v21 = vld [vmem:[%s5466_s3 + $0xa8] sm:$0xff]  }
 0x70a   :  { %v2556_v4 = vmul.f32 %v2524_v33, %v2424_v62  ;;  %v2525_v51 = vmin.f32 %v2493_v49, 6.0  ;;  %4113 = vmatprep.subr.bf16.mxu1 %v4284_v31 }
 0x70b   :  { %v2554_v45 = vmul.f32 %v2522_v35, %v2416_v6  ;;  %v2523_v22 = vmin.f32 %v2491_v3, 6.0 }
 0x70c   :  { %v2588_v32 = vmul.f32 0.16666667, %v2556_v4  ;;  %v2557_v57 = vmul.f32 %v2525_v51, %v2427_v2 }
 0x70d   :  { %v2586_v43 = vmul.f32 0.16666667, %v2554_v45  ;;  %v2555_v42 = vmul.f32 %v2523_v22, %v2419_v18  ;;  %4114 = vmatpush3.bf16.msra.mxu1 %v4233_v41 }
 0x70e   :  { %v2589_v44 = vmul.f32 0.16666667, %v2557_v57  ;;  %4115 = vmatprep.subr.bf16.mxu1 %v4284_v31 }
 0x70f   :  { %v2587_v38 = vmul.f32 0.16666667, %v2555_v42 }
 0x710   :  { %4096 = vmatmul.mubr.bf16.gmra.mrb[92].mxu1 %v2599_v36  ;;  %v2605_v59 = vpack.c.bf16 %v2589_v44, %v2588_v32  ;;  %v4235_v36 = vld [vmem:[%s5466_s3 + $0x98] sm:$0xff]  }
 0x711   :  { %4099 = vmatprep.mubr.bf16.mxu1 %v2600_v12  ;;  %v2604_v16 = vpack.c.bf16 %v2587_v38, %v2586_v43  ;;  %4116 = vmatpush3.bf16.msra.mxu1 %v4234_v60 }
 0x712   :  { %4117 = vmatprep.subr.bf16.mxu1 %v4284_v31 }
 0x715   :  { %4118 = vmatpush3.bf16.msra.mxu1 %v4235_v36 }
 0x716   :  { %4119 = vmatprep.subr.bf16.mxu1 %v4284_v31 }
 0x718   :  { %4100 = vmatmul.mubr.bf16.gmra.mrb[96].mxu1 %v2601_v25  ;;  %v4238_v25 = vld [vmem:[%s5466_s3 + $0xb0] sm:$0xff]  }
 0x719   :  { %4103 = vmatprep.mubr.bf16.mxu1 %v2602_v63  ;;  %4120 = vmatpush3.bf16.msra.mxu1 %v4236_v55 }
 0x71a   :  { %4121 = vmatprep.subr.bf16.mxu1 %v4284_v31 }
 0x71d   :  { %4122 = vmatpush3.bf16.msra.mxu1 %v4237_v21 }
 0x71e   :  { %4123 = vmatprep.subr.bf16.mxu1 %v4284_v31 }
 0x720   :  { %4104 = vmatmul.mubr.bf16.gmra.mrb[100].mxu1 %v2603_v30 }
 0x721   :  { %4107 = vmatprep.mubr.bf16.mxu1 %v2604_v16  ;;  %4124 = vmatpush3.bf16.msra.mxu1 %v4238_v25 }
 0x722   :  { %4125 = vmatprep.subr.bf16.mxu1 %v4284_v31 }
 0x728   :  { %4108 = vmatmul.mubr.bf16.gmra.mrb[104].mxu1 %v2605_v59 }
 0x729   :  { %4127 = vmatprep.mubr.msk.bf16.mxu1 %vm4285_vm1, %v4284_v31 }
 0x7a3   :  { %v2238_v17 = vpop.f32.mrb[72].mxu1 }
 0x7a4   :  { %v2239_v7 = vadd.f32 %v2238_v17, %v2155_v53  ;;  %v4025_v13 = vpop.f32.mrb[73].mxu1 }
 0x7a5   :  { %v2241_v56 = vpop.f32.mrb[74].mxu1 }
 0x7a6   :  { %3436 = vst [vmem:[%s5468_s6 + $0x8] sm:$0xff] %v2239_v7  ;;  %v4026_v0 = vpop.f32.mrb[75].mxu1 }
 0x7c3   :  { %v4081_v28 = vpop.f32.mrb[76].mxu1 }
 0x7c4   :  { %v2718_v8 = vadd.f32 %v4081_v28, %v5310_v29  ;;  %v2709_v12 = vpop.f32.mrb[77].mxu1 }
 0x7c5   :  { %v2710_v14 = vadd.f32 %v2709_v12, %v5310_v29  ;;  %v4082_v58 = vpop.f32.mrb[78].mxu1 }
 0x7c6   :  { %v2838_v62 = vadd.f32 3.0, %v2718_v8  ;;  %v2721_v9 = vadd.f32 %v4082_v58, %v5310_v29  ;;  %v2712_v61 = vpop.f32.mrb[79].mxu1 }
 0x7c7   :  { %v2836_v40 = vadd.f32 3.0, %v2710_v14  ;;  %v2713_v6 = vadd.f32 %v2712_v61, %v5310_v29 }
 0x7c8   :  { %v2870_v46 = vmax.f32 %v2838_v62, 0.0  ;;  %v2839_v1 = vadd.f32 3.0, %v2721_v9 }
 0x7c9   :  { %v2868_v47 = vmax.f32 %v2836_v40, 0.0  ;;  %v2837_v54 = vadd.f32 3.0, %v2713_v6 }
 0x7ca   :  { %v2902_v39 = vmin.f32 %v2870_v46, 6.0  ;;  %v2871_v24 = vmax.f32 %v2839_v1, 0.0 }
 0x7cb   :  { %v2900_v2 = vmin.f32 %v2868_v47, 6.0  ;;  %v2869_v11 = vmax.f32 %v2837_v54, 0.0  ;;  %v4085_v50 = vpop.f32.mrb[80].mxu1 }
 0x7cc   :  { %v2934_v5 = vmul.f32 %v2902_v39, %v2718_v8  ;;  %v2903_v48 = vmin.f32 %v2871_v24, 6.0  ;;  %v2734_v18 = vadd.f32 %v4085_v50, %v5310_v29  ;;  %v2725_v19 = vpop.f32.mrb[81].mxu1 }
 0x7cd   :  { %v2932_v52 = vmul.f32 %v2900_v2, %v2710_v14  ;;  %v2901_v20 = vmin.f32 %v2869_v11, 6.0  ;;  %v2726_v10 = vadd.f32 %v2725_v19, %v5310_v29  ;;  %v4086_v34 = vpop.f32.mrb[82].mxu1 }
 0x7ce   :  { %v2935_v27 = vmul.f32 %v2903_v48, %v2721_v9  ;;  %v2842_v33 = vadd.f32 3.0, %v2734_v18  ;;  %v2737_v49 = vadd.f32 %v4086_v34, %v5310_v29  ;;  %v2728_v30 = vpop.f32.mrb[83].mxu1  ;;  %v5320_v4 = vmul.f32 0.16666667, %v2934_v5 }
 0x7cf   :  { %v2933_v35 = vmul.f32 %v2901_v20, %v2713_v6  ;;  %v2840_v3 = vadd.f32 3.0, %v2726_v10  ;;  %v2729_v63 = vadd.f32 %v2728_v30, %v5310_v29  ;;  %v5324_v32 = vmul.f32 0.16666667, %v2932_v52 }
 0x7d0   :  { %v5322_v51 = vmul.f32 0.16666667, %v2935_v27  ;;  %v2874_v45 = vmax.f32 %v2842_v33, 0.0  ;;  %v2843_v22 = vadd.f32 3.0, %v2737_v49 }
 0x7d1   :  { %v5326_v57 = vmul.f32 0.16666667, %v2933_v35  ;;  %v2872_v43 = vmax.f32 %v2840_v3, 0.0  ;;  %v2841_v42 = vadd.f32 3.0, %v2729_v63 }
 0x7d2   :  { %v2997_v44 = vpack.c.bf16 %v5322_v51, %v5320_v4  ;;  %v2906_v38 = vmin.f32 %v2874_v45, 6.0  ;;  %v2875_v59 = vmax.f32 %v2843_v22, 0.0 }
 0x7d3   :  { %v2996_v16 = vpack.c.bf16 %v5326_v57, %v5324_v32  ;;  %v2904_v37 = vmin.f32 %v2872_v43, 6.0  ;;  %v2873_v41 = vmax.f32 %v2841_v42, 0.0  ;;  %v4089_v60 = vpop.f32.mrb[84].mxu1 }
 0x7d4   :  { %v2938_v36 = vmul.f32 %v2906_v38, %v2734_v18  ;;  %v2907_v53 = vmin.f32 %v2875_v59, 6.0  ;;  %v2750_v17 = vadd.f32 %v4089_v60, %v5310_v29  ;;  %v2741_v55 = vpop.f32.mrb[85].mxu1 }
 0x7d5   :  { %v2936_v7 = vmul.f32 %v2904_v37, %v2726_v10  ;;  %v2905_v13 = vmin.f32 %v2873_v41, 6.0  ;;  %v2742_v56 = vadd.f32 %v2741_v55, %v5310_v29  ;;  %v4090_v0 = vpop.f32.mrb[86].mxu1 }
 0x7d6   :  { %v2939_v21 = vmul.f32 %v2907_v53, %v2737_v49  ;;  %v2846_v25 = vadd.f32 3.0, %v2750_v17  ;;  %v2753_v28 = vadd.f32 %v4090_v0, %v5310_v29  ;;  %v2744_v8 = vpop.f32.mrb[87].mxu1  ;;  %v5336_v62 = vmul.f32 0.16666667, %v2938_v36 }
 0x7d7   :  { %v2937_v12 = vmul.f32 %v2905_v13, %v2729_v63  ;;  %v2844_v14 = vadd.f32 3.0, %v2742_v56  ;;  %v2745_v58 = vadd.f32 %v2744_v8, %v5310_v29  ;;  %v5340_v6 = vmul.f32 0.16666667, %v2936_v7 }
 0x7d8   :  { %v5338_v9 = vmul.f32 0.16666667, %v2939_v21  ;;  %v2878_v61 = vmax.f32 %v2846_v25, 0.0  ;;  %v2847_v40 = vadd.f32 3.0, %v2753_v28 }
 0x7d9   :  { %v5342_v46 = vmul.f32 0.16666667, %v2937_v12  ;;  %v2876_v1 = vmax.f32 %v2844_v14, 0.0  ;;  %v2845_v47 = vadd.f32 3.0, %v2745_v58 }
 0x7da   :  { %v2999_v54 = vpack.c.bf16 %v5338_v9, %v5336_v62  ;;  %v2910_v39 = vmin.f32 %v2878_v61, 6.0  ;;  %v2879_v24 = vmax.f32 %v2847_v40, 0.0 }
 0x7db   :  { %v2998_v2 = vpack.c.bf16 %v5342_v46, %v5340_v6  ;;  %v2908_v11 = vmin.f32 %v2876_v1, 6.0  ;;  %v2877_v50 = vmax.f32 %v2845_v47, 0.0  ;;  %v4093_v5 = vpop.f32.mrb[88].mxu1 }
 0x7dc   :  { %v2942_v48 = vmul.f32 %v2910_v39, %v2750_v17  ;;  %v2911_v18 = vmin.f32 %v2879_v24, 6.0  ;;  %v2766_v19 = vadd.f32 %v4093_v5, %v5310_v29  ;;  %v2757_v52 = vpop.f32.mrb[89].mxu1 }
 0x7dd   :  { %v2940_v20 = vmul.f32 %v2908_v11, %v2742_v56  ;;  %v2909_v10 = vmin.f32 %v2877_v50, 6.0  ;;  %v2758_v34 = vadd.f32 %v2757_v52, %v5310_v29  ;;  %v4094_v27 = vpop.f32.mrb[90].mxu1 }
 0x7de   :  { %v2943_v33 = vmul.f32 %v2911_v18, %v2753_v28  ;;  %v2850_v49 = vadd.f32 3.0, %v2766_v19  ;;  %v2769_v30 = vadd.f32 %v4094_v27, %v5310_v29  ;;  %v2760_v35 = vpop.f32.mrb[91].mxu1  ;;  %v5352_v22 = vmul.f32 0.16666667, %v2942_v48 }
 0x7df   :  { %v2941_v3 = vmul.f32 %v2909_v10, %v2745_v58  ;;  %v2848_v63 = vadd.f32 3.0, %v2758_v34  ;;  %v2761_v45 = vadd.f32 %v2760_v35, %v5310_v29  ;;  %v5356_v59 = vmul.f32 0.16666667, %v2940_v20 }
 0x7e0   :  { %v5354_v43 = vmul.f32 0.16666667, %v2943_v33  ;;  %v2882_v42 = vmax.f32 %v2850_v49, 0.0  ;;  %v2851_v38 = vadd.f32 3.0, %v2769_v30 }
 0x7e1   :  { %v5358_v37 = vmul.f32 0.16666667, %v2941_v3  ;;  %v2880_v41 = vmax.f32 %v2848_v63, 0.0  ;;  %v2849_v60 = vadd.f32 3.0, %v2761_v45 }
 0x7e2   :  { %v3001_v36 = vpack.c.bf16 %v5354_v43, %v5352_v22  ;;  %v2914_v53 = vmin.f32 %v2882_v42, 6.0  ;;  %v2883_v17 = vmax.f32 %v2851_v38, 0.0  ;;  %v4239_v22 = vld [vmem:[%s5466_s3 + $0xb8] sm:$0xff]   ;;  %v4240_v43 = vld [vmem:[%s5467_s4 + $0x80] sm:$0xff]  }
 0x7e3   :  { %v3000_v55 = vpack.c.bf16 %v5358_v37, %v5356_v59  ;;  %v2912_v7 = vmin.f32 %v2880_v41, 6.0  ;;  %v2881_v13 = vmax.f32 %v2849_v60, 0.0  ;;  %v4097_v56 = vpop.f32.mrb[92].mxu1  ;;  %4126 = vmatpush3.bf16.msra.mxu1 %v4239_v22  ;;  %v4241_v59 = vld [vmem:[%s5467_s4 + $0x88] sm:$0xff]   ;;  %v4243_v37 = vld [vmem:[%s5467_s4 + $0x98] sm:$0xff]  }
 0x7e4   :  { %v2946_v0 = vmul.f32 %v2914_v53, %v2766_v19  ;;  %v2915_v21 = vmin.f32 %v2883_v17, 6.0  ;;  %v2782_v25 = vadd.f32 %v4097_v56, %v5310_v29  ;;  %v2773_v28 = vpop.f32.mrb[93].mxu1 }
 0x7e5   :  { %v2944_v8 = vmul.f32 %v2912_v7, %v2758_v34  ;;  %v2913_v12 = vmin.f32 %v2881_v13, 6.0  ;;  %v2774_v14 = vadd.f32 %v2773_v28, %v5310_v29  ;;  %v4098_v58 = vpop.f32.mrb[94].mxu1 }
 0x7e6   :  { %v2947_v61 = vmul.f32 %v2915_v21, %v2769_v30  ;;  %v2854_v40 = vadd.f32 3.0, %v2782_v25  ;;  %v2785_v1 = vadd.f32 %v4098_v58, %v5310_v29  ;;  %v2776_v47 = vpop.f32.mrb[95].mxu1  ;;  %v5368_v50 = vmul.f32 0.16666667, %v2946_v0 }
 0x7e7   :  { %v2945_v39 = vmul.f32 %v2913_v12, %v2761_v45  ;;  %v2852_v24 = vadd.f32 3.0, %v2774_v14  ;;  %v2777_v11 = vadd.f32 %v2776_v47, %v5310_v29  ;;  %v5372_v19 = vmul.f32 0.16666667, %v2944_v8 }
 0x7e8   :  { %v5370_v5 = vmul.f32 0.16666667, %v2947_v61  ;;  %v2886_v48 = vmax.f32 %v2854_v40, 0.0  ;;  %v2855_v18 = vadd.f32 3.0, %v2785_v1 }
 0x7e9   :  { %v5374_v52 = vmul.f32 0.16666667, %v2945_v39  ;;  %v2884_v20 = vmax.f32 %v2852_v24, 0.0  ;;  %v2853_v10 = vadd.f32 3.0, %v2777_v11 }
 0x7ea   :  { %v3003_v34 = vpack.c.bf16 %v5370_v5, %v5368_v50  ;;  %v2918_v27 = vmin.f32 %v2886_v48, 6.0  ;;  %v2887_v33 = vmax.f32 %v2855_v18, 0.0 }
 0x7eb   :  { %v3002_v49 = vpack.c.bf16 %v5374_v52, %v5372_v19  ;;  %v2916_v30 = vmin.f32 %v2884_v20, 6.0  ;;  %v2885_v35 = vmax.f32 %v2853_v10, 0.0  ;;  %v4101_v3 = vpop.f32.mrb[96].mxu1 }
 0x7ec   :  { %v2950_v63 = vmul.f32 %v2918_v27, %v2782_v25  ;;  %v2919_v45 = vmin.f32 %v2887_v33, 6.0  ;;  %v2798_v42 = vadd.f32 %v4101_v3, %v5310_v29  ;;  %v2789_v38 = vpop.f32.mrb[97].mxu1 }
 0x7ed   :  { %v2948_v41 = vmul.f32 %v2916_v30, %v2774_v14  ;;  %v2917_v60 = vmin.f32 %v2885_v35, 6.0  ;;  %v2790_v53 = vadd.f32 %v2789_v38, %v5310_v29  ;;  %v4102_v17 = vpop.f32.mrb[98].mxu1 }
 0x7ee   :  { %v2951_v7 = vmul.f32 %v2919_v45, %v2785_v1  ;;  %v2858_v13 = vadd.f32 3.0, %v2798_v42  ;;  %v2801_v56 = vadd.f32 %v4102_v17, %v5310_v29  ;;  %v2792_v0 = vpop.f32.mrb[99].mxu1  ;;  %v2982_v12 = vmul.f32 0.16666667, %v2950_v63 }
 0x7ef   :  { %v2949_v21 = vmul.f32 %v2917_v60, %v2777_v11  ;;  %v2856_v28 = vadd.f32 3.0, %v2790_v53  ;;  %v2793_v8 = vadd.f32 %v2792_v0, %v5310_v29  ;;  %v2980_v40 = vmul.f32 0.16666667, %v2948_v41 }
 0x7f0   :  { %v2983_v25 = vmul.f32 0.16666667, %v2951_v7  ;;  %v2890_v58 = vmax.f32 %v2858_v13, 0.0  ;;  %v2859_v61 = vadd.f32 3.0, %v2801_v56 }
 0x7f1   :  { %v2981_v47 = vmul.f32 0.16666667, %v2949_v21  ;;  %v2888_v14 = vmax.f32 %v2856_v28, 0.0  ;;  %v2857_v39 = vadd.f32 3.0, %v2793_v8 }
 0x7f2   :  { %v2922_v24 = vmin.f32 %v2890_v58, 6.0  ;;  %v2891_v48 = vmax.f32 %v2859_v61, 0.0  ;;  %v3005_v18 = vpack.c.bf16 %v2983_v25, %v2982_v12 }
 0x7f3   :  { %v2920_v1 = vmin.f32 %v2888_v14, 6.0  ;;  %v2889_v20 = vmax.f32 %v2857_v39, 0.0  ;;  %v4105_v10 = vpop.f32.mrb[100].mxu1  ;;  %v3004_v27 = vpack.c.bf16 %v2981_v47, %v2980_v40 }
 0x7f4   :  { %v2954_v33 = vmul.f32 %v2922_v24, %v2798_v42  ;;  %v2923_v11 = vmin.f32 %v2891_v48, 6.0  ;;  %v2814_v30 = vadd.f32 %v4105_v10, %v5310_v29  ;;  %v2805_v35 = vpop.f32.mrb[101].mxu1 }
 0x7f5   :  { %v2952_v3 = vmul.f32 %v2920_v1, %v2790_v53  ;;  %v2921_v63 = vmin.f32 %v2889_v20, 6.0  ;;  %v2806_v45 = vadd.f32 %v2805_v35, %v5310_v29  ;;  %v4106_v38 = vpop.f32.mrb[102].mxu1  ;;  %3739 = vmatprep.subr.bf16.mxu0 %v3004_v27 }
 0x7f6   :  { %v2955_v41 = vmul.f32 %v2923_v11, %v2801_v56  ;;  %v2862_v60 = vadd.f32 3.0, %v2814_v30  ;;  %v2817_v17 = vadd.f32 %v4106_v38, %v5310_v29  ;;  %v2808_v7 = vpop.f32.mrb[103].mxu1  ;;  %3740 = vmatpush3.bf16.msra.mxu0 %v2996_v16  ;;  %v2986_v53 = vmul.f32 0.16666667, %v2954_v33 }
 0x7f7   :  { %v2953_v42 = vmul.f32 %v2921_v63, %v2793_v8  ;;  %v2860_v13 = vadd.f32 3.0, %v2806_v45  ;;  %v2809_v0 = vadd.f32 %v2808_v7, %v5310_v29  ;;  %3741 = vmatprep.subr.bf16.mxu0 %v3005_v18  ;;  %v2984_v25 = vmul.f32 0.16666667, %v2952_v3 }
 0x7f8   :  { %v2987_v21 = vmul.f32 0.16666667, %v2955_v41  ;;  %v2894_v28 = vmax.f32 %v2862_v60, 0.0  ;;  %v2863_v12 = vadd.f32 3.0, %v2817_v17 }
 0x7f9   :  { %v2985_v58 = vmul.f32 0.16666667, %v2953_v42  ;;  %v2892_v56 = vmax.f32 %v2860_v13, 0.0  ;;  %v2861_v61 = vadd.f32 3.0, %v2809_v0 }
 0x7fa   :  { %v2926_v40 = vmin.f32 %v2894_v28, 6.0  ;;  %v2895_v47 = vmax.f32 %v2863_v12, 0.0  ;;  %3742 = vmatpush3.bf16.msra.mxu0 %v2997_v44  ;;  %v3007_v32 = vpack.c.bf16 %v2987_v21, %v2986_v53 }
 0x7fb   :  { %v2924_v57 = vmin.f32 %v2892_v56, 6.0  ;;  %v2893_v16 = vmax.f32 %v2861_v61, 0.0  ;;  %v4109_v8 = vpop.f32.mrb[104].mxu1  ;;  %v3006_v14 = vpack.c.bf16 %v2985_v58, %v2984_v25 }
 0x7fc   :  { %v2958_v39 = vmul.f32 %v2926_v40, %v2814_v30  ;;  %v2927_v24 = vmin.f32 %v2895_v47, 6.0  ;;  %v2830_v48 = vadd.f32 %v4109_v8, %v5310_v29  ;;  %v2821_v18 = vpop.f32.mrb[105].mxu1  ;;  %v4246_v40 = vld [vmem:[%s5467_s4 + $0xb0] sm:$0xff]   ;;  %v4247_v47 = vld [vmem:[%s5467_s4 + $0xb8] sm:$0xff]  }
 0x7fd   :  { %v2956_v1 = vmul.f32 %v2924_v57, %v2806_v45  ;;  %v2925_v20 = vmin.f32 %v2893_v16, 6.0  ;;  %v2822_v10 = vadd.f32 %v2821_v18, %v5310_v29  ;;  %v4110_v27 = vpop.f32.mrb[106].mxu1  ;;  %3743 = vmatprep.subr.bf16.mxu0 %v3006_v14 }
 0x7fe   :  { %v2959_v33 = vmul.f32 %v2927_v24, %v2817_v17  ;;  %v2866_v11 = vadd.f32 3.0, %v2830_v48  ;;  %v2833_v4 = vadd.f32 %v4110_v27, %v5310_v29  ;;  %v2824_v51 = vpop.f32.mrb[107].mxu1  ;;  %3744 = vmatpush3.bf16.msra.mxu0 %v2998_v2  ;;  %v2990_v3 = vmul.f32 0.16666667, %v2958_v39 }
 0x7ff   :  { %v2957_v44 = vmul.f32 %v2925_v20, %v2809_v0  ;;  %v2864_v30 = vadd.f32 3.0, %v2822_v10  ;;  %v2825_v35 = vadd.f32 %v2824_v51, %v5310_v29  ;;  %3745 = vmatprep.subr.bf16.mxu0 %v3007_v32  ;;  %v2988_v41 = vmul.f32 0.16666667, %v2956_v1  ;;  %v4282_v32 = vld [vmem:[%s5465_s5 + $0x8] sm:$0xf] }
 0x800   :  { %v2991_v63 = vmul.f32 0.16666667, %v2959_v33  ;;  %v2898_v45 = vmax.f32 %v2866_v11, 0.0  ;;  %v2867_v38 = vadd.f32 3.0, %v2833_v4  ;;  %v3073_v57 = vrot.slane %v4282_v32, %v4717_v23 }
 0x801   :  { %v2989_v60 = vmul.f32 0.16666667, %v2957_v44  ;;  %v2896_v17 = vmax.f32 %v2864_v30, 0.0  ;;  %v2865_v7 = vadd.f32 3.0, %v2825_v35  ;;  %v3188_v27 = vrot.slane %v4282_v32, %v4880_v15 }
 0x802   :  { %v2930_v42 = vmin.f32 %v2898_v45, 6.0  ;;  %v2899_v13 = vmax.f32 %v2867_v38, 0.0  ;;  %3746 = vmatpush3.bf16.msra.mxu0 %v2999_v54  ;;  %v3009_v6 = vpack.c.bf16 %v2991_v63, %v2990_v3 }
 0x803   :  { %v2928_v46 = vmin.f32 %v2896_v17, 6.0  ;;  %v2897_v2 = vmax.f32 %v2865_v7, 0.0  ;;  %v3008_v0 = vpack.c.bf16 %v2989_v60, %v2988_v41 }
 0x804   :  { %v2962_v29 = vmul.f32 %v2930_v42, %v2830_v48  ;;  %v2931_v53 = vmin.f32 %v2899_v13, 6.0 }
 0x805   :  { %v2960_v21 = vmul.f32 %v2928_v46, %v2822_v10  ;;  %v2929_v28 = vmin.f32 %v2897_v2, 6.0  ;;  %3747 = vmatprep.subr.bf16.mxu0 %v3008_v0 }
 0x806   :  { %v2963_v12 = vmul.f32 %v2931_v53, %v2833_v4  ;;  %3748 = vmatpush3.bf16.msra.mxu0 %v3000_v55  ;;  %v2994_v58 = vmul.f32 0.16666667, %v2962_v29 }
 0x807   :  { %v2961_v25 = vmul.f32 %v2929_v28, %v2825_v35  ;;  %3749 = vmatprep.subr.bf16.mxu0 %v3009_v6  ;;  %v2992_v62 = vmul.f32 0.16666667, %v2960_v21 }
 0x808   :  { %v2995_v56 = vmul.f32 0.16666667, %v2963_v12 }
 0x809   :  { %v2993_v9 = vmul.f32 0.16666667, %v2961_v25 }
 0x80a   :  { %3750 = vmatpush3.bf16.msra.mxu0 %v3001_v36  ;;  %v3011_v54 = vpack.c.bf16 %v2995_v56, %v2994_v58 }
 0x80b   :  { %v3010_v61 = vpack.c.bf16 %v2993_v9, %v2992_v62 }
 0x80d   :  { %3751 = vmatprep.subr.bf16.mxu0 %v3010_v61 }
 0x80e   :  { %3752 = vmatpush3.bf16.msra.mxu0 %v3002_v49  ;;  %v4245_v49 = vld [vmem:[%s5467_s4 + $0xa8] sm:$0xff]  }
 0x80f   :  { %3753 = vmatprep.subr.bf16.mxu0 %v3011_v54 }
 0x812   :  { %3754 = vmatpush3.bf16.msra.mxu0 %v3003_v34  ;;  %v4244_v34 = vld [vmem:[%s5467_s4 + $0xa0] sm:$0xff]  }
 0x813   :  { %4131 = vmatprep.subr.bf16.mxu0 %v4284_v31 }
 0x815   :  { %3045 = vmatmul.mubr.bf16.vlgmr.msra.gmra.mrb[108].mxu0 %v4283_v26  ;;  %v4242_v26 = vld [vmem:[%s5467_s4 + $0x90] sm:$0xff]  }
 0x816   :  { %4147 = vmatprep.mubr.msk.bf16.mxu0 %vm4285_vm1, %v4284_v31  ;;  %4132 = vmatpush3.bf16.msra.mxu0 %v4240_v43 }
 0x817   :  { %4133 = vmatprep.subr.bf16.mxu0 %v4284_v31 }
 0x81a   :  { %4134 = vmatpush3.bf16.msra.mxu0 %v4241_v59 }
 0x81b   :  { %4135 = vmatprep.subr.bf16.mxu0 %v4284_v31 }
 0x81e   :  { %4136 = vmatpush3.bf16.msra.mxu0 %v4242_v26 }
 0x81f   :  { %4137 = vmatprep.subr.bf16.mxu0 %v4284_v31 }
 0x822   :  { %4138 = vmatpush3.bf16.msra.mxu0 %v4243_v37 }
 0x823   :  { %4139 = vmatprep.subr.bf16.mxu0 %v4284_v31 }
 0x826   :  { %4140 = vmatpush3.bf16.msra.mxu0 %v4244_v34 }
 0x827   :  { %4141 = vmatprep.subr.bf16.mxu0 %v4284_v31 }
 0x82a   :  { %4142 = vmatpush3.bf16.msra.mxu0 %v4245_v49 }
 0x82b   :  { %4143 = vmatprep.subr.bf16.mxu0 %v4284_v31 }
 0x82e   :  { %4144 = vmatpush3.bf16.msra.mxu0 %v4246_v40 }
 0x82f   :  { %4145 = vmatprep.subr.bf16.mxu0 %v4284_v31 }
 0x832   :  { %4146 = vmatpush3.bf16.msra.mxu0 %v4247_v47 }
 0x8e8   :  { %v3755_v36 = vpop.f32.mrb[108].mxu0 }
 0x8e9   :  { %v3756_v55 = vpop.f32.mrb[109].mxu0 }
 0x8ea   :  { %v3757_v50 = vadd.f32 %v3756_v55, %v3755_v36  ;;  %v3758_v5 = vpop.f32.mrb[110].mxu0 }
 0x8eb   :  { %v3759_v19 = vpop.f32.mrb[111].mxu0 }
 0x8ec   :  { %v3052_v52 = vpack.c.bf16 %v3757_v50, %v3757_v50 }
 0x8ee   :  { %4128 = vmatmul.mubr.bf16.vlgmr.msra.gmra.mrb[108].mxu1 %v3052_v52 }
 0x9c1   :  { %v3156_v16 = vpop.f32.mrb[108].mxu1 }
 0x9c2   :  { %v3157_v8 = vadd.f32 %v3156_v16, %v3073_v57  ;;  %v4129_v14 = vpop.f32.mrb[109].mxu1 }
 0x9c3   :  { %v3159_v39 = vpop.f32.mrb[110].mxu1 }
 0x9c4   :  { %v3162_v24 = vadd.f32 3.0, %v3157_v8  ;;  %v4130_v48 = vpop.f32.mrb[111].mxu1 }
 0x9c6   :  { %v3163_v18 = vmax.f32 %v3162_v24, 0.0 }
 0x9c8   :  { %v3164_v1 = vmin.f32 %v3163_v18, 6.0 }
 0x9ca   :  { %v3165_v31 = vmul.f32 %v3164_v1, %v3157_v8 }
 0x9cc   :  { %v3166_v20 = vmul.f32 0.16666667, %v3165_v31 }
 0x9ce   :  { %v3167_v10 = vpack.c.bf16 %v3166_v20, %v3166_v20 }
 0x9d0   :  { %4148 = vmatmul.mubr.bf16.vlgmr.msra.gmra.mrb[112].mxu0 %v3167_v10 }
 0xaa3   :  { %v3271_v33 = vpop.f32.mrb[112].mxu0 }
 0xaa4   :  { %v3272_v11 = vadd.f32 %v3271_v33, %v3188_v27  ;;  %v4149_v4 = vpop.f32.mrb[113].mxu0 }
 0xaa5   :  { %v3274_v51 = vpop.f32.mrb[114].mxu0 }
 0xaa6   :  { %3532 = vst [vmem:[%s5468_s6 + $0x10] sm:$0xff] %v3272_v11  ;;  %v4150_v23 = vpop.f32.mrb[115].mxu0 }

</bundles_post_ra>
